<compile_context>
chip_gen: v5e
topology: v5e:2x2
jax: 0.10.0
libtpu: 0.0.40
codegen_flags: <defaults>
</compile_context>

<pallas_src>
import jax
import jax.numpy as jnp
from jax.experimental import pallas as pl
from jax.experimental.pallas import tpu as pltpu


# ---------------------------------------------------------------------------
# Pallas kernel: one tile of TR ROIs per grid step.
#   pooled[r, px, (py, c)] = Wx[r] @ ( transpose( Wy[r] @ feat[r] ) )
# ---------------------------------------------------------------------------
def _roi_align_tile_kernel(tb_ref, x_ref, wy_ref, wx_ref, o_ref):
    # tb_ref : (num_tiles,) int32 in SMEM  (scalar-prefetched feature block ids;
    #          consumed by the index_maps, unused in the body)
    # x_ref  : (TR, H, W*C)  channels-last features for the TR rois of this tile
    # wy_ref : (TR, P, H)    y-axis interpolation weights
    # wx_ref : (TR, P, W)    x-axis interpolation weights
    # o_ref  : (TR, P, P*C)  lane-dense pooled output, element order (px, py, c)
    del tb_ref
    tr, p, h = wy_ref.shape
    w = wx_ref.shape[2]
    wc = x_ref.shape[2]
    c = wc // w

    # H-contraction (native batched matmul, N dim = W*C, f32 accumulation):
    #   a[r, py, (w, c)] = sum_h Wy[r, py, h] * feat[r, h, (w, c)]
    a = jax.lax.dot_general(
        wy_ref[...], x_ref[...],
        (((2,), (1,)), ((0,), (0,))),
        preferred_element_type=jnp.float32,
    )

    # Single unavoidable relayout between the two contractions, done in bf16:
    #   (py, w, c) -> (w, py*c).  Re-quantizes the f32 accumulator to bf16
    #   before the second matmul (documented extra rounding source).
    a = a.astype(wx_ref.dtype).reshape(tr, p, w, c)
    a = jnp.transpose(a, (0, 2, 1, 3)).reshape(tr, w, p * c)

    # W-contraction (native batched matmul, N dim = P*C with C minor/lanes):
    #   o[r, px, (py, c)] = sum_w Wx[r, px, w] * a[r, w, (py, c)]
    o = jax.lax.dot_general(
        wx_ref[...], a,
        (((2,), (1,)), ((0,), (0,))),
        preferred_element_type=jnp.float32,
    )
    o_ref[...] = o.astype(o_ref.dtype)


# ---------------------------------------------------------------------------
# Glue: separable bilinear-interpolation matrices (legacy ROIAlign rules).
# ---------------------------------------------------------------------------
def _axis_weights(c0, c1, spatial_scale, pooled, sampling_ratio, dim):
    """Weights W[r, p, d] so that pooled row p = sum_d W[r,p,d] * feature[d]."""
    start = c0 * spatial_scale                     # (R,)
    end = c1 * spatial_scale
    length = jnp.maximum(end - start, 1.0)         # roi dim clamped to >= 1
    bin_sz = length / pooled                       # (R,)

    p = jnp.arange(pooled, dtype=jnp.float32)           # (P,)
    g = jnp.arange(sampling_ratio, dtype=jnp.float32)   # (S,)
    # sample coordinates: (R, P, S)
    coords = (start[:, None, None]
              + p[None, :, None] * bin_sz[:, None, None]
              + (g[None, None, :] + 0.5) * bin_sz[:, None, None] / sampling_ratio)

    in_range = (coords >= -1.0) & (coords <= dim)
    c = jnp.maximum(coords, 0.0)
    low = jnp.floor(c)
    hi_clamp = low >= dim - 1
    low = jnp.where(hi_clamp, float(dim - 1), low)
    high = jnp.where(hi_clamp, float(dim - 1), low + 1.0)
    c_eff = jnp.where(hi_clamp, low, c)
    l_w = c_eff - low                              # weight for `high`
    h_w = 1.0 - l_w                                # weight for `low`

    oh_low = jax.nn.one_hot(low.astype(jnp.int32), dim, dtype=jnp.float32)
    oh_high = jax.nn.one_hot(high.astype(jnp.int32), dim, dtype=jnp.float32)
    m = in_range.astype(jnp.float32)
    w = (h_w * m)[..., None] * oh_low + (l_w * m)[..., None] * oh_high  # (R,P,S,dim)
    return w.sum(axis=2) / float(sampling_ratio)   # (R, P, dim)


def _vmem_capacity_bytes():
    try:
        return int(pltpu.get_tpu_info().vmem_capacity_bytes)
    except Exception:
        return 64 << 20   # conservative: v7x has 64 MiB VMEM per TensorCore


# ---------------------------------------------------------------------------
# One ROIAlign level via pallas_call.
# ---------------------------------------------------------------------------
def roi_align_level(x, rois, pooled_size, spatial_scale, sampling_ratio,
                    ids_are_arange=False, compute_dtype=jnp.bfloat16,
                    min_pallas_lane=0):
    """x: (N, C, H, W) f32, rois: (R, 5) [batch_id, x1, y1, x2, y2]."""
    n, c, h, w = x.shape
    r = rois.shape[0]
    p = int(pooled_size)
    it = jnp.finfo(compute_dtype).bits // 8

    # --- per-roi separable interpolation weights (plain JAX glue, f32) ---
    wy = _axis_weights(rois[:, 2], rois[:, 4], spatial_scale, p, sampling_ratio, h)
    wx = _axis_weights(rois[:, 1], rois[:, 3], spatial_scale, p, sampling_ratio, w)

    # --- generation-aware VMEM budgeting & roi-tile sizing -------------------
    # Per-roi VMEM bytes: 2x double-buffered pipelined blocks (feat, Wy, Wx, out)
    # plus the in-kernel intermediates (a_f32, bf16 relayout copies, o_f32).
    per_roi = (2 * (h * w * c * it + p * h * it + p * w * it + p * p * c * 4)
               + p * w * c * 4 + 2 * p * w * c * it + p * p * c * 4)
    vmem_cap = _vmem_capacity_bytes()
    budget = vmem_cap // 3

    # Fallback: minimal block does not fit the VMEM budget (production FPN
    # sizes) or the output lane width is too small for the pallas path.
    # TODO(synk): replace this fallback with a per-ROI spatial-window crop
    # (memory_space=pl.ANY feature input + pltpu.make_async_copy using
    # scalar-prefetched row/col offsets), channel tiling and a 2-slot
    # double-buffered VMEM scratch so the crop DMA overlaps the two matmuls.
    if 8 * per_roi > budget or p * c < min_pallas_lane:
        bidx = jnp.clip(rois[:, 0].astype(jnp.int32), 0, n - 1)
        out = jnp.einsum("rph,rchw,rqw->rcpq", wy, x[bidx], wx)
        return out.astype(x.dtype)

    r_ceil = pl.cdiv(r, 8) * 8
    tr = max(8, (min(budget // per_roi, r_ceil) // 8) * 8)   # grow tr to the budget
    # v7x megacore: keep >= 2 roughly balanced tiles when there are enough rois.
    if tr >= r_ceil and r_ceil >= 16:
        tr = max(8, (((r_ceil // 2) + 7) // 8) * 8)
    r_pad = pl.cdiv(r, tr) * tr
    pad = r_pad - r
    num_tiles = r_pad // tr

    # --- wrapper-side layout plumbing (one XLA pass each, outside the kernel) ---
    # channels-last (N, H, W*C): C stays on the lane/N dim through both matmuls.
    feats = x.transpose(0, 2, 3, 1).reshape(n, h, w * c).astype(compute_dtype)
    if ids_are_arange:
        # roi i pools image i: NO per-roi feature gather. Only pad the image axis
        # with zero rows if the padded roi count exceeds N (padded rois have zero
        # weights and are sliced off anyway).
        feats_in = feats if r_pad <= n else jnp.pad(
            feats, ((0, r_pad - n), (0, 0), (0, 0)))
    else:
        # TODO(synk): for arbitrary batch ids, group rois by image (or one roi per
        # grid step) and index features purely via scalar-prefetched block ids
        # instead of this HBM gather.
        bidx = jnp.clip(rois[:, 0].astype(jnp.int32), 0, n - 1)
        feats_in = jnp.take(feats, jnp.pad(bidx, (0, pad)), axis=0)

    wy_p = jnp.pad(wy, ((0, pad), (0, 0), (0, 0))).astype(compute_dtype)
    wx_p = jnp.pad(wx, ((0, pad), (0, 0), (0, 0))).astype(compute_dtype)
    tile_block = jnp.arange(num_tiles, dtype=jnp.int32)    # scalar-prefetch (SMEM)

    need = tr * per_roi + (2 << 20)
    vmem_limit = int(min(max(need, 16 << 20), (vmem_cap * 9) // 10))

    out = pl.pallas_call(
        _roi_align_tile_kernel,
        out_shape=jax.ShapeDtypeStruct((r_pad, p, p * c), jnp.float32),
        grid_spec=pltpu.PrefetchScalarGridSpec(
            num_scalar_prefetch=1,
            grid=(num_tiles,),
            in_specs=[
                pl.BlockSpec((tr, h, w * c), lambda t, tb: (tb[t], 0, 0)),
                pl.BlockSpec((tr, p, h), lambda t, tb: (t, 0, 0)),
                pl.BlockSpec((tr, p, w), lambda t, tb: (t, 0, 0)),
            ],
            out_specs=pl.BlockSpec((tr, p, p * c), lambda t, tb: (t, 0, 0)),
        ),
        compiler_params=pltpu.CompilerParams(
            dimension_semantics=("parallel",),
            vmem_limit_bytes=vmem_limit,
        ),
    )(tile_block, feats_in, wy_p, wx_p)

    # Kernel element order per roi is (px, py, c)  ->  (R, C, py, px).
    out = out[:r].reshape(r, p, p, c).transpose(0, 3, 2, 1)
    return out.astype(x.dtype)


# ---------------------------------------------------------------------------
# Encoder_Pooler forward.
# ---------------------------------------------------------------------------
def encoder_pooler_forward(feature_maps, boxes, output_sizes, scales, sampling_ratio,
                           compute_dtype=jnp.bfloat16):
    assert boxes.ndim == 2
    dtype = feature_maps[0].dtype
    rois = boxes.astype(dtype)
    num_rois = rois.shape[0]
    ids_are_arange = False
    if rois.shape[1] == 4:
        ids = jnp.arange(num_rois, dtype=dtype)[:, None]   # roi i pools from image i
        rois = jnp.concatenate([ids, rois], axis=1)
        ids_are_arange = True

    results = []
    for x, p, s in zip(feature_maps, output_sizes, scales):
        results.append(
            roi_align_level(x, rois, p, s, sampling_ratio,
                            ids_are_arange=ids_are_arange,
                            compute_dtype=compute_dtype))
    return results, rois


if __name__ == "__main__":
    key = jax.random.PRNGKey(0)
    k_feat0, k_feat1, k_feat2, k_xy, k_wh = jax.random.split(key, 5)

    # Small shapes: batch=3 (one ROI per image), channels=4, image 64x64 implied.
    N, C = 3, 4
    output_sizes = (8, 4, 2)
    scales = (0.25, 0.125, 0.0625)
    sampling_ratio = 2

    feats = [
        jax.random.normal(k_feat0, (N, C, 16, 16), dtype=jnp.float32),  # 1/4
        jax.random.normal(k_feat1, (N, C, 8, 8), dtype=jnp.float32),    # 1/8
        jax.random.normal(k_feat2, (N, C, 4, 4), dtype=jnp.float32),    # 1/16
    ]

    xy = jax.random.uniform(k_xy, (N, 2), minval=0.0, maxval=40.0)
    wh = jax.random.uniform(k_wh, (N, 2), minval=4.0, maxval=24.0)
    boxes = jnp.concatenate([xy, xy + wh], axis=1).astype(jnp.float32)  # (N, 4)

    results, rois = encoder_pooler_forward(
        feats, boxes, output_sizes, scales, sampling_ratio
    )
    results = [jax.block_until_ready(r) for r in results]

    # Verify against a full-f32 separable ROIAlign reference (same weight
    # construction). Kernel computes in bf16 with f32 accumulation (and a bf16
    # re-quantization of the intermediate), so use a bf16-appropriate tolerance.
    bidx = jnp.arange(N)
    for x, out, p, s in zip(feats, results, output_sizes, scales):
        h, w = x.shape[2], x.shape[3]
        wy = _axis_weights(boxes[:, 1], boxes[:, 3], s, p, sampling_ratio, h)
        wx = _axis_weights(boxes[:, 0], boxes[:, 2], s, p, sampling_ratio, w)
        ref = jnp.einsum("rph,rchw,rqw->rcpq", wy, x[bidx], wx)
        assert out.shape == ref.shape
        assert jnp.allclose(out, ref, atol=5e-2, rtol=5e-2), "kernel mismatch"

    print("KERNEL_OK")
</pallas_src>

<mosaic_0001>
module attributes {stable_mosaic.version = 11 : i64} {
  func.func @_roi_align_tile_kernel(%arg0: i32, %arg1: memref<1xi32, #tpu.memory_space<smem>>, %arg2: memref<8x16x64xbf16, #tpu.memory_space<vmem>>, %arg3: memref<8x8x16xbf16, #tpu.memory_space<vmem>>, %arg4: memref<8x8x16xbf16, #tpu.memory_space<vmem>>, %arg5: memref<8x8x32xf32, #tpu.memory_space<vmem>>) attributes {dimension_semantics = [#tpu.dimension_semantics<parallel>], iteration_bounds = array<i64: 1>, scalar_prefetch = 1 : i64, scratch_operands = 0 : i64, tpu.core_type = #tpu.core_type<tc>, window_params = [{transform_indices = @transform_0, window_bounds = array<i64: 8, 16, 64>}, {transform_indices = @transform_1, window_bounds = array<i64: 8, 8, 16>}, {transform_indices = @transform_2, window_bounds = array<i64: 8, 8, 16>}, {transform_indices = @transform_3, window_bounds = array<i64: 8, 8, 32>}]} {
    %c0 = arith.constant 0 : index
    %c0_0 = arith.constant 0 : index
    %c0_1 = arith.constant 0 : index
    %0 = vector.load %arg3[%c0, %c0_0, %c0_1] : memref<8x8x16xbf16, #tpu.memory_space<vmem>>, vector<8x8x16xbf16>
    %c0_2 = arith.constant 0 : index
    %c0_3 = arith.constant 0 : index
    %c0_4 = arith.constant 0 : index
    %1 = vector.load %arg2[%c0_2, %c0_3, %c0_4] : memref<8x16x64xbf16, #tpu.memory_space<vmem>>, vector<8x16x64xbf16>
    %cst = arith.constant dense<0.000000e+00> : vector<8x8x64xf32>
    %2 = tpu.matmul %0, %1, %cst {dimension_numbers = #tpu.dot_dimension_numbers<[2], [1], [1], [2], [0, 0, 0, 1, 1, 2], [0], [0]>} : vector<8x8x16xbf16>, vector<8x16x64xbf16>, vector<8x8x64xf32> -> vector<8x8x64xf32>
    %3 = arith.truncf %2 : vector<8x8x64xf32> to vector<8x8x64xbf16>
    %4 = vector.shape_cast %3 : vector<8x8x64xbf16> to vector<8x8x16x4xbf16>
    %5 = tpu.transpose %4, [0, 2, 1, 3] : vector<8x8x16x4xbf16> -> vector<8x16x8x4xbf16>
    %6 = vector.shape_cast %5 : vector<8x16x8x4xbf16> to vector<8x16x32xbf16>
    %c0_5 = arith.constant 0 : index
    %c0_6 = arith.constant 0 : index
    %c0_7 = arith.constant 0 : index
    %7 = vector.load %arg4[%c0_5, %c0_6, %c0_7] : memref<8x8x16xbf16, #tpu.memory_space<vmem>>, vector<8x8x16xbf16>
    %cst_8 = arith.constant dense<0.000000e+00> : vector<8x8x32xf32>
    %8 = tpu.matmul %7, %6, %cst_8 {dimension_numbers = #tpu.dot_dimension_numbers<[2], [1], [1], [2], [0, 0, 0, 1, 1, 2], [0], [0]>} : vector<8x8x16xbf16>, vector<8x16x32xbf16>, vector<8x8x32xf32> -> vector<8x8x32xf32>
    %c0_9 = arith.constant 0 : index
    %c0_10 = arith.constant 0 : index
    %c0_11 = arith.constant 0 : index
    %9 = vector.load %arg5[%c0_9, %c0_10, %c0_11] : memref<8x8x32xf32, #tpu.memory_space<vmem>>, vector<8x8x32xf32>
    tpu.vector_store %arg5[%c0_9, %c0_10, %c0_11], %8 {strides = array<i32>} : memref<8x8x32xf32, #tpu.memory_space<vmem>>, vector<8x8x32xf32>,
    return
  }
  func.func @transform_0(%arg0: i32, %arg1: memref<1xi32, #tpu.memory_space<smem>>) -> (i32, i32, i32) {
    %0 = arith.index_cast %arg0 : i32 to index
    %1 = memref.load %arg1[%0] : memref<1xi32, #tpu.memory_space<smem>>
    %c0_i32 = arith.constant 0 : i32
    %c0_i32_0 = arith.constant 0 : i32
    %c0_i32_1 = arith.constant 0 : i32
    return %1, %c0_i32, %c0_i32_0 : i32, i32, i32
  }
  func.func @transform_1(%arg0: i32, %arg1: memref<1xi32, #tpu.memory_space<smem>>) -> (i32, i32, i32) {
    %c0_i32 = arith.constant 0 : i32
    %c0_i32_0 = arith.constant 0 : i32
    %c0_i32_1 = arith.constant 0 : i32
    return %arg0, %c0_i32, %c0_i32_0 : i32, i32, i32
  }
  func.func @transform_2(%arg0: i32, %arg1: memref<1xi32, #tpu.memory_space<smem>>) -> (i32, i32, i32) {
    %c0_i32 = arith.constant 0 : i32
    %c0_i32_0 = arith.constant 0 : i32
    %c0_i32_1 = arith.constant 0 : i32
    return %arg0, %c0_i32, %c0_i32_0 : i32, i32, i32
  }
  func.func @transform_3(%arg0: i32, %arg1: memref<1xi32, #tpu.memory_space<smem>>) -> (i32, i32, i32) {
    %c0_i32 = arith.constant 0 : i32
    %c0_i32_0 = arith.constant 0 : i32
    %c0_i32_1 = arith.constant 0 : i32
    return %arg0, %c0_i32, %c0_i32_0 : i32, i32, i32
  }
}

</mosaic_0001>

<bundles_post_ra>
// kernel: tpu_custom_call.1
= control target key start
LH: loop header
LB: loop body
LE: loop exit
PB: predicated region body
PF: predicated region fallthrough
CT: control target
= control target key end

     0   :  { %10 = vsyncpa [#allocation5], 0  ;;  %s8795_s0 = inlined_call_operand.<no memory space> [shape: s32[1], index: 0, kind: input, shape index: {}]   ;;  %s8796_s1 = inlined_call_operand.hbm [shape: bf16[8,16,64], index: 1, kind: input, shape index: {}]   ;;  %s8797_s2 = inlined_call_operand.hbm [shape: bf16[8,8,16], index: 2, kind: input, shape index: {}]   ;;  %s8798_s3 = inlined_call_operand.hbm [shape: bf16[8,8,16], index: 3, kind: input, shape index: {}]   ;;  %s8799_s4 = inlined_call_operand.hbm [shape: f32[8,8,32], index: 4, kind: output, shape index: {}]  }
   0x1   :  { %11 = vsyncpa [#allocation8], 0 }
   0x2   :  { %12 = vsyncpa [#allocation6], 0  ;;  %s35_s17 = sshll.u32 %s8797_s2, 4  ;;  %s5544_s18 = smov [#allocation7]   ;;  %s36_s17 = int_to_ptr.hbm [resolvable:$true] %s35_s17 }
   0x3   :  { %s37_s19 = sshll.u32 %s5544_s18, 4  ;;  %s5403_s22 = sshll.u32 %s8795_s0, 6  ;;  %s38_s19 = int_to_ptr.vmem [resolvable:$true] %s37_s19 }
   0x4   :  { %s5545_s23 = smov 64   ;;  %s5546_s24 = smov 4  }
   0x5   :  { %43 = dma.hbm_to_vmem [thread:$0]  %s36_s17, 512, %s38_s19, [#allocation8], %s5545_s23, %s5545_s23, %s5546_s24  }
   0x6   :  { %s21_s27 = scalar_lea.hbm %s8796_s1, %s5403_s22  ;;  %s5547_s29 = smov [#allocation4]  }
   0x7   :  { %s22_s28 = sshll.u32 %s21_s27, 4  ;;  %s24_s30 = sshll.u32 %s5547_s29, 4  ;;  %s23_s28 = int_to_ptr.hbm [resolvable:$true] %s22_s28  ;;  %s25_s30 = int_to_ptr.vmem [resolvable:$true] %s24_s30 }
   0x8   :  { %s5466_s2 = sshra.s32 %s23_s28, 4  ;;  %s5470_s0 = scalar_lea.hbm %s8796_s1, 64  ;;  %s5467_s2 = int_to_ptr.hbm [resolvable:$true] %s5466_s2 }
   0x9   :  { %s5468_s5 = scalar_lea.hbm %s5467_s2, 64  ;;  %p5471_p1 = scmp.lt.s32.totalorder %s5467_s2, %s8796_s1 }
   0xa   :  { %p5469_p0 = scmp.ne.s32.totalorder %s5467_s2, %s5468_s5  ;;  %p5472_p2 = scmp.lt.s32.totalorder %s5470_s0, %s5468_s5 }
   0xc   :  { %p5473_p3 = por %p5472_p2, %p5471_p1 }
   0xe   :  { %p5474_p4 = pnand %p5473_p3, %p5469_p0 }
  0x10   :  { %5477 = shalt.err (!%p5474_p4)
}
  0x11   :  { %30 = dma.hbm_to_vmem [thread:$0]  %s23_s28, 1024, %s25_s30, [#allocation5], %s5545_s23, %s5545_s23, %s5546_s24  }
  0x12   :  { %s48_s12 = sshll.u32 %s8798_s3, 4  ;;  %s5548_s13 = smov [#allocation9]   ;;  %s49_s12 = int_to_ptr.hbm [resolvable:$true] %s48_s12 }
  0x13   :  { %s50_s14 = sshll.u32 %s5548_s13, 4  ;;  %s51_s14 = int_to_ptr.vmem [resolvable:$true] %s50_s14 }
  0x14   :  { %56 = dma.hbm_to_vmem [thread:$0]  %s49_s12, 512, %s51_s14, [#allocation8], %s5545_s23, %s5545_s23, %s5546_s24  }
  0x15   :  { %5538 = dma.done.wait [#allocation5], 1024  }
  0x16   :  { %5539 = vsyncadd [#allocation5], 4294966272 }
  0x17   :  { %5540 = dma.done.wait [#allocation8], 1024  }
  0x18   :  { %5541 = vsyncadd [#allocation8], 4294966272  ;;  %v5404_v0 = vld [vmem:[#allocation4] sm:$0xff]  ;;  %v5405_v1 = vld [vmem:[#allocation4 + $0x8] sm:$0xff]  ;;  %vm102_vm0 = vcmask 130048   ;;  %s5549_s1 = smov 116  }
  0x19   :  { %v72_v2 = vld [vmem:[#allocation7] sm:$0xf]  ;;  %v5406_v3 = vld [vmem:[#allocation4 + $0x10] sm:$0xff]  ;;  %113 = vmatpush.bf16.msra.mxu0 %v5404_v0  ;;  %135 = vmatpush.bf16.msra.mxu1 %v5405_v1  ;;  %v73_v4 = vld [vmem:[#allocation7 + $0x4] sm:$0xf]  ;;  %s5550_s3 = smov 120  }
  0x1a   :  { %v5407_v5 = vld [vmem:[#allocation4 + $0x18] sm:$0xff]  ;;  %v5408_v6 = vld [vmem:[#allocation4 + $0x20] sm:$0xff]  ;;  %157 = vmatpush.bf16.msra.mxu2 %v5406_v3  ;;  %v74_v7 = vld [vmem:[#allocation7 + $0x8] sm:$0xf]  ;;  %s5551_s15 = smov 124   ;;  %s5552_s16 = smov 112  }
  0x1b   :  { %v5409_v8 = vld [vmem:[#allocation4 + $0x28] sm:$0xff]  ;;  %179 = vmatpush.bf16.msra.mxu3 %v5407_v5  ;;  %v5410_v10 = vld [vmem:[#allocation4 + $0x30] sm:$0xff]  ;;  %v5411_v11 = vld [vmem:[#allocation4 + $0x38] sm:$0xff]  ;;  %s5553_s17 = smov 104   ;;  %s5554_s18 = smov 108   ;;  %vm650_vm1 = vcmask 1047556  }
  0x1c   :  { %v75_v9 = vld [vmem:[#allocation7 + $0xc] sm:$0xf]  ;;  %5358 = vmatmul.msk.bf16.vlgmr.msra.gmra.mxu0 %vm102_vm0, %v72_v2  ;;  %5363 = vmatmul.msk.bf16.vlgmr.msra.gmra.mxu1 %vm102_vm0, %v73_v4  ;;  %v76_v12 = vld [vmem:[#allocation7 + $0x10] sm:$0xf]  ;;  %v77_v13 = vld [vmem:[#allocation7 + $0x14] sm:$0xf] }
  0x1d   :  { %201 = vmatpush.bf16.msrb.mxu0 %v5408_v6  ;;  %5368 = vmatmul.msk.bf16.vlgmr.msra.gmra.mxu2 %vm102_vm0, %v74_v7  ;;  %v78_v14 = vld [vmem:[#allocation7 + $0x18] sm:$0xf]  ;;  %v79_v15 = vld [vmem:[#allocation7 + $0x1c] sm:$0xf]  ;;  %s5555_s19 = smov 100   ;;  %s5556_s20 = smov 96  }
  0x1e   :  { %223 = vmatpush.bf16.msrb.mxu1 %v5409_v8  ;;  %5373 = vmatmul.msk.bf16.vlgmr.msra.gmra.mxu3 %vm102_vm0, %v75_v9  ;;  %v5557_v52 = vmov 1983009808   ;;  %v5558_v2 = vmov 1934713408   ;;  %s5559_s21 = smov 92   ;;  %s5560_s22 = smov 88  }
  0x1f   :  { %245 = vmatpush.bf16.msrb.mxu2 %v5410_v10  ;;  %267 = vmatpush.bf16.msrb.mxu3 %v5411_v11  ;;  %v653_v53 = vunpack.c.l.s4 %v5557_v52  ;;  %v667_v3 = vunpack.c.l.s4 %v5558_v2  ;;  %s5561_s23 = smov 80   ;;  %s5562_s25 = smov 76   ;;  %vm5050_vm2 = vcmask 31744   ;;  %vm5075_vm3 = vcmask 64512  }
  0x20   :  { %s5563_s26 = smov 72   ;;  %s5564_s27 = smov 68   ;;  %vm5092_vm4 = vcmask 97280   ;;  %vm5125_vm5 = vcmask 162816   ;;  %vm5142_vm6 = vcmask 195584   ;;  %vm5159_vm7 = vcmask 228352  }
  0x21   :  { %v5763_v60 = vunpack.c.0.s8 %v653_v53  ;;  %s5565_s28 = smov 84   ;;  %s5566_s29 = smov 8   ;;  %vm5320_vm8 = vcmask 261120  }
  0x22   :  { %s5567_s30 = smov 12   ;;  %s5568_s2 = smov 16  }
  0x23   :  { %s5569_s5 = smov 20   ;;  %s5570_s6 = smov 24  }
  0x24   :  { %s5571_s7 = smov 28   ;;  %s5335_s8 = sshll.u32 %s8799_s4, 4  ;;  %s5336_s8 = int_to_ptr.hbm [resolvable:$true] %s5335_s8 }
  0x25   :  { %s5572_s9 = smov [#allocation10]   ;;  %s5573_s11 = smov 128  }
  0x26   :  { %s5333_s10 = sshll.u32 %s5572_s9, 4  ;;  %s5334_s10 = int_to_ptr.vmem [resolvable:$true] %s5333_s10 }
  0x2c   :  { %5378 = vmatmul.msk.bf16.vlgmr.msrb.gmra.mxu0 %vm102_vm0, %v76_v12  ;;  %5383 = vmatmul.msk.bf16.vlgmr.msrb.gmra.mxu1 %vm102_vm0, %v77_v13 }
  0x2d   :  { %5388 = vmatmul.msk.bf16.vlgmr.msrb.gmra.mxu2 %vm102_vm0, %v78_v14  ;;  %v5783_v14 = vunpack.c.0.s8 %v667_v3 }
  0x2e   :  { %5393 = vmatmul.msk.bf16.vlgmr.msrb.gmra.mxu3 %vm102_vm0, %v79_v15 }
  0x99   :  { %v115_v16 = vpop.f32.mrf.mxu0  ;;  %v137_v17 = vpop.f32.mrf.mxu1 }
  0x9a   :  { %v5628_v18 = vpack.c.bf16 %v115_v16, %v115_v16  ;;  %v5636_v19 = vpack.c.bf16 %v137_v17, %v137_v17 }
  0x9c   :  { %337 = vrot.lane.b32.xlu1 %v5628_v18, %s5549_s1  ;;  %313 = vrot.lane.b32.xlu2 %v5628_v18, %s5550_s3 }
  0x9d   :  { %289 = vrot.lane.b32.xlu0 %v5628_v18, %s5551_s15 }
  0xa0   :  { %v159_v20 = vpop.f32.mrf.mxu2 }
  0xa1   :  { %v117_v21 = vpop.f32.mrf.mxu0  ;;  %v139_v22 = vpop.f32.mrf.mxu1  ;;  %v5656_v26 = vpack.c.bf16 %v159_v20, %v159_v20 }
  0xa2   :  { %v181_v23 = vpop.f32.mrf.mxu3 }
  0xa3   :  { %v5664_v27 = vpack.c.bf16 %v181_v23, %v181_v23 }
  0xa4   :  { %363 = vrot.lane.b32.xlu1 %v5636_v19, %s5552_s16  ;;  %339 = vrot.lane.b32.xlu2 %v5636_v19, %s5549_s1 }
  0xa5   :  { %291 = vrot.lane.b32.xlu0 %v5636_v19, %s5551_s15 }
  0xa8   :  { %v161_v24 = vpop.f32.mrf.mxu2 }
  0xa9   :  { %v203_v28 = vpop.f32.mrf.mxu0  ;;  %v225_v29 = vpop.f32.mrf.mxu1 }
  0xaa   :  { %v183_v25 = vpop.f32.mrf.mxu3  ;;  %v5696_v32 = vpack.c.bf16 %v203_v28, %v203_v28  ;;  %v5704_v33 = vpack.c.bf16 %v225_v29, %v225_v29 }
  0xac   :  { %409 = vrot.lane.b32.xlu1 %v5628_v18, %s5553_s17  ;;  %385 = vrot.lane.b32.xlu2 %v5628_v18, %s5554_s18 }
  0xad   :  { %315 = vrot.lane.b32.xlu0 %v5636_v19, %s5550_s3 }
  0xb0   :  { %v247_v34 = vpop.f32.mrf.mxu2 }
  0xb1   :  { %v205_v30 = vpop.f32.mrf.mxu0  ;;  %v227_v31 = vpop.f32.mrf.mxu1  ;;  %v5744_v47 = vpack.c.bf16 %v247_v34, %v247_v34 }
  0xb2   :  { %v269_v36 = vpop.f32.mrf.mxu3 }
  0xb3   :  { %v5746_v48 = vpack.c.bf16 %v269_v36, %v269_v36 }
  0xb4   :  { %435 = vrot.lane.b32.xlu1 %v5636_v19, %s5555_s19  ;;  %411 = vrot.lane.b32.xlu2 %v5636_v19, %s5553_s17 }
  0xb5   :  { %361 = vrot.lane.b32.xlu0 %v5628_v18, %s5552_s16 }
  0xb8   :  { %v249_v37 = vpop.f32.mrf.mxu2 }
  0xba   :  { %v271_v39 = vpop.f32.mrf.mxu3 }
  0xbc   :  { %293 = vrot.lane.b32.xlu1 %v5656_v26, %s5551_s15  ;;  %457 = vrot.lane.b32.xlu2 %v5628_v18, %s5556_s20 }
  0xbd   :  { %387 = vrot.lane.b32.xlu0 %v5636_v19, %s5554_s18 }
  0xc4   :  { %295 = vrot.lane.b32.xlu1 %v5664_v27, %s5551_s15  ;;  %319 = vrot.lane.b32.xlu2 %v5664_v27, %s5550_s3 }
  0xc5   :  { %433 = vrot.lane.b32.xlu0 %v5628_v18, %s5555_s19 }
  0xcc   :  { %317 = vrot.lane.b32.xlu1 %v5656_v26, %s5550_s3  ;;  %365 = vrot.lane.b32.xlu2 %v5656_v26, %s5552_s16 }
  0xcd   :  { %459 = vrot.lane.b32.xlu0 %v5636_v19, %s5556_s20 }
  0xd4   :  { %343 = vrot.lane.b32.xlu1 %v5664_v27, %s5549_s1  ;;  %391 = vrot.lane.b32.xlu2 %v5664_v27, %s5554_s18 }
  0xd5   :  { %341 = vrot.lane.b32.xlu0 %v5656_v26, %s5549_s1 }
  0xdc   :  { %389 = vrot.lane.b32.xlu1 %v5656_v26, %s5554_s18  ;;  %437 = vrot.lane.b32.xlu2 %v5656_v26, %s5555_s19 }
  0xdd   :  { %367 = vrot.lane.b32.xlu0 %v5664_v27, %s5552_s16 }
  0xe4   :  { %415 = vrot.lane.b32.xlu1 %v5664_v27, %s5553_s17  ;;  %463 = vrot.lane.b32.xlu2 %v5664_v27, %s5556_s20 }
  0xe5   :  { %413 = vrot.lane.b32.xlu0 %v5656_v26, %s5553_s17 }
  0xec   :  { %461 = vrot.lane.b32.xlu1 %v5656_v26, %s5556_s20  ;;  %297 = vrot.lane.b32.xlu2 %v5696_v32, %s5551_s15 }
  0xed   :  { %439 = vrot.lane.b32.xlu0 %v5664_v27, %s5555_s19 }
  0xf4   :  { %323 = vrot.lane.b32.xlu1 %v5704_v33, %s5550_s3  ;;  %299 = vrot.lane.b32.xlu2 %v5704_v33, %s5551_s15 }
  0xf5   :  { %321 = vrot.lane.b32.xlu0 %v5696_v32, %s5550_s3 }
  0xf6   :  { %v314_v35 = vpop.permute.xlu2 %313 }
  0xfc   :  { %369 = vrot.lane.b32.xlu1 %v5696_v32, %s5552_s16  ;;  %345 = vrot.lane.b32.xlu2 %v5696_v32, %s5549_s1 }
  0xfd   :  { %347 = vrot.lane.b32.xlu0 %v5704_v33, %s5549_s1 }
  0xfe   :  { %v340_v38 = vpop.permute.xlu2 %339 }
 0x104   :  { %395 = vrot.lane.b32.xlu1 %v5704_v33, %s5554_s18  ;;  %371 = vrot.lane.b32.xlu2 %v5704_v33, %s5552_s16 }
 0x105   :  { %393 = vrot.lane.b32.xlu0 %v5696_v32, %s5554_s18 }
 0x106   :  { %v5724_v40 = vpop.permute.xlu2 %385 }
 0x107   :  { %v678_v23 = vrot.slane %v5724_v40, 4 }
 0x10c   :  { %441 = vrot.lane.b32.xlu1 %v5696_v32, %s5555_s19  ;;  %417 = vrot.lane.b32.xlu2 %v5696_v32, %s5553_s17 }
 0x10d   :  { %419 = vrot.lane.b32.xlu0 %v5704_v33, %s5553_s17 }
 0x10e   :  { %v5732_v41 = vpop.permute.xlu1 %337  ;;  %v412_v42 = vpop.permute.xlu2 %411 }
 0x10f   :  { %v5734_v43 = vpop.permute.xlu0 %289  ;;  %v768_v57 = vrot.slane %v412_v42, 4 }
 0x110   :  { %v679_v34 = vsel %vm650_vm1, %v678_v23, %v5734_v43 }
 0x114   :  { %467 = vrot.lane.b32.xlu1 %v5704_v33, %s5556_s20  ;;  %443 = vrot.lane.b32.xlu2 %v5704_v33, %s5555_s19 }
 0x115   :  { %465 = vrot.lane.b32.xlu0 %v5696_v32, %s5556_s20 }
 0x116   :  { %v364_v44 = vpop.permute.xlu1 %363  ;;  %v5742_v45 = vpop.permute.xlu2 %457 }
 0x117   :  { %v292_v46 = vpop.permute.xlu0 %291  ;;  %v762_v54 = vrot.slane %v364_v44, 4 }
 0x119   :  { %v763_v61 = vsel %vm650_vm1, %v762_v54, %v5636_v19 }
 0x11a   :  { %v767_v1 = vperm.slane %v763_v61, %v5763_v60 }
 0x11c   :  { %303 = vrot.lane.b32.xlu1 %v5746_v48, %s5551_s15  ;;  %325 = vrot.lane.b32.xlu2 %v5744_v47, %s5550_s3  ;;  %v776_v12 = vrot.slane %v767_v1, 4 }
 0x11d   :  { %301 = vrot.lane.b32.xlu0 %v5744_v47, %s5551_s15 }
 0x11e   :  { %v410_v49 = vpop.permute.xlu1 %409  ;;  %v5754_v50 = vpop.permute.xlu2 %319 }
 0x11f   :  { %v316_v51 = vpop.permute.xlu0 %315  ;;  %v656_v63 = vrot.slane %v410_v49, 4  ;;  %v683_v49 = vperm.slane %v679_v34, %v5763_v60 }
 0x120   :  { %v769_v59 = vsel %vm650_vm1, %v768_v57, %v316_v51 }
 0x121   :  { %v773_v0 = vperm.slane %v769_v59, %v5763_v60  ;;  %v657_v9 = vsel %vm650_vm1, %v656_v63, %v314_v35 }
 0x122   :  { %v661_v17 = vperm.slane %v657_v9, %v5763_v60 }
 0x123   :  { %v774_v10 = vrot.slane %v773_v0, 4  ;;  %v777_v20 = vsel %vm650_vm1, %v773_v0, %v776_v12 }
 0x124   :  { %349 = vrot.lane.b32.xlu1 %v5744_v47, %s5549_s1  ;;  %351 = vrot.lane.b32.xlu2 %v5746_v48, %s5549_s1  ;;  %v5800_v29 = vperm.slane %v777_v20, %v5783_v14  ;;  %v662_v35 = vrot.slane %v661_v17, 4 }
 0x125   :  { %327 = vrot.lane.b32.xlu0 %v5746_v48, %s5550_s3  ;;  %v775_v22 = vsel %vm650_vm1, %v774_v10, %v767_v1 }
 0x126   :  { %v436_v55 = vpop.permute.xlu1 %435  ;;  %v366_v56 = vpop.permute.xlu2 %365  ;;  %v5809_v36 = vperm.slane %v775_v22, %v5783_v14  ;;  %v788_v51 = vrot.slane %v5800_v29, 4 }
 0x127   :  { %v362_v58 = vpop.permute.xlu0 %361  ;;  %v796_v4 = vrot.slane %v436_v55, 4  ;;  %v874_v37 = vrot.slane %v366_v56, 4 }
 0x128   :  { %v649_v62 = vrot.slane %v362_v58, 4  ;;  %v786_v43 = vrot.slane %v5809_v36, 4  ;;  %v692_v58 = vrot.slane %v683_v49, 4  ;;  %v789_v0 = vsel %vm650_vm1, 0, %v788_v51 }
 0x129   :  { %v797_v15 = vsel %vm650_vm1, %v796_v4, %v340_v38  ;;  %v875_v52 = vsel %vm650_vm1, %v874_v37, %v5656_v26  ;;  %v1614_v10 = vshrl.u32 %v5809_v36, 16  ;;  %v1638_v12 = vshrl.u32 %v789_v0, 16 }
 0x12a   :  { %v651_v5 = vsel %vm650_vm1, %v649_v62, %v5628_v18  ;;  %v801_v24 = vperm.slane %v797_v15, %v5763_v60  ;;  %v5848_v1 = vperm.slane %v875_v52, %v5763_v60 }
 0x12b   :  { %v655_v13 = vperm.slane %v651_v5, %v5763_v60 }
 0x12c   :  { %375 = vrot.lane.b32.xlu1 %v5746_v48, %s5552_s16  ;;  %397 = vrot.lane.b32.xlu2 %v5744_v47, %s5554_s18  ;;  %v802_v40 = vrot.slane %v801_v24, 4  ;;  %v888_v20 = vrot.slane %v5848_v1, 4 }
 0x12d   :  { %373 = vrot.lane.b32.xlu0 %v5744_v47, %s5552_s16  ;;  %v664_v25 = vrot.slane %v655_v13, 4  ;;  %v663_v42 = vsel %vm650_vm1, %v662_v35, %v655_v13 }
 0x12e   :  { %v5777_v6 = vpop.permute.xlu1 %293  ;;  %v5779_v7 = vpop.permute.xlu2 %391  ;;  %v5822_v55 = vperm.slane %v663_v42, %v5783_v14 }
 0x12f   :  { %v388_v8 = vpop.permute.xlu0 %387  ;;  %v665_v44 = vsel %vm650_vm1, %v661_v17, %v664_v25  ;;  %v1014_v37 = vrot.slane %v5779_v7, 4 }
 0x130   :  { %v790_v11 = vrot.slane %v388_v8, 4  ;;  %v5825_v56 = vperm.slane %v665_v44, %v5783_v14  ;;  %v674_v4 = vrot.slane %v5822_v55, 4  ;;  %v1550_v34 = vshrl.u32 %v5822_v55, 16 }
 0x132   :  { %v791_v16 = vsel %vm650_vm1, %v790_v11, %v292_v46  ;;  %v676_v5 = vrot.slane %v5825_v56, 4  ;;  %v1630_v11 = vshrl.u32 %v5800_v29, 16  ;;  %v5867_v23 = vsel %vm650_vm1, 0, %v674_v4 }
 0x133   :  { %v795_v21 = vperm.slane %v791_v16, %v5763_v60  ;;  %v1566_v35 = vshrl.u32 %v5825_v56, 16 }
 0x134   :  { %421 = vrot.lane.b32.xlu1 %v5744_v47, %s5553_s17  ;;  %423 = vrot.lane.b32.xlu2 %v5746_v48, %s5553_s17  ;;  %v677_v25 = vsel %vm650_vm1, 0, %v676_v5 }
 0x135   :  { %v804_v28 = vrot.slane %v795_v21, 4  ;;  %399 = vrot.lane.b32.xlu0 %v5746_v48, %s5554_s18  ;;  %v803_v53 = vsel %vm650_vm1, %v802_v40, %v795_v21 }
 0x136   :  { %v5802_v30 = vpop.permute.xlu1 %295  ;;  %v5804_v31 = vpop.permute.xlu2 %437  ;;  %v5836_v59 = vperm.slane %v803_v53, %v5783_v14 }
 0x137   :  { %v434_v38 = vpop.permute.xlu0 %433  ;;  %v805_v39 = vsel %vm650_vm1, %v801_v24, %v804_v28  ;;  %v1015_v7 = vsel %vm650_vm1, %v1014_v37, %v5802_v30 }
 0x138   :  { %v684_v46 = vrot.slane %v434_v38, 4  ;;  %v813_v54 = vperm.slane %v805_v39, %v5783_v14  ;;  %v814_v13 = vrot.slane %v5836_v59, 4  ;;  %v1615_v51 = vshrl.u32 %v5836_v59, 16 }
 0x13a   :  { %v685_v57 = vsel %vm650_vm1, %v684_v46, %v5732_v41  ;;  %v5844_v41 = vsel %vm650_vm1, 0, %v786_v43  ;;  %v816_v2 = vrot.slane %v813_v54, 4  ;;  %v1628_v24 = vpack.i.b16 %v813_v54, %v5800_v29 }
 0x13b   :  { %v689_v61 = vperm.slane %v685_v57, %v5763_v60  ;;  %v1622_v17 = vshrl.u32 %v5844_v41, 16  ;;  %v1631_v38 = vshrl.u32 %v813_v54, 16  ;;  %v815_v29 = vsel %vm650_vm1, 0, %v814_v13 }
 0x13c   :  { %447 = vrot.lane.b32.xlu1 %v5746_v48, %s5555_s19  ;;  %469 = vrot.lane.b32.xlu2 %v5744_v47, %s5556_s20  ;;  %v817_v21 = vsel %vm650_vm1, 0, %v816_v2  ;;  %v1574_v43 = vshrl.u32 %v677_v25, 16  ;;  %v2170_v54 = vrot.slane %v1628_v24, 4  ;;  %v908_v57 = vrot.slane %v5804_v31, 4 }
 0x13d   :  { %445 = vrot.lane.b32.xlu0 %v5744_v47, %s5555_s19  ;;  %v690_v8 = vrot.slane %v689_v61, 4  ;;  %v693_v9 = vsel %vm650_vm1, %v689_v61, %v692_v58  ;;  %v1639_v39 = vshrl.u32 %v817_v21, 16  ;;  %v1636_v53 = vpack.i.b16 %v817_v21, %v789_v0 }
 0x13e   :  { %v5839_v62 = vpop.permute.xlu1 %317  ;;  %v5841_v63 = vpop.permute.xlu2 %463  ;;  %v701_v16 = vperm.slane %v693_v9, %v5783_v14  ;;  %v1612_v61 = vpack.i.b16 %v5836_v59, %v5809_v36  ;;  %v1623_v2 = vshrl.u32 %v815_v29, 16  ;;  %v1632_v4 = vpack.i.b16 %v1631_v38, %v1630_v11 }
 0x13f   :  { %v5850_v3 = vpop.permute.xlu0 %459  ;;  %v691_v15 = vsel %vm650_vm1, %v690_v8, %v683_v49  ;;  %v1558_v49 = vshrl.u32 %v5867_v23, 16  ;;  %v1640_v8 = vpack.i.b16 %v1639_v39, %v1638_v12  ;;  %v5895_v9 = vperm.slane %v1015_v7, %v5763_v60 }
 0x140   :  { %v5864_v22 = vperm.slane %v691_v15, %v5783_v14  ;;  %v704_v28 = vrot.slane %v701_v16, 4  ;;  %v1567_v58 = vshrl.u32 %v701_v16, 16  ;;  %v1564_v30 = vpack.i.b16 %v701_v16, %v5825_v56 }
 0x141   :  { %v1616_v15 = vpack.i.b16 %v1615_v51, %v1614_v10  ;;  %v1620_v0 = vpack.i.b16 %v815_v29, %v5844_v41  ;;  %v2171_v24 = vsel %vm650_vm1, %v2170_v54, %v1612_v61  ;;  %v2176_v36 = vrot.slane %v1636_v53, 4 }
 0x142   :  { %v702_v40 = vrot.slane %v5864_v22, 4  ;;  %v705_v42 = vsel %vm650_vm1, 0, %v704_v28  ;;  %v1551_v59 = vshrl.u32 %v5864_v22, 16  ;;  %v1568_v11 = vpack.i.b16 %v1567_v58, %v1566_v35 }
 0x143   :  { %v1575_v5 = vshrl.u32 %v705_v42, 16  ;;  %v1572_v21 = vpack.i.b16 %v705_v42, %v677_v25  ;;  %v1624_v12 = vpack.i.b16 %v1623_v2, %v1622_v17  ;;  %v2198_v56 = vrot.slane %v1632_v4, 4 }
 0x144   :  { %481 = vrot.lane.b32.xlu1 %v5628_v18, %s5559_s21  ;;  %483 = vrot.lane.b32.xlu2 %v5636_v19, %s5559_s21  ;;  %v703_v13 = vsel %vm650_vm1, 0, %v702_v40  ;;  %v2204_v41 = vrot.slane %v1640_v8, 4  ;;  %v1548_v25 = vpack.i.b16 %v5864_v22, %v5822_v55  ;;  %v2058_v28 = vrot.slane %v1564_v30, 4 }
 0x145   :  { %471 = vrot.lane.b32.xlu0 %v5746_v48, %s5556_s20  ;;  %v1559_v10 = vshrl.u32 %v703_v13, 16  ;;  %v1576_v16 = vpack.i.b16 %v1575_v5, %v1574_v43  ;;  %v5915_v29 = vperm.slane %v2171_v24, %v5763_v60  ;;  %v1556_v17 = vpack.i.b16 %v703_v13, %v5867_v23 }
 0x146   :  { %v5883_v44 = vpop.permute.xlu1 %343  ;;  %v5885_v46 = vpop.permute.xlu2 %297  ;;  %v2064_v39 = vrot.slane %v1572_v21, 4  ;;  %v2177_v51 = vsel %vm650_vm1, %v2176_v36, %v1620_v0  ;;  %v1552_v7 = vpack.i.b16 %v1551_v59, %v1550_v34  ;;  %v2086_v43 = vrot.slane %v1568_v11, 4 }
 0x147   :  { %v342_v52 = vpop.permute.xlu0 %341  ;;  %8872 = vst [vmem:[#allocation14_spill] sm:$0xff] %v5915_v29  ;;  %v2199_v55 = vsel %vm650_vm1, %v2198_v56, %v1616_v15  ;;  %v1560_v22 = vpack.i.b16 %v1559_v10, %v1558_v49  ;;  %v2092_v53 = vrot.slane %v1576_v16, 4  ;;  %v2059_v58 = vsel %vm650_vm1, %v2058_v28, %v1548_v25 }
 0x148   :  { %v909_v31 = vsel %vm650_vm1, %v908_v57, %v342_v52  ;;  %v2205_v57 = vsel %vm650_vm1, %v2204_v41, %v1624_v12  ;;  %v5926_v2 = vperm.slane %v2177_v51, %v5763_v60  ;;  %v1028_v34 = vrot.slane %v5895_v9, 4 }
 0x149   :  { %v913_v35 = vperm.slane %v909_v31, %v5763_v60  ;;  %v2065_v4 = vsel %vm650_vm1, %v2064_v39, %v1556_v17  ;;  %v5933_v5 = vperm.slane %v2199_v55, %v5763_v60  ;;  %v5942_v30 = vperm.slane %v2205_v57, %v5763_v60 }
 0x14a   :  { %8873 = vst [vmem:[#allocation15_spill] sm:$0xff] %v5926_v2  ;;  %v5945_v15 = vperm.slane %v2059_v58, %v5763_v60  ;;  %v2093_v0 = vsel %vm650_vm1, %v2092_v53, %v1560_v22  ;;  %v5955_v24 = vperm.slane %v2065_v4, %v5763_v60 }
 0x14b   :  { %v914_v23 = vrot.slane %v913_v35, 4  ;;  %8874 = vst [vmem:[#allocation16_spill] sm:$0xff] %v5933_v5 }
 0x14c   :  { %487 = vrot.lane.b32.xlu1 %v5664_v27, %s5559_s21  ;;  %489 = vrot.lane.b32.xlu2 %v5696_v32, %s5559_s21  ;;  %8875 = vst [vmem:[#allocation17_spill] sm:$0xff] %v5942_v30 }
 0x14d   :  { %485 = vrot.lane.b32.xlu0 %v5656_v26, %s5559_s21 }
 0x14e   :  { %v390_v37 = vpop.permute.xlu1 %389  ;;  %v5912_v38 = vpop.permute.xlu2 %299 }
 0x14f   :  { %v902_v40 = vrot.slane %v390_v37, 4  ;;  %v368_v42 = vpop.permute.xlu0 %367 }
 0x150   :  { %v986_v52 = vrot.slane %v368_v42, 4 }
 0x151   :  { %v903_v54 = vsel %vm650_vm1, %v902_v40, %v5777_v6  ;;  %v2087_v6 = vsel %vm650_vm1, %v2086_v43, %v1552_v7 }
 0x152   :  { %v907_v61 = vperm.slane %v903_v54, %v5763_v60  ;;  %v987_v49 = vsel %vm650_vm1, %v986_v52, %v5664_v27  ;;  %v5962_v56 = vperm.slane %v2087_v6, %v5763_v60 }
 0x153   :  { %v991_v59 = vperm.slane %v987_v49, %v5763_v60 }
 0x154   :  { %v915_v8 = vsel %vm650_vm1, %v914_v23, %v907_v61  ;;  %v916_v13 = vrot.slane %v907_v61, 4  ;;  %493 = vrot.lane.b32.xlu1 %v5744_v47, %s5559_s21  ;;  %495 = vrot.lane.b32.xlu2 %v5746_v48, %s5559_s21 }
 0x155   :  { %v5949_v21 = vperm.slane %v915_v8, %v5783_v14  ;;  %491 = vrot.lane.b32.xlu0 %v5704_v33, %s5559_s21  ;;  %v1000_v43 = vrot.slane %v991_v59, 4 }
 0x156   :  { %v917_v36 = vsel %vm650_vm1, %v913_v35, %v916_v13  ;;  %v416_v11 = vpop.permute.xlu1 %415  ;;  %v5959_v12 = vpop.permute.xlu2 %345  ;;  %v5969_v35 = vperm.slane %v2093_v0, %v5763_v60 }
 0x157   :  { %v925_v10 = vperm.slane %v917_v36, %v5783_v14  ;;  %v926_v16 = vrot.slane %v5949_v21, 4  ;;  %v992_v41 = vrot.slane %v416_v11, 4  ;;  %v414_v25 = vpop.permute.xlu0 %413 }
 0x158   :  { %v880_v17 = vrot.slane %v414_v25, 4 }
 0x159   :  { %v928_v42 = vrot.slane %v925_v10, 4  ;;  %v993_v51 = vsel %vm650_vm1, %v992_v41, %v5754_v50  ;;  %v5981_v53 = vsel %vm650_vm1, 0, %v926_v16  ;;  %v1679_v50 = vshrl.u32 %v5949_v21, 16 }
 0x15a   :  { %v997_v52 = vperm.slane %v993_v51, %v5763_v60  ;;  %v881_v55 = vsel %vm650_vm1, %v880_v17, %v5839_v62  ;;  %v1695_v62 = vshrl.u32 %v925_v10, 16  ;;  %v1687_v8 = vshrl.u32 %v5981_v53, 16 }
 0x15b   :  { %v929_v54 = vsel %vm650_vm1, 0, %v928_v42  ;;  %v885_v57 = vperm.slane %v881_v55, %v5763_v60 }
 0x15c   :  { %v998_v23 = vrot.slane %v997_v52, 4  ;;  %v1001_v61 = vsel %vm650_vm1, %v997_v52, %v1000_v43  ;;  %507 = vrot.lane.b32.xlu1 %v5636_v19, %s5560_s22  ;;  %509 = vrot.lane.b32.xlu2 %v5656_v26, %s5560_s22  ;;  %v1703_v0 = vshrl.u32 %v929_v54, 16 }
 0x15d   :  { %v5993_v4 = vperm.slane %v1001_v61, %v5783_v14  ;;  %v886_v49 = vrot.slane %v885_v57, 4  ;;  %v889_v6 = vsel %vm650_vm1, %v885_v57, %v888_v20  ;;  %505 = vrot.lane.b32.xlu0 %v5628_v18, %s5560_s22 }
 0x15e   :  { %v999_v13 = vsel %vm650_vm1, %v998_v23, %v991_v59  ;;  %v897_v36 = vperm.slane %v889_v6, %v5783_v14  ;;  %v6003_v11 = vpop.permute.xlu1 %461  ;;  %v372_v16 = vpop.permute.xlu2 %371 }
 0x15f   :  { %v6006_v41 = vperm.slane %v999_v13, %v5783_v14  ;;  %v1012_v25 = vrot.slane %v5993_v4, 4  ;;  %v1758_v20 = vshrl.u32 %v5993_v4, 16  ;;  %v887_v17 = vsel %vm650_vm1, %v886_v49, %v5848_v1  ;;  %v440_v42 = vpop.permute.xlu0 %439 }
 0x160   :  { %v893_v51 = vperm.slane %v887_v17, %v5783_v14  ;;  %v900_v59 = vrot.slane %v897_v36, 4  ;;  %v1692_v43 = vpack.i.b16 %v925_v10, %v897_v36  ;;  %v1694_v52 = vshrl.u32 %v897_v36, 16 }
 0x161   :  { %v1010_v55 = vrot.slane %v6006_v41, 4  ;;  %v6015_v57 = vsel %vm650_vm1, 0, %v1012_v25  ;;  %v1742_v23 = vshrl.u32 %v6006_v41, 16  ;;  %v1020_v61 = vrot.slane %v440_v42, 4 }
 0x162   :  { %v1766_v6 = vshrl.u32 %v6015_v57, 16  ;;  %v898_v13 = vrot.slane %v893_v51, 4  ;;  %v901_v37 = vsel %vm650_vm1, 0, %v900_v59  ;;  %v1676_v1 = vpack.i.b16 %v5949_v21, %v893_v51 }
 0x163   :  { %v6022_v49 = vsel %vm650_vm1, 0, %v1010_v55  ;;  %v1678_v10 = vshrl.u32 %v893_v51, 16  ;;  %v1696_v36 = vpack.i.b16 %v1695_v62, %v1694_v52  ;;  %v1700_v17 = vpack.i.b16 %v929_v54, %v901_v37 }
 0x164   :  { %v1750_v39 = vshrl.u32 %v6022_v49, 16  ;;  %v899_v25 = vsel %vm650_vm1, 0, %v898_v13  ;;  %v1702_v31 = vshrl.u32 %v901_v37, 16  ;;  %v2282_v28 = vrot.slane %v1692_v43, 4  ;;  %513 = vrot.lane.b32.xlu1 %v5696_v32, %s5560_s22  ;;  %515 = vrot.lane.b32.xlu2 %v5704_v33, %s5560_s22 }
 0x165   :  { %v1680_v42 = vpack.i.b16 %v1679_v50, %v1678_v10  ;;  %v1684_v21 = vpack.i.b16 %v5981_v53, %v899_v25  ;;  %v1686_v59 = vshrl.u32 %v899_v25, 16  ;;  %v2288_v55 = vrot.slane %v1700_v17, 4  ;;  %511 = vrot.lane.b32.xlu0 %v5664_v27, %s5560_s22 }
 0x166   :  { %v1704_v54 = vpack.i.b16 %v1703_v0, %v1702_v31  ;;  %v2283_v62 = vsel %vm650_vm1, %v2282_v28, %v1676_v1  ;;  %v2310_v51 = vrot.slane %v1696_v36, 4  ;;  %v1021_v37 = vsel %vm650_vm1, %v1020_v61, %v5883_v44  ;;  %v6036_v43 = vpop.permute.xlu1 %323  ;;  %v418_v52 = vpop.permute.xlu2 %417 }
 0x167   :  { %v1688_v13 = vpack.i.b16 %v1687_v8, %v1686_v59  ;;  %v6039_v50 = vperm.slane %v2283_v62, %v5763_v60  ;;  %v2289_v53 = vsel %vm650_vm1, %v2288_v55, %v1684_v21  ;;  %v1025_v10 = vperm.slane %v1021_v37, %v5763_v60  ;;  %v322_v17 = vpop.permute.xlu0 %321 }
 0x168   :  { %v6044_v31 = vperm.slane %v2289_v53, %v5763_v60  ;;  %v2311_v28 = vsel %vm650_vm1, %v2310_v51, %v1680_v42  ;;  %v2316_v0 = vrot.slane %v1704_v54, 4  ;;  %v1210_v1 = vrot.slane %v372_v16, 4 }
 0x169   :  { %v2296_v44 = vrot.slane %v6039_v50, 4  ;;  %v6049_v61 = vperm.slane %v2311_v28, %v5763_v60  ;;  %v1026_v8 = vrot.slane %v1025_v10, 4  ;;  %v1029_v36 = vsel %vm650_vm1, %v1025_v10, %v1028_v34 }
 0x16a   :  { %v2294_v25 = vrot.slane %v6044_v31, 4  ;;  %v2317_v21 = vsel %vm650_vm1, %v2316_v0, %v1688_v13  ;;  %v1037_v59 = vperm.slane %v1029_v36, %v5783_v14  ;;  %v1211_v42 = vsel %vm650_vm1, %v1210_v1, %v5704_v33 }
 0x16b   :  { %v6060_v16 = vperm.slane %v2317_v21, %v5763_v60  ;;  %v2324_v55 = vrot.slane %v6049_v61, 4  ;;  %v1027_v54 = vsel %vm650_vm1, %v1026_v8, %v5895_v9  ;;  %v6066_v62 = vperm.slane %v1211_v42, %v5763_v60 }
 0x16c   :  { %v1033_v34 = vperm.slane %v1027_v54, %v5783_v14  ;;  %v1040_v51 = vrot.slane %v1037_v59, 4  ;;  %v1756_v37 = vpack.i.b16 %v1037_v59, %v5993_v4  ;;  %v1759_v13 = vshrl.u32 %v1037_v59, 16  ;;  %559 = vrot.lane.b32.xlu1 %v5664_v27, %s5561_s23  ;;  %581 = vrot.lane.b32.xlu2 %v5656_v26, %s5562_s25 }
 0x16d   :  { %v2322_v53 = vrot.slane %v6060_v16, 4  ;;  %v1104_v10 = vrot.slane %v418_v52, 4  ;;  %557 = vrot.lane.b32.xlu0 %v5656_v26, %s5561_s23  ;;  %v2295_v28 = vsel %vm650_vm1, %v2294_v25, %v6039_v50 }
 0x16e   :  { %v1038_v0 = vrot.slane %v1033_v34, 4  ;;  %v1041_v1 = vsel %vm650_vm1, 0, %v1040_v51  ;;  %v1740_v8 = vpack.i.b16 %v1033_v34, %v6006_v41  ;;  %v1743_v36 = vshrl.u32 %v1033_v34, 16  ;;  %v370_v21 = vpop.permute.xlu1 %369  ;;  %v444_v59 = vpop.permute.xlu2 %443 }
 0x16f   :  { %v1760_v42 = vpack.i.b16 %v1759_v13, %v1758_v20  ;;  %v1764_v54 = vpack.i.b16 %v1041_v1, %v6015_v57  ;;  %v1767_v52 = vshrl.u32 %v1041_v1, 16  ;;  %v2394_v22 = vrot.slane %v1756_v37, 4  ;;  %v348_v58 = vpop.permute.xlu0 %347 }
 0x170   :  { %v1039_v40 = vsel %vm650_vm1, 0, %v1038_v0  ;;  %v1744_v25 = vpack.i.b16 %v1743_v36, %v1742_v23  ;;  %v1105_v51 = vsel %vm650_vm1, %v1104_v10, %v322_v17  ;;  %v1098_v7 = vrot.slane %v370_v21, 4 }
 0x171   :  { %v1748_v34 = vpack.i.b16 %v1039_v40, %v6022_v49  ;;  %v1751_v9 = vshrl.u32 %v1039_v40, 16  ;;  %v1768_v4 = vpack.i.b16 %v1767_v52, %v1766_v6  ;;  %v2395_v20 = vsel %vm650_vm1, %v2394_v22, %v1740_v8 }
 0x172   :  { %v6094_v13 = vperm.slane %v2395_v20, %v5763_v60  ;;  %v2400_v37 = vrot.slane %v1764_v54, 4  ;;  %v2422_v1 = vrot.slane %v1760_v42, 4  ;;  %v1109_v0 = vperm.slane %v1105_v51, %v5763_v60 }
 0x173   :  { %v1752_v41 = vpack.i.b16 %v1751_v9, %v1750_v39  ;;  %v2428_v23 = vrot.slane %v1768_v4, 4  ;;  %v1099_v17 = vsel %vm650_vm1, %v1098_v7, %v5696_v32  ;;  %v1244_v40 = vrot.slane %v444_v59, 4 }
 0x174   :  { %v2401_v57 = vsel %vm650_vm1, %v2400_v37, %v1748_v34  ;;  %v2423_v22 = vsel %vm650_vm1, %v2422_v1, %v1744_v25  ;;  %v1110_v10 = vrot.slane %v1109_v0, 4  ;;  %605 = vrot.lane.b32.xlu1 %v5656_v26, %s5563_s26  ;;  %607 = vrot.lane.b32.xlu2 %v5664_v27, %s5563_s26  ;;  %v1103_v9 = vperm.slane %v1099_v17, %v5763_v60 }
 0x175   :  { %v6109_v39 = vperm.slane %v2401_v57, %v5763_v60  ;;  %v6112_v7 = vperm.slane %v2423_v22, %v5763_v60  ;;  %v2429_v49 = vsel %vm650_vm1, %v2428_v23, %v1752_v41  ;;  %583 = vrot.lane.b32.xlu0 %v5664_v27, %s5562_s25  ;;  %v1245_v36 = vsel %vm650_vm1, %v1244_v40, %v348_v58 }
 0x176   :  { %v6119_v8 = vperm.slane %v2429_v49, %v5763_v60  ;;  %v396_v21 = vpop.permute.xlu1 %395  ;;  %v6122_v59 = vpop.permute.xlu2 %325  ;;  %v2297_v42 = vsel %vm650_vm1, %v6044_v31, %v2296_v44  ;;  %v6129_v54 = vperm.slane %v2295_v28, %v5783_v14  ;;  %v1111_v51 = vsel %vm650_vm1, %v1110_v10, %v1103_v9 }
 0x177   :  { %v2406_v52 = vrot.slane %v6109_v39, 4  ;;  %v1112_v34 = vrot.slane %v1103_v9, 4  ;;  %v394_v4 = vpop.permute.xlu0 %393  ;;  %v6136_v20 = vperm.slane %v1111_v51, %v5783_v14  ;;  %v1249_v50 = vperm.slane %v1245_v36, %v5763_v60 }
 0x178   :  { %v1238_v37 = vrot.slane %v396_v21, 4  ;;  %v1126_v28 = vrot.slane %v394_v4, 4  ;;  %v6145_v1 = vperm.slane %v2297_v42, %v5783_v14 }
 0x179   :  { %v6141_v31 = vsel %vm650_vm1, %v2406_v52, %v6094_v13  ;;  %v1113_v44 = vsel %vm650_vm1, %v1109_v0, %v1112_v34  ;;  %v1122_v23 = vrot.slane %v6136_v20, 4  ;;  %v1250_v40 = vrot.slane %v1249_v50, 4 }
 0x17a   :  { %v6148_v41 = vperm.slane %v1113_v44, %v5783_v14  ;;  %v1239_v57 = vsel %vm650_vm1, %v1238_v37, %v5912_v38  ;;  %v1127_v22 = vsel %vm650_vm1, %v1126_v28, %v5885_v46  ;;  %v2306_v0 = vrot.slane %v6129_v54, 4 }
 0x17b   :  { %v2308_v10 = vrot.slane %v6145_v1, 4  ;;  %v6159_v49 = vsel %vm650_vm1, 0, %v1122_v23  ;;  %v1243_v21 = vperm.slane %v1239_v57, %v5763_v60  ;;  %v1131_v38 = vperm.slane %v1127_v22, %v5763_v60 }
 0x17c   :  { %v1124_v9 = vrot.slane %v6148_v41, 4  ;;  %v1822_v36 = vshrl.u32 %v6148_v41, 16  ;;  %631 = vrot.lane.b32.xlu1 %v5664_v27, %s5564_s27  ;;  %533 = vrot.lane.b32.xlu2 %v5656_v26, %s5565_s28  ;;  %v6173_v42 = vsel %vm650_vm1, 0, %v2306_v0  ;;  %v8878_v5 = vshrl.u32 %v6136_v20, 16 }
 0x17d   :  { %629 = vrot.lane.b32.xlu0 %v5656_v26, %s5564_s27  ;;  %v6176_v52 = vsel %vm650_vm1, 0, %v2308_v10  ;;  %v1251_v51 = vsel %vm650_vm1, %v1250_v40, %v1243_v21  ;;  %v1252_v34 = vrot.slane %v1243_v21, 4  ;;  %v2323_v26 = vsel %vm650_vm1, %v2322_v53, %v6049_v61 }
 0x17e   :  { %v442_v4 = vpop.permute.xlu1 %441  ;;  %v6180_v37 = vsel %vm650_vm1, 0, %v1124_v9  ;;  %v6182_v44 = vpop.permute.xlu2 %351  ;;  %v6189_v28 = vperm.slane %v1251_v51, %v5783_v14  ;;  %v1140_v23 = vrot.slane %v1131_v38, 4  ;;  %v2325_v9 = vsel %vm650_vm1, %v6060_v16, %v2324_v55 }
 0x17f   :  { %v1132_v57 = vrot.slane %v442_v4, 4  ;;  %v1830_v22 = vshrl.u32 %v6180_v37, 16  ;;  %v420_v40 = vpop.permute.xlu0 %419  ;;  %v1253_v0 = vsel %vm650_vm1, %v1249_v50, %v1252_v34  ;;  %v6198_v21 = vperm.slane %v2323_v26, %v5783_v14 }
 0x180   :  { %v1216_v10 = vrot.slane %v420_v40, 4  ;;  %v6201_v53 = vperm.slane %v1253_v0, %v5783_v14  ;;  %v1262_v51 = vrot.slane %v6189_v28, 4  ;;  %v6211_v16 = vperm.slane %v2325_v9, %v5783_v14 }
 0x181   :  { %v1133_v25 = vsel %vm650_vm1, %v1132_v57, %v5959_v12  ;;  %v2334_v55 = vrot.slane %v6198_v21, 4 }
 0x182   :  { %v1137_v50 = vperm.slane %v1133_v25, %v5763_v60  ;;  %v1217_v61 = vsel %vm650_vm1, %v1216_v10, %v6036_v43  ;;  %v6215_v34 = vsel %vm650_vm1, 0, %v1262_v51  ;;  %v1264_v26 = vrot.slane %v6201_v53, 4 }
 0x183   :  { %v1221_v0 = vperm.slane %v1217_v61, %v5763_v60  ;;  %v6227_v43 = vsel %vm650_vm1, 0, %v2334_v55  ;;  %v8876_v51 = vrot.slane %v6066_v62, 4 }
 0x184   :  { %v1138_v25 = vrot.slane %v1137_v50, 4  ;;  %v1141_v57 = vsel %vm650_vm1, %v1137_v50, %v1140_v23  ;;  %553 = vrot.lane.b32.xlu1 %v5628_v18, %s5561_s23  ;;  %555 = vrot.lane.b32.xlu2 %v5636_v19, %s5561_s23  ;;  %v6234_v58 = vsel %vm650_vm1, 0, %v1264_v26 }
 0x185   :  { %v1149_v10 = vperm.slane %v1141_v57, %v5783_v14  ;;  %v1222_v9 = vrot.slane %v1221_v0, 4  ;;  %v1225_v61 = vsel %vm650_vm1, %v1221_v0, %v8876_v51  ;;  %535 = vrot.lane.b32.xlu0 %v5664_v27, %s5565_s28 }
 0x186   :  { %v1139_v23 = vsel %vm650_vm1, %v1138_v25, %v1131_v38  ;;  %v6240_v50 = vperm.slane %v1225_v61, %v5783_v14  ;;  %v6243_v6 = vpop.permute.xlu1 %467  ;;  %v6245_v57 = vpop.permute.xlu2 %397 }
 0x187   :  { %8877 = vst [vmem:[#allocation18_spill] sm:$0xff] %v6243_v6  ;;  %v1145_v0 = vperm.slane %v1139_v23, %v5783_v14  ;;  %v1152_v26 = vrot.slane %v1149_v10, 4  ;;  %v1820_v51 = vpack.i.b16 %v1149_v10, %v6148_v41  ;;  %v1823_v40 = vshrl.u32 %v1149_v10, 16  ;;  %v6250_v27 = vpop.permute.xlu0 %465 }
 0x188   :  { %v1223_v38 = vsel %vm650_vm1, %v1222_v9, %v6066_v62  ;;  %v1236_v25 = vrot.slane %v6240_v50, 4  ;;  %v1884_v61 = vpack.i.b16 %v6201_v53, %v6240_v50  ;;  %v1886_v55 = vshrl.u32 %v6240_v50, 16 }
 0x189   :  { %v1150_v4 = vrot.slane %v1145_v0, 4  ;;  %v1153_v12 = vsel %vm650_vm1, 0, %v1152_v26  ;;  %v1804_v23 = vpack.i.b16 %v1145_v0, %v6136_v20  ;;  %v1807_v46 = vshrl.u32 %v1145_v0, 16 }
 0x18a   :  { %v1824_v10 = vpack.i.b16 %v1823_v40, %v1822_v36  ;;  %v1828_v17 = vpack.i.b16 %v1153_v12, %v6180_v37  ;;  %v1831_v30 = vshrl.u32 %v1153_v12, 16  ;;  %v2506_v62 = vrot.slane %v1820_v51, 4 }
 0x18b   :  { %v1151_v9 = vsel %vm650_vm1, 0, %v1150_v4  ;;  %v1808_v2 = vpack.i.b16 %v1807_v46, %v8878_v5  ;;  %v1229_v50 = vperm.slane %v1223_v38, %v5783_v14  ;;  %v1237_v29 = vsel %vm650_vm1, 0, %v1236_v25 }
 0x18c   :  { %v1812_v26 = vpack.i.b16 %v1151_v9, %v6159_v49  ;;  %v1815_v6 = vshrl.u32 %v1151_v9, 16  ;;  %v1832_v0 = vpack.i.b16 %v1831_v30, %v1830_v22  ;;  %v2507_v41 = vsel %vm650_vm1, %v2506_v62, %v1804_v23  ;;  %579 = vrot.lane.b32.xlu1 %v5636_v19, %s5562_s25  ;;  %601 = vrot.lane.b32.xlu2 %v5628_v18, %s5563_s26 }
 0x18d   :  { %v2511_v36 = vperm.slane %v2507_v41, %v5763_v60  ;;  %v2512_v20 = vrot.slane %v1828_v17, 4  ;;  %v2534_v5 = vrot.slane %v1824_v10, 4  ;;  %v1234_v46 = vrot.slane %v1229_v50, 4  ;;  %577 = vrot.lane.b32.xlu0 %v5628_v18, %s5562_s25 }
 0x18e   :  { %v8879_v37 = vshrl.u32 %v6159_v49, 16  ;;  %v2540_v30 = vrot.slane %v1832_v0, 4  ;;  %v1868_v22 = vpack.i.b16 %v6189_v28, %v1229_v50  ;;  %v1870_v40 = vshrl.u32 %v1229_v50, 16  ;;  %v6280_v12 = vpop.permute.xlu1 %303  ;;  %v424_v51 = vpop.permute.xlu2 %423 }
 0x18f   :  { %v2513_v38 = vsel %vm650_vm1, %v2512_v20, %v1812_v26  ;;  %v2520_v25 = vrot.slane %v2511_v36, 4  ;;  %v2535_v17 = vsel %vm650_vm1, %v2534_v5, %v1808_v2  ;;  %v1235_v23 = vsel %vm650_vm1, 0, %v1234_v46  ;;  %v302_v10 = vpop.permute.xlu0 %301 }
 0x190   :  { %v1816_v4 = vpack.i.b16 %v1815_v6, %v8879_v37  ;;  %v2517_v62 = vperm.slane %v2513_v38, %v5763_v60  ;;  %v6287_v49 = vperm.slane %v2535_v17, %v5763_v60  ;;  %v8881_v9 = vshrl.u32 %v6189_v28, 16 }
 0x191   :  { %v1876_v26 = vpack.i.b16 %v6215_v34, %v1235_v23  ;;  %v1878_v41 = vshrl.u32 %v1235_v23, 16  ;;  %v8883_v2 = vshrl.u32 %v6201_v53, 16  ;;  %v1894_v38 = vshrl.u32 %v1237_v29, 16 }
 0x192   :  { %8880 = vst [vmem:[#allocation19_spill] sm:$0xff] %v6287_v49  ;;  %v2541_v6 = vsel %vm650_vm1, %v2540_v30, %v1816_v4  ;;  %v1872_v50 = vpack.i.b16 %v8881_v9, %v1870_v40  ;;  %v2518_v5 = vrot.slane %v2517_v62, 4  ;;  %v6299_v46 = vsel %vm650_vm1, %v2517_v62, %v2520_v25 }
 0x193   :  { %v6293_v0 = vperm.slane %v2541_v6, %v5763_v60  ;;  %v1888_v20 = vpack.i.b16 %v8883_v2, %v1886_v55  ;;  %8884 = vst [vmem:[#allocation21_spill] sm:$0xff] %v6299_v46  ;;  %v1892_v4 = vpack.i.b16 %v6234_v58, %v1237_v29  ;;  %v8885_v30 = vshrl.u32 %v6215_v34, 16 }
 0x194   :  { %v2618_v17 = vrot.slane %v1884_v61, 4  ;;  %v2519_v23 = vsel %vm650_vm1, %v2518_v5, %v2511_v36  ;;  %v1350_v55 = vrot.slane %v6245_v57, 4  ;;  %625 = vrot.lane.b32.xlu1 %v5628_v18, %s5564_s27  ;;  %627 = vrot.lane.b32.xlu2 %v5636_v19, %s5564_s27  ;;  %v8888_v29 = vshrl.u32 %v6234_v58, 16 }
 0x195   :  { %8882 = vst [vmem:[#allocation20_spill] sm:$0xff] %v6293_v0  ;;  %v2546_v28 = vrot.slane %v6293_v0, 4  ;;  %v1880_v40 = vpack.i.b16 %v8885_v30, %v1878_v41  ;;  %v2624_v6 = vrot.slane %v1892_v4, 4  ;;  %v2646_v53 = vrot.slane %v1888_v20, 4  ;;  %603 = vrot.lane.b32.xlu0 %v5636_v19, %s5563_s26 }
 0x196   :  { %v6313_v25 = vperm.slane %v2519_v23, %v5783_v14  ;;  %v1896_v61 = vpack.i.b16 %v8888_v29, %v1894_v38  ;;  %v2619_v36 = vsel %vm650_vm1, %v2618_v17, %v1868_v22  ;;  %v1351_v41 = vsel %vm650_vm1, %v1350_v55, %v302_v10  ;;  %v6328_v2 = vpop.permute.xlu1 %349  ;;  %v6330_v20 = vpop.permute.xlu2 %469 }
 0x197   :  { %v6317_v34 = vsel %vm650_vm1, %v2546_v28, %v6287_v49  ;;  %v2623_v57 = vperm.slane %v2619_v36, %v5763_v60  ;;  %v2625_v62 = vsel %vm650_vm1, %v2624_v6, %v1876_v26  ;;  %v2647_v9 = vsel %vm650_vm1, %v2646_v53, %v1872_v50  ;;  %v328_v28 = vpop.permute.xlu0 %327 }
 0x198   :  { %8886 = vst [vmem:[#allocation22_spill] sm:$0xff] %v6313_v25  ;;  %v2629_v58 = vperm.slane %v2625_v62, %v5763_v60  ;;  %v6334_v5 = vperm.slane %v2647_v9, %v5763_v60  ;;  %v2652_v22 = vrot.slane %v1896_v61, 4  ;;  %v6337_v4 = vperm.slane %v1351_v41, %v5763_v60 }
 0x199   :  { %8887 = vst [vmem:[#allocation23_spill] sm:$0xff] %v6317_v34  ;;  %v2632_v30 = vrot.slane %v2623_v57, 4  ;;  %v1440_v26 = vrot.slane %v424_v51, 4  ;;  %v8890_v50 = vrot.slane %v6211_v16, 4  ;;  %v3084_v38 = vpack.i.b16 %v6198_v21, %v6129_v54 }
 0x19a   :  { %8889 = vst [vmem:[#allocation24_spill] sm:$0xff] %v6334_v5  ;;  %v2630_v17 = vrot.slane %v2629_v58, 4  ;;  %v2653_v23 = vsel %vm650_vm1, %v2652_v22, %v1880_v40  ;;  %v3086_v61 = vshrl.u32 %v6129_v54, 16  ;;  %v3087_v40 = vshrl.u32 %v6198_v21, 16 }
 0x19b   :  { %v2337_v10 = vsel %vm650_vm1, 0, %v8890_v50  ;;  %v6348_v55 = vsel %vm650_vm1, %v2629_v58, %v2632_v30  ;;  %v6351_v29 = vperm.slane %v2653_v23, %v5763_v60  ;;  %v1441_v51 = vsel %vm650_vm1, %v1440_v26, %v328_v28 }
 0x19c   :  { %8891 = vst [vmem:[#allocation25_spill] sm:$0xff] %v6348_v55  ;;  %v2631_v36 = vsel %vm650_vm1, %v2630_v17, %v2623_v57  ;;  %v1445_v62 = vperm.slane %v1441_v51, %v5763_v60  ;;  %v3092_v9 = vpack.i.b16 %v6227_v43, %v6173_v42  ;;  %531 = vrot.lane.b32.xlu1 %v5636_v19, %s5565_s28  ;;  %v3094_v54 = vshrl.u32 %v6173_v42, 16 }
 0x19d   :  { %8892 = vst [vmem:[#allocation26_spill] sm:$0xff] %v6351_v29  ;;  %v6361_v41 = vperm.slane %v2631_v36, %v5783_v14  ;;  %v2658_v58 = vrot.slane %v6351_v29, 4  ;;  %565 = vrot.lane.b32.xlu2 %v5744_v47, %s5561_s23  ;;  %v3095_v57 = vshrl.u32 %v6227_v43, 16  ;;  %529 = vrot.lane.b32.xlu0 %v5628_v18, %s5565_s28  ;;  %v3088_v21 = vpack.i.b16 %v3087_v40, %v3086_v61 }
 0x19e   :  { %v1446_v22 = vrot.slane %v1445_v62, 4  ;;  %v3100_v28 = vpack.i.b16 %v6211_v16, %v6145_v1  ;;  %v3102_v30 = vshrl.u32 %v6145_v1, 16  ;;  %v376_v26 = vpop.permute.xlu1 %375  ;;  %v6379_v50 = vpop.permute.xlu2 %483  ;;  %v3103_v43 = vshrl.u32 %v6211_v16, 16 }
 0x19f   :  { %8893 = vst [vmem:[#allocation27_spill] sm:$0xff] %v6361_v41  ;;  %v6377_v19 = vsel %vm650_vm1, %v2658_v58, %v6334_v5  ;;  %v3096_v42 = vpack.i.b16 %v3095_v57, %v3094_v54  ;;  %v3108_v17 = vpack.i.b16 %v2337_v10, %v6176_v52  ;;  %v1434_v23 = vrot.slane %v376_v26, 4  ;;  %v374_v18 = vpop.permute.xlu0 %373 }
 0x1a0   :  { %8894 = vst [vmem:[#allocation28_spill] sm:$0xff] %v6377_v19  ;;  %v3110_v51 = vshrl.u32 %v6176_v52, 16  ;;  %v3111_v61 = vshrl.u32 %v2337_v10, 16  ;;  %v3690_v36 = vrot.slane %v3100_v28, 4  ;;  %v1322_v40 = vrot.slane %v374_v18, 4 }
 0x1a1   :  { %v3104_v1 = vpack.i.b16 %v3103_v43, %v3102_v30  ;;  %v3696_v37 = vrot.slane %v3108_v17, 4  ;;  %v8895_v58 = vrot.slane %v6094_v13, 4  ;;  %v1435_v54 = vsel %vm650_vm1, %v1434_v23, %v5746_v48 }
 0x1a2   :  { %v3112_v16 = vpack.i.b16 %v3111_v61, %v3110_v51  ;;  %v3691_v57 = vsel %vm650_vm1, %v3690_v36, %v3084_v38  ;;  %v6393_v26 = vperm.slane %v6141_v31, %v5783_v14  ;;  %v1439_v52 = vperm.slane %v1435_v54, %v5763_v60 }
 0x1a3   :  { %v2409_v6 = vsel %vm650_vm1, %v6109_v39, %v8895_v58  ;;  %v1323_v10 = vsel %vm650_vm1, %v1322_v40, %v5744_v47  ;;  %v6399_v13 = vperm.slane %v3691_v57, %v5763_v60  ;;  %v3697_v39 = vsel %vm650_vm1, %v3696_v37, %v3092_v9 }
 0x1a4   :  { %v1327_v28 = vperm.slane %v1323_v10, %v5763_v60  ;;  %v6404_v30 = vperm.slane %v3697_v39, %v5763_v60  ;;  %v3718_v38 = vrot.slane %v3104_v1, 4  ;;  %v3724_v43 = vrot.slane %v3112_v16, 4  ;;  %589 = vrot.lane.b32.xlu1 %v5744_v47, %s5562_s25 }
 0x1a5   :  { %v1447_v31 = vsel %vm650_vm1, %v1446_v22, %v1439_v52  ;;  %v1448_v17 = vrot.slane %v1439_v52, 4  ;;  %591 = vrot.lane.b32.xlu2 %v5746_v48, %s5562_s25  ;;  %v6412_v23 = vperm.slane %v2409_v6, %v5783_v14  ;;  %v2418_v37 = vrot.slane %v6393_v26, 4  ;;  %567 = vrot.lane.b32.xlu0 %v5746_v48, %s5561_s23 }
 0x1a6   :  { %v6416_v9 = vperm.slane %v1447_v31, %v5783_v14  ;;  %v1336_v18 = vrot.slane %v1327_v28, 4  ;;  %v3702_v22 = vrot.slane %v6404_v30, 4  ;;  %v3719_v51 = vsel %vm650_vm1, %v3718_v38, %v3088_v21  ;;  %v422_v36 = vpop.permute.xlu1 %421  ;;  %v6423_v40 = vpop.permute.xlu2 %489 }
 0x1a7   :  { %v1449_v61 = vsel %vm650_vm1, %v1445_v62, %v1448_v17  ;;  %8896 = vst [vmem:[#allocation29_spill] sm:$0xff] %v6423_v40  ;;  %v6426_v6 = vperm.slane %v3719_v51, %v5763_v60  ;;  %v3725_v1 = vsel %vm650_vm1, %v3724_v43, %v3096_v42  ;;  %v6430_v58 = vsel %vm650_vm1, 0, %v2418_v37  ;;  %v400_v62 = vpop.permute.xlu0 %399 }
 0x1a8   :  { %v6433_v54 = vperm.slane %v1449_v61, %v5783_v14  ;;  %v1458_v16 = vrot.slane %v6416_v9, 4  ;;  %v1328_v57 = vrot.slane %v422_v36, 4  ;;  %v1462_v52 = vrot.slane %v400_v62, 4 }
 0x1a9   :  { %v3703_v10 = vsel %vm650_vm1, %v3702_v22, %v6399_v13  ;;  %v6440_v39 = vperm.slane %v3725_v1, %v5763_v60  ;;  %v2420_v42 = vrot.slane %v6412_v23, 4  ;;  %v8900_v21 = vrot.slane %v6112_v7, 4 }
 0x1aa   :  { %v6444_v38 = vsel %vm650_vm1, 0, %v1458_v16  ;;  %v1460_v43 = vrot.slane %v6433_v54, 4  ;;  %v1329_v17 = vsel %vm650_vm1, %v1328_v57, %v6122_v59  ;;  %v1463_v22 = vsel %vm650_vm1, %v1462_v52, %v6280_v12 }
 0x1ab   :  { %v1333_v51 = vperm.slane %v1329_v17, %v5763_v60  ;;  %v6455_v61 = vperm.slane %v3703_v10, %v5783_v14  ;;  %v1467_v36 = vperm.slane %v1463_v22, %v5763_v60  ;;  %v3730_v16 = vrot.slane %v6440_v39, 4 }
 0x1ac   :  { %v6459_v1 = vsel %vm650_vm1, 0, %v1460_v43  ;;  %v6463_v62 = vsel %vm650_vm1, 0, %v2420_v42  ;;  %615 = vrot.lane.b32.xlu1 %v5746_v48, %s5563_s26  ;;  %v8904_v41 = vshrl.u32 %v6416_v9, 16 }
 0x1ad   :  { %8897 = vst [vmem:[#allocation30_spill] sm:$0xff] %v6455_v61  ;;  %v1334_v59 = vrot.slane %v1333_v51, 4  ;;  %v1337_v57 = vsel %vm650_vm1, %v1333_v51, %v1336_v18  ;;  %637 = vrot.lane.b32.xlu2 %v5744_v47, %s5564_s27  ;;  %v4461_v52 = vshrl.u32 %v6455_v61, 16  ;;  %v1476_v43 = vrot.slane %v1467_v36, 4  ;;  %613 = vrot.lane.b32.xlu0 %v5744_v47, %s5563_s26 }
 0x1ae   :  { %v6473_v10 = vperm.slane %v1337_v57, %v5783_v14  ;;  %v3731_v18 = vsel %vm650_vm1, %v3730_v16, %v6426_v6  ;;  %v3714_v42 = vrot.slane %v6455_v61, 4  ;;  %v448_v51 = vpop.permute.xlu1 %447  ;;  %v6481_v22 = vpop.permute.xlu2 %495  ;;  %v8899_v57 = vrot.slane %v6119_v8, 4 }
 0x1af   :  { %v1335_v17 = vsel %vm650_vm1, %v1334_v59, %v1327_v28  ;;  %v6484_v37 = vperm.slane %v3731_v18, %v5783_v14  ;;  %v2437_v16 = vsel %vm650_vm1, %v6119_v8, %v8900_v21  ;;  %v1468_v53 = vrot.slane %v448_v51, 4  ;;  %v446_v18 = vpop.permute.xlu0 %445 }
 0x1b0   :  { %v2435_v12 = vsel %vm650_vm1, %v8899_v57, %v6112_v7  ;;  %v6495_v31 = vperm.slane %v1335_v17, %v5783_v14  ;;  %v1348_v28 = vrot.slane %v6473_v10, 4  ;;  %v1356_v61 = vrot.slane %v446_v18, 4 }
 0x1b1   :  { %8898 = vst [vmem:[#allocation31_spill] sm:$0xff] %v6484_v37  ;;  %v4462_v34 = vshrl.u32 %v6484_v37, 16  ;;  %v6501_v0 = vsel %vm650_vm1, 0, %v3714_v42  ;;  %v3742_v7 = vrot.slane %v6484_v37, 4  ;;  %v1469_v17 = vsel %vm650_vm1, %v1468_v53, %v6182_v44 }
 0x1b2   :  { %v1346_v57 = vrot.slane %v6495_v31, 4  ;;  %v6506_v8 = vsel %vm650_vm1, 0, %v1348_v28  ;;  %v1473_v18 = vperm.slane %v1469_v17, %v5763_v60  ;;  %v1357_v42 = vsel %vm650_vm1, %v1356_v61, %v6328_v2 }
 0x1b3   :  { %v6515_v59 = vpack.i.b16 %v4462_v34, %v4461_v52  ;;  %v1361_v28 = vperm.slane %v1357_v42, %v5763_v60  ;;  %v6522_v49 = vsel %vm650_vm1, 0, %v3742_v7  ;;  %v6525_v21 = vperm.slane %v2435_v12, %v5783_v14 }
 0x1b4   :  { %v6518_v37 = vsel %vm650_vm1, 0, %v1346_v57  ;;  %v1474_v53 = vrot.slane %v1473_v18, 4  ;;  %v1477_v17 = vsel %vm650_vm1, %v1473_v18, %v1476_v43  ;;  %517 = vrot.lane.b32.xlu1 %v5744_v47, %s5560_s22  ;;  %v8902_v52 = vrot.slane %v6337_v4, 4 }
 0x1b5   :  { %8901 = vst [vmem:[#allocation32_spill] sm:$0xff] %v6515_v59  ;;  %519 = vrot.lane.b32.xlu2 %v5746_v48, %s5560_s22  ;;  %v1485_v2 = vperm.slane %v1477_v17, %v5783_v14  ;;  %v1362_v61 = vrot.slane %v1361_v28, 4  ;;  %639 = vrot.lane.b32.xlu0 %v5746_v48, %s5564_s27  ;;  %v6551_v17 = vperm.slane %v2437_v16, %v5783_v14 }
 0x1b6   :  { %v1365_v12 = vsel %vm650_vm1, %v1361_v28, %v8902_v52  ;;  %v1475_v7 = vsel %vm650_vm1, %v1474_v53, %v1467_v36  ;;  %v6546_v18 = vpop.permute.xlu1 %481  ;;  %v6548_v42 = vpop.permute.xlu2 %509 }
 0x1b7   :  { %v6544_v57 = vperm.slane %v1365_v12, %v5783_v14  ;;  %v1481_v52 = vperm.slane %v1475_v7, %v5783_v14  ;;  %v1488_v34 = vrot.slane %v1485_v2, 4  ;;  %v2012_v51 = vpack.i.b16 %v1485_v2, %v6433_v54  ;;  %v6556_v44 = vpop.permute.xlu0 %471 }
 0x1b8   :  { %v2015_v43 = vshrl.u32 %v1485_v2, 16  ;;  %v1363_v36 = vsel %vm650_vm1, %v1362_v61, %v6337_v4  ;;  %v8903_v2 = vshrl.u32 %v6433_v54, 16 }
 0x1b9   :  { %v1376_v53 = vrot.slane %v6544_v57, 4  ;;  %v1948_v12 = vpack.i.b16 %v6544_v57, %v6473_v10  ;;  %v1951_v16 = vshrl.u32 %v6544_v57, 16  ;;  %v1486_v25 = vrot.slane %v1481_v52, 4 }
 0x1ba   :  { %v1489_v28 = vsel %vm650_vm1, 0, %v1488_v34  ;;  %v1996_v7 = vpack.i.b16 %v1481_v52, %v6416_v9  ;;  %v1999_v46 = vshrl.u32 %v1481_v52, 16  ;;  %v2016_v19 = vpack.i.b16 %v2015_v43, %v8903_v2 }
 0x1bb   :  { %v2020_v29 = vpack.i.b16 %v1489_v28, %v6459_v1  ;;  %v2023_v5 = vshrl.u32 %v1489_v28, 16  ;;  %v2842_v4 = vrot.slane %v2012_v51, 4  ;;  %v1487_v61 = vsel %vm650_vm1, 0, %v1486_v25 }
 0x1bc   :  { %v2000_v55 = vpack.i.b16 %v1999_v46, %v8904_v41  ;;  %v1369_v57 = vperm.slane %v1363_v36, %v5783_v14  ;;  %v1377_v40 = vsel %vm650_vm1, 0, %v1376_v53  ;;  %v2004_v34 = vpack.i.b16 %v1487_v61, %v6444_v38  ;;  %543 = vrot.lane.b32.xlu1 %v5746_v48, %s5565_s28 }
 0x1bd   :  { %v2007_v59 = vshrl.u32 %v1487_v61, 16  ;;  %v8905_v52 = vshrl.u32 %v6459_v1, 16  ;;  %v2843_v43 = vsel %vm650_vm1, %v2842_v4, %v1996_v7  ;;  %561 = vrot.lane.b32.xlu2 %v5696_v32, %s5561_s23  ;;  %v2848_v25 = vrot.slane %v2020_v29, 4  ;;  %541 = vrot.lane.b32.xlu0 %v5744_v47, %s5565_s28 }
 0x1be   :  { %v2847_v46 = vperm.slane %v2843_v43, %v5763_v60  ;;  %v2870_v41 = vrot.slane %v2016_v19, 4  ;;  %v1374_v9 = vrot.slane %v1369_v57, 4  ;;  %v8906_v51 = vshrl.u32 %v6444_v38, 16  ;;  %v6588_v53 = vpop.permute.xlu1 %487  ;;  %v6590_v48 = vpop.permute.xlu2 %515 }
 0x1bf   :  { %v2024_v54 = vpack.i.b16 %v2023_v5, %v8905_v52  ;;  %v1932_v28 = vpack.i.b16 %v1369_v57, %v6495_v31  ;;  %v1935_v36 = vshrl.u32 %v1369_v57, 16  ;;  %v2849_v7 = vsel %vm650_vm1, %v2848_v25, %v2004_v34  ;;  %v486_v4 = vpop.permute.xlu0 %485 }
 0x1c0   :  { %v2008_v1 = vpack.i.b16 %v2007_v59, %v8906_v51  ;;  %v2856_v2 = vrot.slane %v2847_v46, 4  ;;  %v2871_v29 = vsel %vm650_vm1, %v2870_v41, %v2000_v55  ;;  %v1375_v19 = vsel %vm650_vm1, 0, %v1374_v9 }
 0x1c1   :  { %v2876_v5 = vrot.slane %v2024_v54, 4  ;;  %v2853_v47 = vperm.slane %v2849_v7, %v5763_v60  ;;  %v6597_v38 = vperm.slane %v2871_v29, %v5763_v60  ;;  %v8908_v61 = vshrl.u32 %v6495_v31, 16 }
 0x1c2   :  { %v1940_v34 = vpack.i.b16 %v1375_v19, %v6518_v37  ;;  %v1943_v54 = vshrl.u32 %v1375_v19, 16  ;;  %v8910_v55 = vshrl.u32 %v6473_v10, 16  ;;  %v1956_v51 = vpack.i.b16 %v1377_v40, %v6506_v8 }
 0x1c3   :  { %8907 = vst [vmem:[#allocation33_spill] sm:$0xff] %v6597_v38  ;;  %v2877_v59 = vsel %vm650_vm1, %v2876_v5, %v2008_v1  ;;  %v1936_v57 = vpack.i.b16 %v1935_v36, %v8908_v61  ;;  %v2854_v25 = vrot.slane %v2853_v47, 4  ;;  %v6609_v41 = vsel %vm650_vm1, %v2853_v47, %v2856_v2 }
 0x1c4   :  { %v6603_v52 = vperm.slane %v2877_v59, %v5763_v60  ;;  %v1952_v43 = vpack.i.b16 %v1951_v16, %v8910_v55  ;;  %8911 = vst [vmem:[#allocation35_spill] sm:$0xff] %v6609_v41  ;;  %v8912_v1 = vshrl.u32 %v6518_v37, 16  ;;  %v1959_v36 = vshrl.u32 %v1377_v40, 16  ;;  %585 = vrot.lane.b32.xlu1 %v5696_v32, %s5562_s25 }
 0x1c5   :  { %v2730_v7 = vrot.slane %v1948_v12, 4  ;;  %v2855_v29 = vsel %vm650_vm1, %v2854_v25, %v2847_v46  ;;  %v2736_v19 = vrot.slane %v1956_v51, 4  ;;  %587 = vrot.lane.b32.xlu2 %v5704_v33, %s5562_s25  ;;  %v8913_v16 = vpack.i.b16 %v6522_v49, %v6501_v0  ;;  %563 = vrot.lane.b32.xlu0 %v5704_v33, %s5561_s23 }
 0x1c6   :  { %8909 = vst [vmem:[#allocation34_spill] sm:$0xff] %v6603_v52  ;;  %v2882_v31 = vrot.slane %v6603_v52, 4  ;;  %v1944_v5 = vpack.i.b16 %v1943_v54, %v8912_v1  ;;  %v2758_v10 = vrot.slane %v1952_v43, 4  ;;  %v6627_v37 = vperm.slane %v2855_v29, %v5783_v14  ;;  %v6641_v55 = vpop.permute.xlu1 %493  ;;  %v582_v43 = vpop.permute.xlu2 %581 }
 0x1c7   :  { %v6624_v2 = vunpack.c.l.b16 %v8913_v16  ;;  %v8916_v12 = vshrl.u32 %v6506_v8, 16  ;;  %v2731_v47 = vsel %vm650_vm1, %v2730_v7, %v1932_v28  ;;  %v2737_v61 = vsel %vm650_vm1, %v2736_v19, %v1940_v34  ;;  %v6650_v1 = vpop.permute.xlu0 %491 }
 0x1c8   :  { %8914 = vst [vmem:[#allocation36_spill] sm:$0xff] %v6627_v37  ;;  %v6631_v40 = vsel %vm650_vm1, %v2882_v31, %v6597_v38  ;;  %v2735_v59 = vperm.slane %v2731_v47, %v5763_v60  ;;  %v2759_v54 = vsel %vm650_vm1, %v2758_v10, %v1936_v57  ;;  %v8917_v25 = vrot.slane %v6525_v21, 4 }
 0x1c9   :  { %8915 = vst [vmem:[#allocation37_spill] sm:$0xff] %v6631_v40  ;;  %v1960_v46 = vpack.i.b16 %v1959_v36, %v8916_v12  ;;  %v2741_v8 = vperm.slane %v2737_v61, %v5763_v60  ;;  %v6648_v28 = vperm.slane %v2759_v54, %v5763_v60  ;;  %v958_v36 = vrot.slane %v582_v43, 4 }
 0x1ca   :  { %v2447_v51 = vsel %vm650_vm1, 0, %v8917_v25  ;;  %v2744_v7 = vrot.slane %v2735_v59, 4  ;;  %v2448_v34 = vrot.slane %v6551_v17, 4  ;;  %v3148_v57 = vpack.i.b16 %v6525_v21, %v6393_v26 }
 0x1cb   :  { %8918 = vst [vmem:[#allocation38_spill] sm:$0xff] %v6648_v28  ;;  %v2764_v31 = vrot.slane %v1960_v46, 4  ;;  %v3150_v29 = vshrl.u32 %v6393_v26, 16  ;;  %v2742_v19 = vrot.slane %v2741_v8, 4  ;;  %v959_v12 = vsel %vm650_vm1, %v958_v36, %v486_v4 }
 0x1cc   :  { %v6660_v46 = vsel %vm650_vm1, %v2741_v8, %v2744_v7  ;;  %v6666_v61 = vperm.slane %v959_v12, %v5763_v60  ;;  %v2449_v54 = vsel %vm650_vm1, 0, %v2448_v34  ;;  %v3151_v43 = vshrl.u32 %v6525_v21, 16  ;;  %611 = vrot.lane.b32.xlu1 %v5704_v33, %s5563_s26 }
 0x1cd   :  { %v2765_v10 = vsel %vm650_vm1, %v2764_v31, %v1944_v5  ;;  %8919 = vst [vmem:[#allocation39_spill] sm:$0xff] %v6660_v46  ;;  %v2743_v26 = vsel %vm650_vm1, %v2742_v19, %v2735_v59  ;;  %v3156_v5 = vpack.i.b16 %v2447_v51, %v6430_v58  ;;  %v3158_v25 = vshrl.u32 %v6430_v58, 16  ;;  %633 = vrot.lane.b32.xlu2 %v5696_v32, %s5564_s27 }
 0x1ce   :  { %v6663_v47 = vperm.slane %v2765_v10, %v5763_v60  ;;  %v6674_v4 = vperm.slane %v2743_v26, %v5783_v14  ;;  %v3159_v59 = vshrl.u32 %v2447_v51, 16  ;;  %609 = vrot.lane.b32.xlu0 %v5696_v32, %s5563_s26  ;;  %v3152_v21 = vpack.i.b16 %v3151_v43, %v3150_v29  ;;  %v6692_v19 = vpop.permute.xlu1 %507  ;;  %v608_v10 = vpop.permute.xlu2 %607 }
 0x1cf   :  { %v3164_v58 = vpack.i.b16 %v6551_v17, %v6412_v23  ;;  %v3166_v36 = vshrl.u32 %v6412_v23, 16  ;;  %v3167_v7 = vshrl.u32 %v6551_v17, 16  ;;  %v3172_v51 = vpack.i.b16 %v2449_v54, %v6463_v62  ;;  %v6696_v29 = vpop.permute.xlu0 %505 }
 0x1d0   :  { %8920 = vst [vmem:[#allocation40_spill] sm:$0xff] %v6663_v47  ;;  %v2770_v8 = vrot.slane %v6663_v47, 4  ;;  %v3160_v12 = vpack.i.b16 %v3159_v59, %v3158_v25  ;;  %v3174_v26 = vshrl.u32 %v6463_v62, 16  ;;  %v1048_v43 = vrot.slane %v608_v10, 4 }
 0x1d1   :  { %8921 = vst [vmem:[#allocation41_spill] sm:$0xff] %v6674_v4  ;;  %v3168_v16 = vpack.i.b16 %v3167_v7, %v3166_v36  ;;  %v3175_v9 = vshrl.u32 %v2449_v54, 16  ;;  %v3802_v23 = vrot.slane %v3164_v58, 4  ;;  %v3808_v31 = vrot.slane %v3172_v51, 4 }
 0x1d2   :  { %v6690_v34 = vsel %vm650_vm1, %v2770_v8, %v6648_v28  ;;  %v4467_v17 = vshrl.u32 %v6501_v0, 16  ;;  %v4468_v8 = vshrl.u32 %v6522_v49, 16  ;;  %v3732_v28 = vrot.slane %v6426_v6, 4 }
 0x1d3   :  { %8922 = vst [vmem:[#allocation42_spill] sm:$0xff] %v6690_v34  ;;  %v3704_v34 = vrot.slane %v6399_v13, 4  ;;  %v3176_v47 = vpack.i.b16 %v3175_v9, %v3174_v26  ;;  %v3803_v25 = vsel %vm650_vm1, %v3802_v23, %v3148_v57  ;;  %v3830_v59 = vrot.slane %v3168_v16, 4 }
 0x1d4   :  { %v3807_v62 = vperm.slane %v3803_v25, %v5763_v60  ;;  %v3809_v10 = vsel %vm650_vm1, %v3808_v31, %v3156_v5  ;;  %v6705_v36 = vpack.i.b16 %v4468_v8, %v4467_v17  ;;  %537 = vrot.lane.b32.xlu1 %v5696_v32, %s5565_s28 }
 0x1d5   :  { %v3705_v54 = vsel %vm650_vm1, %v6404_v30, %v3704_v34  ;;  %v3813_v0 = vperm.slane %v3809_v10, %v5763_v60  ;;  %v3831_v49 = vsel %vm650_vm1, %v3830_v59, %v3152_v21  ;;  %v3836_v13 = vrot.slane %v3176_v47, 4  ;;  %539 = vrot.lane.b32.xlu2 %v5704_v33, %s5565_s28 }
 0x1d6   :  { %v3713_v9 = vperm.slane %v3705_v54, %v5783_v14  ;;  %v3835_v6 = vperm.slane %v3831_v49, %v5763_v60  ;;  %v3733_v30 = vsel %vm650_vm1, %v6440_v39, %v3732_v28  ;;  %v3816_v16 = vrot.slane %v3807_v62, 4  ;;  %635 = vrot.lane.b32.xlu0 %v5704_v33, %s5564_s27  ;;  %v6726_v21 = vpop.permute.xlu1 %513  ;;  %v6728_v58 = vpop.permute.xlu2 %533 }
 0x1d7   :  { %v3814_v47 = vrot.slane %v3813_v0, 4  ;;  %v3837_v5 = vsel %vm650_vm1, %v3836_v13, %v3160_v12  ;;  %v6724_v31 = vperm.slane %v3733_v30, %v5783_v14  ;;  %v512_v51 = vpop.permute.xlu0 %511 }
 0x1d8   :  { %v4473_v32 = vshrl.u32 %v3713_v9, 16  ;;  %v3841_v7 = vperm.slane %v3837_v5, %v5763_v60  ;;  %v3817_v34 = vsel %vm650_vm1, %v3813_v0, %v3816_v16  ;;  %v3844_v39 = vrot.slane %v3835_v6, 4 }
 0x1d9   :  { %v3716_v28 = vrot.slane %v3713_v9, 4  ;;  %v3815_v33 = vsel %vm650_vm1, %v3814_v47, %v3807_v62  ;;  %v4472_v26 = vpack.i.b16 %v6724_v31, %v3713_v9  ;;  %v4474_v12 = vshrl.u32 %v6724_v31, 16 }
 0x1da   :  { %v3825_v23 = vperm.slane %v3817_v34, %v5783_v14  ;;  %v1049_v17 = vsel %vm650_vm1, %v1048_v43, %v512_v51  ;;  %v6738_v8 = vperm.slane %v3815_v33, %v5783_v14  ;;  %v3842_v25 = vrot.slane %v3841_v7, 4 }
 0x1db   :  { %v3845_v59 = vsel %vm650_vm1, %v3841_v7, %v3844_v39  ;;  %v1053_v10 = vperm.slane %v1049_v17, %v5763_v60  ;;  %v6742_v54 = vunpack.c.l.b16 %v4472_v26  ;;  %v6744_v0 = vpack.i.b16 %v4474_v12, %v4473_v32 }
 0x1dc   :  { %8923 = vst [vmem:[#allocation43_spill] sm:$0xff] %v6738_v8  ;;  %v3853_v62 = vperm.slane %v3845_v59, %v5783_v14  ;;  %v3843_v49 = vsel %vm650_vm1, %v3842_v25, %v3835_v6  ;;  %v4509_v13 = vshrl.u32 %v6738_v8, 16  ;;  %v3826_v43 = vrot.slane %v6738_v8, 4 }
 0x1dd   :  { %v4521_v9 = vshrl.u32 %v3825_v23, 16  ;;  %v1054_v30 = vrot.slane %v1053_v10, 4  ;;  %v6751_v16 = vperm.slane %v3843_v49, %v5783_v14  ;;  %v3828_v34 = vrot.slane %v3825_v23, 4 }
 0x1de   :  { %v4520_v5 = vpack.i.b16 %v3853_v62, %v3825_v23  ;;  %v3827_v7 = vsel %vm650_vm1, 0, %v3826_v43  ;;  %v4522_v32 = vshrl.u32 %v3853_v62, 16  ;;  %v3856_v39 = vrot.slane %v3853_v62, 4  ;;  %v560_v12 = vpop.permute.xlu1 %559  ;;  %v556_v17 = vpop.permute.xlu2 %555 }
 0x1df   :  { %8924 = vst [vmem:[#allocation44_spill] sm:$0xff] %v6751_v16  ;;  %v4510_v51 = vshrl.u32 %v6751_v16, 16  ;;  %v3854_v6 = vrot.slane %v6751_v16, 4  ;;  %v4515_v33 = vshrl.u32 %v3827_v7, 16  ;;  %v6762_v59 = vsel %vm650_vm1, 0, %v3828_v34  ;;  %v558_v43 = vpop.permute.xlu0 %557 }
 0x1e0   :  { %v6757_v26 = vunpack.c.l.b16 %v4520_v5  ;;  %v6759_v25 = vpack.i.b16 %v4522_v32, %v4521_v9  ;;  %8925 = vst [vmem:[#allocation45_spill] sm:$0xff] %v6762_v59  ;;  %v6765_v49 = vsel %vm650_vm1, 0, %v3856_v39  ;;  %v6768_v23 = vsel %vm650_vm1, 0, %v3716_v28 }
 0x1e1   :  { %8926 = vst [vmem:[#allocation46_spill] sm:$0xff] %v6765_v49  ;;  %v1042_v62 = vrot.slane %v560_v12, 4  ;;  %v818_v47 = vrot.slane %v556_v17, 4  ;;  %v6770_v57 = vpack.i.b16 %v4510_v51, %v4509_v13  ;;  %v3855_v5 = vsel %vm650_vm1, 0, %v3854_v6 }
 0x1e2   :  { %8927 = vst [vmem:[#allocation47_spill] sm:$0xff] %v6768_v23  ;;  %v930_v16 = vrot.slane %v558_v43, 4  ;;  %v4514_v8 = vpack.i.b16 %v3855_v5, %v3827_v7  ;;  %v4516_v9 = vshrl.u32 %v3855_v5, 16  ;;  %v4526_v12 = vpack.i.b16 %v6765_v49, %v6762_v59 }
 0x1e3   :  { %v1043_v34 = vsel %vm650_vm1, %v1042_v62, %v5841_v63  ;;  %v819_v39 = vsel %vm650_vm1, %v818_v47, %v5850_v3  ;;  %v3744_v47 = vrot.slane %v6724_v31, 4  ;;  %v8942_v59 = vrot.slane %v6666_v61, 4 }
 0x1e4   :  { %v1047_v13 = vperm.slane %v1043_v34, %v5763_v60  ;;  %v931_v51 = vsel %vm650_vm1, %v930_v16, %v6003_v11  ;;  %v6785_v7 = vperm.slane %v819_v39, %v5763_v60  ;;  %v6787_v6 = vunpack.c.l.b16 %v4514_v8 }
 0x1e5   :  { %v935_v63 = vperm.slane %v931_v51, %v5763_v60  ;;  %v6790_v17 = vpack.i.b16 %v4516_v9, %v4515_v33  ;;  %v6792_v3 = vunpack.c.l.b16 %v4526_v12  ;;  %v8928_v11 = vrot.slane %v5955_v24, 4 }
 0x1e6   :  { %v1055_v62 = vsel %vm650_vm1, %v1054_v30, %v1047_v13  ;;  %v1056_v43 = vrot.slane %v1047_v13, 4  ;;  %v6806_v9 = vsel %vm650_vm1, 0, %v3744_v47  ;;  %v606_v30 = vpop.permute.xlu1 %605  ;;  %v602_v39 = vpop.permute.xlu2 %601  ;;  %v8930_v13 = vrot.slane %v5945_v15, 4 }
 0x1e7   :  { %v2071_v16 = vsel %vm650_vm1, %v8928_v11, %v5945_v15  ;;  %v6802_v8 = vperm.slane %v1055_v62, %v5783_v14  ;;  %v944_v34 = vrot.slane %v935_v63, 4  ;;  %8929 = vst [vmem:[#allocation48_spill] sm:$0xff] %v6806_v9  ;;  %v4478_v12 = vpack.i.b16 %v6806_v9, %v6768_v23  ;;  %v584_v32 = vpop.permute.xlu0 %583 }
 0x1e8   :  { %v1057_v31 = vsel %vm650_vm1, %v1053_v10, %v1056_v43  ;;  %v2073_v51 = vsel %vm650_vm1, %v5955_v24, %v8930_v13  ;;  %v6816_v62 = vperm.slane %v2071_v16, %v5783_v14  ;;  %v936_v43 = vrot.slane %v606_v30, 4 }
 0x1e9   :  { %v6819_v11 = vperm.slane %v1057_v31, %v5783_v14  ;;  %v1066_v47 = vrot.slane %v6802_v8, 4  ;;  %v1070_v33 = vrot.slane %v584_v32, 4  ;;  %v712_v28 = vrot.slane %v602_v39, 4 }
 0x1ea   :  { %8931 = vst [vmem:[#allocation49_spill] sm:$0xff] %v6816_v62  ;;  %v6823_v5 = vunpack.c.l.b16 %v4478_v12  ;;  %v6826_v15 = vperm.slane %v2073_v51, %v5783_v14  ;;  %v937_v31 = vsel %vm650_vm1, %v936_v43, %v6548_v42  ;;  %v2082_v43 = vrot.slane %v6816_v62, 4 }
 0x1eb   :  { %v6829_v24 = vsel %vm650_vm1, 0, %v1066_v47  ;;  %v1068_v16 = vrot.slane %v6819_v11, 4  ;;  %v941_v32 = vperm.slane %v937_v31, %v5763_v60  ;;  %v1071_v39 = vsel %vm650_vm1, %v1070_v33, %v6588_v53 }
 0x1ec   :  { %8932 = vst [vmem:[#allocation50_spill] sm:$0xff] %v6823_v5  ;;  %v713_v12 = vsel %vm650_vm1, %v712_v28, %v6696_v29  ;;  %v6842_v51 = vperm.slane %v1071_v39, %v5763_v60  ;;  %v2084_v53 = vrot.slane %v6826_v15, 4  ;;  %v6860_v39 = vsel %vm650_vm1, 0, %v2082_v43 }
 0x1ed   :  { %8933 = vst [vmem:[#allocation51_spill] sm:$0xff] %v6826_v15  ;;  %v6845_v47 = vperm.slane %v713_v12, %v5763_v60  ;;  %v6848_v42 = vsel %vm650_vm1, 0, %v1068_v16  ;;  %v942_v30 = vrot.slane %v941_v32, 4  ;;  %v945_v31 = vsel %vm650_vm1, %v941_v32, %v944_v34 }
 0x1ee   :  { %v6855_v29 = vperm.slane %v945_v31, %v5783_v14  ;;  %8934 = vst [vmem:[#allocation52_spill] sm:$0xff] %v6860_v39  ;;  %v632_v12 = vpop.permute.xlu1 %631  ;;  %v6863_v10 = vpop.permute.xlu2 %627  ;;  %v6866_v34 = vsel %vm650_vm1, 0, %v2084_v53  ;;  %v8936_v32 = vrot.slane %v5969_v35, 4  ;;  %v8937_v13 = vrot.slane %v5962_v56, 4 }
 0x1ef   :  { %v943_v16 = vsel %vm650_vm1, %v942_v30, %v935_v63  ;;  %8935 = vst [vmem:[#allocation53_spill] sm:$0xff] %v6866_v34  ;;  %v1076_v33 = vrot.slane %v632_v12, 4  ;;  %v630_v53 = vpop.permute.xlu0 %629 }
 0x1f0   :  { %v2099_v31 = vsel %vm650_vm1, %v8936_v32, %v5962_v56  ;;  %v2101_v28 = vsel %vm650_vm1, %v5969_v35, %v8937_v13  ;;  %v6877_v43 = vperm.slane %v943_v16, %v5783_v14  ;;  %v956_v63 = vrot.slane %v6855_v29, 4 }
 0x1f1   :  { %v1726_v30 = vshrl.u32 %v6855_v29, 16  ;;  %v964_v4 = vrot.slane %v630_v53, 4  ;;  %v6883_v40 = vperm.slane %v2099_v31, %v5783_v14  ;;  %v6886_v56 = vperm.slane %v2101_v28, %v5783_v14 }
 0x1f2   :  { %v954_v35 = vrot.slane %v6877_v43, 4  ;;  %v957_v13 = vsel %vm650_vm1, 0, %v956_v63  ;;  %v1710_v16 = vshrl.u32 %v6877_v43, 16  ;;  %v2958_v32 = vshrl.u32 %v6816_v62, 16 }
 0x1f3   :  { %8938 = vst [vmem:[#allocation54_spill] sm:$0xff] %v6883_v40  ;;  %v1734_v52 = vshrl.u32 %v957_v13, 16  ;;  %v965_v12 = vsel %vm650_vm1, %v964_v4, %v6728_v58  ;;  %v2110_v53 = vrot.slane %v6883_v40, 4  ;;  %v2112_v31 = vrot.slane %v6886_v56, 4 }
 0x1f4   :  { %8939 = vst [vmem:[#allocation55_spill] sm:$0xff] %v6886_v56  ;;  %v955_v46 = vsel %vm650_vm1, 0, %v954_v35  ;;  %v969_v28 = vperm.slane %v965_v12, %v5763_v60  ;;  %v2959_v63 = vshrl.u32 %v6883_v40, 16  ;;  %v2966_v4 = vshrl.u32 %v6860_v39, 16 }
 0x1f5   :  { %v1718_v37 = vshrl.u32 %v955_v46, 16  ;;  %v6902_v41 = vsel %vm650_vm1, 0, %v2110_v53  ;;  %v6905_v49 = vsel %vm650_vm1, 0, %v2112_v31 }
 0x1f6   :  { %8940 = vst [vmem:[#allocation56_spill] sm:$0xff] %v6902_v41  ;;  %v970_v58 = vrot.slane %v969_v28, 4  ;;  %v973_v35 = vsel %vm650_vm1, %v969_v28, %v8942_v59  ;;  %v6911_v12 = vpack.i.b16 %v2959_v63, %v2958_v32  ;;  %v554_v23 = vpop.permute.xlu1 %553  ;;  %v2967_v62 = vshrl.u32 %v6902_v41, 16 }
 0x1f7   :  { %8941 = vst [vmem:[#allocation57_spill] sm:$0xff] %v6905_v49  ;;  %v981_v9 = vperm.slane %v973_v35, %v5783_v14  ;;  %v566_v53 = vpop.permute.xlu2 %565  ;;  %v706_v59 = vrot.slane %v554_v23, 4  ;;  %v536_v32 = vpop.permute.xlu0 %535 }
 0x1f8   :  { %8943 = vst [vmem:[#allocation58_spill] sm:$0xff] %v6911_v12  ;;  %v971_v49 = vsel %vm650_vm1, %v970_v58, %v6666_v61  ;;  %v1378_v28 = vrot.slane %v566_v53, 4  ;;  %v1077_v31 = vsel %vm650_vm1, %v1076_v33, %v536_v32  ;;  %v6930_v61 = vpack.i.b16 %v2967_v62, %v2966_v4 }
 0x1f9   :  { %v977_v38 = vperm.slane %v971_v49, %v5783_v14  ;;  %v984_v35 = vrot.slane %v981_v9, 4  ;;  %v1724_v12 = vpack.i.b16 %v981_v9, %v6855_v29  ;;  %v1727_v39 = vshrl.u32 %v981_v9, 16 }
 0x1fa   :  { %v707_v41 = vsel %vm650_vm1, %v706_v59, %v5742_v45  ;;  %v1379_v40 = vsel %vm650_vm1, %v1378_v28, %v6330_v20  ;;  %8944 = vst [vmem:[#allocation59_spill] sm:$0xff] %v6930_v61  ;;  %v1081_v59 = vperm.slane %v1077_v31, %v5763_v60 }
 0x1fb   :  { %v982_v23 = vrot.slane %v977_v38, 4  ;;  %v985_v58 = vsel %vm650_vm1, 0, %v984_v35  ;;  %v1708_v53 = vpack.i.b16 %v977_v38, %v6877_v43  ;;  %v1711_v49 = vshrl.u32 %v977_v38, 16 }
 0x1fc   :  { %v1728_v63 = vpack.i.b16 %v1727_v39, %v1726_v30  ;;  %v1732_v34 = vpack.i.b16 %v985_v58, %v957_v13  ;;  %v1735_v29 = vshrl.u32 %v985_v58, 16  ;;  %v2338_v9 = vrot.slane %v1724_v12, 4 }
 0x1fd   :  { %v983_v56 = vsel %vm650_vm1, 0, %v982_v23  ;;  %v1712_v45 = vpack.i.b16 %v1711_v49, %v1710_v16  ;;  %v711_v33 = vperm.slane %v707_v41, %v5763_v60  ;;  %v8945_v43 = vrot.slane %v6845_v47, 4 }
 0x1fe   :  { %v1716_v20 = vpack.i.b16 %v983_v56, %v955_v46  ;;  %v1719_v62 = vshrl.u32 %v983_v56, 16  ;;  %v1736_v4 = vpack.i.b16 %v1735_v29, %v1734_v52  ;;  %v2339_v32 = vsel %vm650_vm1, %v2338_v9, %v1708_v53  ;;  %v580_v13 = vpop.permute.xlu1 %579 }
 0x1ff   :  { %v6939_v28 = vperm.slane %v2339_v32, %v5763_v60  ;;  %v2344_v38 = vrot.slane %v1732_v34, 4  ;;  %v2366_v39 = vrot.slane %v1728_v63, 4  ;;  %v719_v30 = vsel %vm650_vm1, %v8945_v43, %v711_v33  ;;  %v578_v46 = vpop.permute.xlu0 %577  ;;  %v592_v43 = vpop.permute.xlu2 %591 }
 0x200   :  { %v1720_v16 = vpack.i.b16 %v1719_v62, %v1718_v37  ;;  %v2372_v12 = vrot.slane %v1736_v4, 4  ;;  %v720_v41 = vrot.slane %v711_v33, 4  ;;  %v6945_v31 = vperm.slane %v719_v30, %v5783_v14 }
 0x201   :  { %v2345_v52 = vsel %vm650_vm1, %v2344_v38, %v1716_v20  ;;  %v2367_v35 = vsel %vm650_vm1, %v2366_v39, %v1712_v45  ;;  %v1082_v34 = vrot.slane %v1081_v59, 4  ;;  %v8946_v62 = vrot.slane %v6842_v51, 4 }
 0x202   :  { %v6951_v63 = vperm.slane %v2345_v52, %v5763_v60  ;;  %v6954_v23 = vperm.slane %v2367_v35, %v5763_v60  ;;  %v2373_v37 = vsel %vm650_vm1, %v2372_v12, %v1720_v16  ;;  %v721_v58 = vsel %vm650_vm1, %v6845_v47, %v720_v41 }
 0x203   :  { %v6960_v53 = vperm.slane %v2373_v37, %v5763_v60  ;;  %v6963_v49 = vperm.slane %v721_v58, %v5783_v14  ;;  %v730_v29 = vrot.slane %v6945_v31, 4  ;;  %v1083_v20 = vsel %vm650_vm1, %v1082_v34, %v6842_v51 }
 0x204   :  { %v2350_v45 = vrot.slane %v6951_v63, 4  ;;  %v1085_v47 = vsel %vm650_vm1, %v1081_v59, %v8946_v62  ;;  %v1089_v39 = vperm.slane %v1083_v20, %v5783_v14  ;;  %v6987_v59 = vperm.slane %v1379_v40, %v5763_v60 }
 0x205   :  { %v6976_v32 = vsel %vm650_vm1, 0, %v730_v29  ;;  %v1093_v51 = vperm.slane %v1085_v47, %v5783_v14  ;;  %v846_v35 = vrot.slane %v580_v13, 4  ;;  %v8947_v47 = vshrl.u32 %v6802_v8, 16 }
 0x206   :  { %v6982_v30 = vsel %vm650_vm1, %v2350_v45, %v6939_v28  ;;  %v1094_v12 = vrot.slane %v1089_v39, 4  ;;  %v1772_v41 = vpack.i.b16 %v1089_v39, %v6802_v8  ;;  %v1775_v52 = vshrl.u32 %v1089_v39, 16  ;;  %v626_v34 = vpop.permute.xlu1 %625 }
 0x207   :  { %v1096_v37 = vrot.slane %v1093_v51, 4  ;;  %v1788_v58 = vpack.i.b16 %v1093_v51, %v6819_v11  ;;  %v1791_v29 = vshrl.u32 %v1093_v51, 16  ;;  %v604_v20 = vpop.permute.xlu0 %603  ;;  %v847_v40 = vsel %vm650_vm1, %v846_v35, %v6379_v50 }
 0x208   :  { %v1095_v62 = vsel %vm650_vm1, 0, %v1094_v12  ;;  %v1776_v33 = vpack.i.b16 %v1775_v52, %v8947_v47  ;;  %v734_v4 = vrot.slane %v578_v46, 4  ;;  %v8948_v16 = vshrl.u32 %v6819_v11, 16 }
 0x209   :  { %v1097_v39 = vsel %vm650_vm1, 0, %v1096_v37  ;;  %v1780_v13 = vpack.i.b16 %v1095_v62, %v6829_v24  ;;  %v1783_v56 = vshrl.u32 %v1095_v62, 16  ;;  %v2450_v38 = vrot.slane %v1788_v58, 4 }
 0x20a   :  { %v1792_v51 = vpack.i.b16 %v1791_v29, %v8948_v16  ;;  %v1796_v45 = vpack.i.b16 %v1097_v39, %v6848_v42  ;;  %v1799_v9 = vshrl.u32 %v1097_v39, 16  ;;  %v851_v12 = vperm.slane %v847_v40, %v5763_v60 }
 0x20b   :  { %v8949_v8 = vshrl.u32 %v6829_v24, 16  ;;  %v735_v50 = vsel %vm650_vm1, %v734_v4, %v6546_v18  ;;  %v1518_v46 = vrot.slane %v592_v43, 4  ;;  %v8950_v35 = vshrl.u32 %v6848_v42, 16 }
 0x20c   :  { %v2478_v47 = vrot.slane %v1792_v51, 4  ;;  %v2451_v11 = vsel %vm650_vm1, %v2450_v38, %v1772_v41  ;;  %v2456_v16 = vrot.slane %v1796_v45, 4  ;;  %v860_v29 = vrot.slane %v851_v12, 4 }
 0x20d   :  { %v1784_v52 = vpack.i.b16 %v1783_v56, %v8949_v8  ;;  %v1800_v37 = vpack.i.b16 %v1799_v9, %v8950_v35  ;;  %v2455_v62 = vperm.slane %v2451_v11, %v5763_v60  ;;  %v739_v40 = vperm.slane %v735_v50, %v5763_v60  ;;  %v7020_v9 = vpop.permute.xlu2 %637 }
 0x20e   :  { %v2479_v58 = vsel %vm650_vm1, %v2478_v47, %v1776_v33  ;;  %v1519_v24 = vsel %vm650_vm1, %v1518_v46, %v6481_v22  ;;  %v2457_v56 = vsel %vm650_vm1, %v2456_v16, %v1780_v13  ;;  %v740_v33 = vrot.slane %v626_v34, 4  ;;  %v532_v45 = vpop.permute.xlu1 %531 }
 0x20f   :  { %v2483_v18 = vperm.slane %v2479_v58, %v5763_v60  ;;  %v2484_v4 = vrot.slane %v1800_v37, 4  ;;  %v7018_v42 = vperm.slane %v1519_v24, %v5763_v60  ;;  %v2461_v38 = vperm.slane %v2457_v56, %v5763_v60  ;;  %v530_v35 = vpop.permute.xlu0 %529 }
 0x210   :  { %v2464_v43 = vrot.slane %v2455_v62, 4  ;;  %v748_v41 = vrot.slane %v739_v40, 4  ;;  %v824_v13 = vrot.slane %v604_v20, 4  ;;  %v8952_v20 = vrot.slane %v6963_v49, 4 }
 0x211   :  { %v2485_v39 = vsel %vm650_vm1, %v2484_v4, %v1784_v52  ;;  %v2492_v51 = vrot.slane %v2483_v18, 4  ;;  %v2462_v8 = vrot.slane %v2461_v38, 4  ;;  %v8951_v52 = vrot.slane %v6863_v10, 4 }
 0x212   :  { %v2465_v47 = vsel %vm650_vm1, %v2461_v38, %v2464_v43  ;;  %v2489_v50 = vperm.slane %v2485_v39, %v5763_v60  ;;  %v825_v34 = vsel %vm650_vm1, %v824_v13, %v6692_v19  ;;  %v7039_v16 = vsel %vm650_vm1, 0, %v8952_v20 }
 0x213   :  { %v7029_v37 = vperm.slane %v2465_v47, %v5783_v14  ;;  %v853_v11 = vsel %vm650_vm1, %v8951_v52, %v532_v45  ;;  %v2463_v58 = vsel %vm650_vm1, %v2462_v8, %v2455_v62  ;;  %v829_v4 = vperm.slane %v825_v34, %v5763_v60 }
 0x214   :  { %v2490_v24 = vrot.slane %v2489_v50, 4  ;;  %v7043_v56 = vsel %vm650_vm1, %v2489_v50, %v2492_v51  ;;  %v7047_v38 = vperm.slane %v2463_v58, %v5783_v14  ;;  %v857_v19 = vperm.slane %v853_v11, %v5763_v60 }
 0x215   :  { %v741_v10 = vsel %vm650_vm1, %v740_v33, %v530_v35  ;;  %v830_v39 = vrot.slane %v829_v4, 4  ;;  %v8953_v62 = vrot.slane %v6785_v7, 4  ;;  %v7072_v22 = vpop.permute.xlu2 %519 }
 0x216   :  { %v7053_v45 = vsel %vm650_vm1, %v2490_v24, %v2483_v18  ;;  %v745_v13 = vperm.slane %v741_v10, %v5763_v60  ;;  %v858_v47 = vrot.slane %v857_v19, 4  ;;  %v861_v50 = vsel %vm650_vm1, %v857_v19, %v860_v29 }
 0x217   :  { %v833_v51 = vsel %vm650_vm1, %v829_v4, %v8953_v62  ;;  %v831_v33 = vsel %vm650_vm1, %v830_v39, %v6785_v7  ;;  %v869_v18 = vperm.slane %v861_v50, %v5783_v14 }
 0x218   :  { %v841_v8 = vperm.slane %v833_v51, %v5783_v14  ;;  %v746_v35 = vrot.slane %v745_v13, 4  ;;  %v749_v52 = vsel %vm650_vm1, %v745_v13, %v748_v41  ;;  %v837_v11 = vperm.slane %v831_v33, %v5783_v14 }
 0x219   :  { %v859_v24 = vsel %vm650_vm1, %v858_v47, %v851_v12  ;;  %v872_v10 = vrot.slane %v869_v18, 4  ;;  %v1663_v19 = vshrl.u32 %v869_v18, 16  ;;  %v757_v5 = vperm.slane %v749_v52, %v5783_v14  ;;  %v568_v52 = vpop.permute.xlu0 %567 }
 0x21a   :  { %v844_v20 = vrot.slane %v841_v8, 4  ;;  %v1662_v58 = vshrl.u32 %v841_v8, 16  ;;  %v865_v4 = vperm.slane %v859_v24, %v5783_v14  ;;  %v1660_v29 = vpack.i.b16 %v869_v18, %v841_v8 }
 0x21b   :  { %v842_v62 = vrot.slane %v837_v11, 4  ;;  %v1646_v51 = vshrl.u32 %v837_v11, 16  ;;  %v747_v39 = vsel %vm650_vm1, %v746_v35, %v739_v40  ;;  %v873_v41 = vsel %vm650_vm1, 0, %v872_v10 }
 0x21c   :  { %v845_v7 = vsel %vm650_vm1, 0, %v844_v20  ;;  %v870_v50 = vrot.slane %v865_v4, 4  ;;  %v1644_v13 = vpack.i.b16 %v865_v4, %v837_v11  ;;  %v1647_v33 = vshrl.u32 %v865_v4, 16  ;;  %v590_v20 = vpop.permute.xlu1 %589 }
 0x21d   :  { %v843_v12 = vsel %vm650_vm1, 0, %v842_v62  ;;  %v1664_v47 = vpack.i.b16 %v1663_v19, %v1662_v58  ;;  %v1668_v24 = vpack.i.b16 %v873_v41, %v845_v7  ;;  %v1670_v46 = vshrl.u32 %v845_v7, 16 }
 0x21e   :  { %v871_v8 = vsel %vm650_vm1, 0, %v870_v50  ;;  %v1648_v18 = vpack.i.b16 %v1647_v33, %v1646_v51  ;;  %v1654_v34 = vshrl.u32 %v843_v12, 16  ;;  %v1671_v43 = vshrl.u32 %v873_v41, 16 }
 0x21f   :  { %v1652_v61 = vpack.i.b16 %v871_v8, %v843_v12  ;;  %v1655_v40 = vshrl.u32 %v871_v8, 16  ;;  %v2226_v35 = vrot.slane %v1660_v29, 4  ;;  %v2232_v15 = vrot.slane %v1668_v24, 4 }
 0x220   :  { %v1672_v10 = vpack.i.b16 %v1671_v43, %v1670_v46  ;;  %v2254_v11 = vrot.slane %v1664_v47, 4  ;;  %v753_v4 = vperm.slane %v747_v39, %v5783_v14  ;;  %v1406_v7 = vrot.slane %v590_v20, 4 }
 0x221   :  { %v1656_v62 = vpack.i.b16 %v1655_v40, %v1654_v34  ;;  %v2227_v58 = vsel %vm650_vm1, %v2226_v35, %v1644_v13  ;;  %v2233_v19 = vsel %vm650_vm1, %v2232_v15, %v1652_v61  ;;  %v760_v33 = vrot.slane %v757_v5, 4 }
 0x222   :  { %v2231_v51 = vperm.slane %v2227_v58, %v5763_v60  ;;  %v2237_v50 = vperm.slane %v2233_v19, %v5763_v60  ;;  %v2255_v41 = vsel %vm650_vm1, %v2254_v11, %v1648_v18  ;;  %v2260_v29 = vrot.slane %v1672_v10, 4  ;;  %v562_v11 = vpop.permute.xlu2 %561 }
 0x223   :  { %v2259_v46 = vperm.slane %v2255_v41, %v5763_v60  ;;  %v758_v43 = vrot.slane %v753_v4, 4  ;;  %v1580_v39 = vpack.i.b16 %v753_v4, %v6945_v31  ;;  %v1583_v15 = vshrl.u32 %v753_v4, 16 }
 0x224   :  { %v2238_v34 = vrot.slane %v2237_v50, 4  ;;  %v2240_v12 = vrot.slane %v2231_v51, 4  ;;  %v2261_v13 = vsel %vm650_vm1, %v2260_v29, %v1656_v62  ;;  %v761_v8 = vsel %vm650_vm1, 0, %v760_v33 }
 0x225   :  { %v2265_v61 = vperm.slane %v2261_v13, %v5763_v60  ;;  %v2268_v47 = vrot.slane %v2259_v46, 4  ;;  %v759_v24 = vsel %vm650_vm1, 0, %v758_v43  ;;  %v8954_v40 = vshrl.u32 %v6945_v31, 16 }
 0x226   :  { %v2239_v18 = vsel %vm650_vm1, %v2238_v34, %v2231_v51  ;;  %v2241_v20 = vsel %vm650_vm1, %v2237_v50, %v2240_v12  ;;  %v1588_v10 = vpack.i.b16 %v759_v24, %v6976_v32  ;;  %v1591_v41 = vshrl.u32 %v759_v24, 16 }
 0x227   :  { %v1584_v35 = vpack.i.b16 %v1583_v15, %v8954_v40  ;;  %v7095_v62 = vperm.slane %v2239_v18, %v5783_v14  ;;  %v7098_v4 = vperm.slane %v2241_v20, %v5783_v14  ;;  %v2266_v58 = vrot.slane %v2265_v61, 4 }
 0x228   :  { %v7101_v19 = vsel %vm650_vm1, %v2265_v61, %v2268_v47  ;;  %v1596_v51 = vpack.i.b16 %v757_v5, %v6963_v49  ;;  %v1599_v50 = vshrl.u32 %v757_v5, 16  ;;  %v1604_v31 = vpack.i.b16 %v761_v8, %v7039_v16 }
 0x229   :  { %v7106_v29 = vsel %vm650_vm1, %v2266_v58, %v2259_v46  ;;  %v1607_v43 = vshrl.u32 %v761_v8, 16  ;;  %v1407_v33 = vsel %vm650_vm1, %v1406_v7, %v6641_v55  ;;  %v1490_v34 = vrot.slane %v568_v52, 4  ;;  %v616_v55 = vpop.permute.xlu1 %615 }
 0x22a   :  { %v8955_v12 = vshrl.u32 %v6976_v32, 16  ;;  %v8956_v15 = vshrl.u32 %v6963_v49, 16  ;;  %v2114_v47 = vrot.slane %v1596_v51, 4  ;;  %v2120_v24 = vrot.slane %v1604_v31, 4  ;;  %v7127_v51 = vpop.permute.xlu0 %613 }
 0x22b   :  { %v8957_v5 = vshrl.u32 %v7039_v16, 16  ;;  %v7117_v20 = vperm.slane %v1407_v33, %v5763_v60  ;;  %v1491_v46 = vsel %vm650_vm1, %v1490_v34, %v6556_v44  ;;  %v1154_v8 = vrot.slane %v562_v11, 4 }
 0x22c   :  { %v1592_v13 = vpack.i.b16 %v1591_v41, %v8955_v12  ;;  %v1600_v61 = vpack.i.b16 %v1599_v50, %v8956_v15  ;;  %v2115_v7 = vsel %vm650_vm1, %v2114_v47, %v1580_v39  ;;  %v2121_v32 = vsel %vm650_vm1, %v2120_v24, %v1588_v10 }
 0x22d   :  { %v1608_v18 = vpack.i.b16 %v1607_v43, %v8957_v5  ;;  %v1495_v49 = vperm.slane %v1491_v46, %v5763_v60  ;;  %v2119_v40 = vperm.slane %v2115_v7, %v5763_v60  ;;  %v2125_v16 = vperm.slane %v2121_v32, %v5763_v60 }
 0x22e   :  { %v2142_v52 = vrot.slane %v1600_v61, 4  ;;  %v1155_v39 = vsel %vm650_vm1, %v1154_v8, %v6250_v27  ;;  %v1496_v50 = vrot.slane %v616_v55, 4  ;;  %v588_v61 = vpop.permute.xlu2 %587 }
 0x22f   :  { %v2148_v58 = vrot.slane %v1608_v18, 4  ;;  %v1504_v11 = vrot.slane %v1495_v49, 4  ;;  %v2126_v10 = vrot.slane %v2125_v16, 4  ;;  %v2128_v31 = vrot.slane %v2119_v40, 4 }
 0x230   :  { %v2143_v44 = vsel %vm650_vm1, %v2142_v52, %v1584_v35  ;;  %v7136_v12 = vperm.slane %v1155_v39, %v5763_v60  ;;  %v1497_v15 = vsel %vm650_vm1, %v1496_v50, %v7072_v22  ;;  %v1384_v35 = vrot.slane %v7127_v51, 4 }
 0x231   :  { %v2147_v43 = vperm.slane %v2143_v44, %v5763_v60  ;;  %v2149_v33 = vsel %vm650_vm1, %v2148_v58, %v1592_v13  ;;  %v2127_v27 = vsel %vm650_vm1, %v2126_v10, %v2119_v40  ;;  %v2129_v47 = vsel %vm650_vm1, %v2125_v16, %v2128_v31 }
 0x232   :  { %v2153_v34 = vperm.slane %v2149_v33, %v5763_v60  ;;  %v1501_v5 = vperm.slane %v1497_v15, %v5763_v60  ;;  %v7145_v13 = vperm.slane %v2127_v27, %v5783_v14  ;;  %v7148_v18 = vperm.slane %v2129_v47, %v5783_v14 }
 0x233   :  { %v2156_v24 = vrot.slane %v2147_v43, 4  ;;  %v1294_v32 = vrot.slane %v588_v61, 4  ;;  %v8958_v16 = vrot.slane %v6939_v28, 4  ;;  %v2357_v44 = vperm.slane %v6982_v30, %v5783_v14 }
 0x234   :  { %v2154_v46 = vrot.slane %v2153_v34, 4  ;;  %v1502_v55 = vrot.slane %v1501_v5, 4  ;;  %v1505_v7 = vsel %vm650_vm1, %v1501_v5, %v1504_v11  ;;  %v8959_v10 = vrot.slane %v6960_v53, 4 }
 0x235   :  { %v7152_v22 = vsel %vm650_vm1, %v2153_v34, %v2156_v24  ;;  %v7159_v40 = vperm.slane %v1505_v7, %v5783_v14  ;;  %v2353_v58 = vsel %vm650_vm1, %v6951_v63, %v8958_v16  ;;  %v1295_v11 = vsel %vm650_vm1, %v1294_v32, %v6650_v1 }
 0x236   :  { %v7156_v52 = vsel %vm650_vm1, %v2154_v46, %v2147_v43  ;;  %v1503_v39 = vsel %vm650_vm1, %v1502_v55, %v1495_v49  ;;  %v2361_v50 = vperm.slane %v2353_v58, %v5783_v14  ;;  %v2379_v31 = vsel %vm650_vm1, %v8959_v10, %v6954_v23 }
 0x237   :  { %v7176_v28 = vperm.slane %v1503_v39, %v5783_v14  ;;  %v7181_v30 = vperm.slane %v1295_v11, %v5763_v60  ;;  %v2362_v49 = vrot.slane %v2357_v44, 4  ;;  %v8961_v1 = vrot.slane %v6954_v23, 4 }
 0x238   :  { %v2364_v33 = vrot.slane %v2361_v50, 4  ;;  %v2385_v15 = vperm.slane %v2379_v31, %v5783_v14  ;;  %v3118_v32 = vshrl.u32 %v2357_v44, 16  ;;  %v3134_v11 = vshrl.u32 %v2361_v50, 16 }
 0x239   :  { %8960 = vst [vmem:[#allocation60_spill] sm:$0xff] %v7181_v30  ;;  %v2381_v34 = vsel %vm650_vm1, %v6960_v53, %v8961_v1  ;;  %v2363_v5 = vsel %vm650_vm1, 0, %v2362_v49 }
 0x23a   :  { %v2389_v24 = vperm.slane %v2381_v34, %v5783_v14  ;;  %v2365_v46 = vsel %vm650_vm1, 0, %v2364_v33  ;;  %v2390_v55 = vrot.slane %v2385_v15, 4  ;;  %v3116_v7 = vpack.i.b16 %v2385_v15, %v2357_v44 }
 0x23b   :  { %v3119_v16 = vshrl.u32 %v2385_v15, 16  ;;  %v3126_v53 = vshrl.u32 %v2363_v5, 16  ;;  %v3142_v27 = vshrl.u32 %v2365_v46, 16  ;;  %v2474_v44 = vrot.slane %v7047_v38, 4 }
 0x23c   :  { %v2392_v23 = vrot.slane %v2389_v24, 4  ;;  %v2391_v58 = vsel %vm650_vm1, 0, %v2390_v55  ;;  %v3132_v39 = vpack.i.b16 %v2389_v24, %v2361_v50  ;;  %v3135_v10 = vshrl.u32 %v2389_v24, 16 }
 0x23d   :  { %v3120_v1 = vpack.i.b16 %v3119_v16, %v3118_v32  ;;  %v3124_v47 = vpack.i.b16 %v2391_v58, %v2363_v5  ;;  %v3127_v34 = vshrl.u32 %v2391_v58, 16  ;;  %v2476_v15 = vrot.slane %v7029_v37, 4 }
 0x23e   :  { %v2393_v31 = vsel %vm650_vm1, 0, %v2392_v23  ;;  %v3136_v8 = vpack.i.b16 %v3135_v10, %v3134_v11  ;;  %v3746_v41 = vrot.slane %v3132_v39, 4  ;;  %v2497_v50 = vperm.slane %v7053_v45, %v5783_v14 }
 0x23f   :  { %v3140_v49 = vpack.i.b16 %v2393_v31, %v2365_v46  ;;  %v3143_v33 = vshrl.u32 %v2393_v31, 16  ;;  %v3128_v43 = vpack.i.b16 %v3127_v34, %v3126_v53  ;;  %v2475_v5 = vsel %vm650_vm1, 0, %v2474_v44 }
 0x240   :  { %v3774_v61 = vrot.slane %v3136_v8, 4  ;;  %v3747_v24 = vsel %vm650_vm1, %v3746_v41, %v3116_v7  ;;  %v2477_v23 = vsel %vm650_vm1, 0, %v2476_v15  ;;  %v2501_v46 = vperm.slane %v7043_v56, %v5783_v14 }
 0x241   :  { %v3144_v63 = vpack.i.b16 %v3143_v33, %v3142_v27  ;;  %v3752_v55 = vrot.slane %v3140_v49, 4  ;;  %v7206_v32 = vperm.slane %v3747_v24, %v5763_v60  ;;  %v2502_v41 = vrot.slane %v2497_v50, 4 }
 0x242   :  { %v3775_v27 = vsel %vm650_vm1, %v3774_v61, %v3120_v1  ;;  %v2504_v7 = vrot.slane %v2501_v46, 4  ;;  %v3180_v56 = vpack.i.b16 %v2497_v50, %v7047_v38  ;;  %v3182_v39 = vshrl.u32 %v7047_v38, 16 }
 0x243   :  { %v3753_v16 = vsel %vm650_vm1, %v3752_v55, %v3124_v47  ;;  %v3780_v8 = vrot.slane %v3144_v63, 4  ;;  %v7214_v45 = vperm.slane %v3775_v27, %v5763_v60  ;;  %v3183_v11 = vshrl.u32 %v2497_v50, 16 }
 0x244   :  { %v7211_v53 = vperm.slane %v3753_v16, %v5763_v60  ;;  %v2503_v63 = vsel %vm650_vm1, 0, %v2502_v41  ;;  %v2505_v10 = vsel %vm650_vm1, 0, %v2504_v7  ;;  %v3190_v34 = vshrl.u32 %v2475_v5, 16  ;;  %v518_v16 = vpop.permute.xlu1 %517 }
 0x245   :  { %v3781_v58 = vsel %vm650_vm1, %v3780_v8, %v3128_v43  ;;  %v3184_v31 = vpack.i.b16 %v3183_v11, %v3182_v39  ;;  %v3188_v1 = vpack.i.b16 %v2503_v63, %v2475_v5  ;;  %v3191_v49 = vshrl.u32 %v2503_v63, 16 }
 0x246   :  { %v3758_v47 = vrot.slane %v7211_v53, 4  ;;  %v7221_v61 = vperm.slane %v3781_v58, %v5763_v60  ;;  %v3196_v38 = vpack.i.b16 %v2501_v46, %v7029_v37  ;;  %v3198_v44 = vshrl.u32 %v7029_v37, 16 }
 0x247   :  { %v3192_v55 = vpack.i.b16 %v3191_v49, %v3190_v34  ;;  %v3199_v50 = vshrl.u32 %v2501_v46, 16  ;;  %v3204_v24 = vpack.i.b16 %v2505_v10, %v2477_v23  ;;  %v3206_v27 = vshrl.u32 %v2477_v23, 16  ;;  %v7244_v34 = vpop.permute.xlu0 %639 }
 0x248   :  { %v3759_v43 = vsel %vm650_vm1, %v3758_v47, %v7206_v32  ;;  %v3786_v33 = vrot.slane %v7221_v61, 4  ;;  %v3207_v8 = vshrl.u32 %v2505_v10, 16  ;;  %v3858_v41 = vrot.slane %v3196_v38, 4 }
 0x249   :  { %v7231_v15 = vperm.slane %v3759_v43, %v5783_v14  ;;  %v3200_v39 = vpack.i.b16 %v3199_v50, %v3198_v44  ;;  %v3864_v46 = vrot.slane %v3204_v24, 4  ;;  %v1385_v63 = vsel %vm650_vm1, %v1384_v35, %v518_v16  ;;  %v7259_v16 = vpop.permute.xlu2 %633 }
 0x24a   :  { %v3787_v5 = vsel %vm650_vm1, %v3786_v33, %v7214_v45  ;;  %v3208_v11 = vpack.i.b16 %v3207_v8, %v3206_v27  ;;  %v3859_v47 = vsel %vm650_vm1, %v3858_v41, %v3180_v56  ;;  %v1389_v44 = vperm.slane %v1385_v63, %v5763_v60  ;;  %v8965_v63 = vld [vmem:[#allocation32_spill] sm:$0xff] }
 0x24b   :  { %8962 = vst [vmem:[#allocation61_spill] sm:$0xff] %v7231_v15  ;;  %v7236_v7 = vperm.slane %v3787_v5, %v5783_v14  ;;  %v4485_v58 = vshrl.u32 %v7231_v15, 16  ;;  %v3770_v37 = vrot.slane %v7231_v15, 4  ;;  %v7250_v43 = vperm.slane %v3859_v47, %v5763_v60 }
 0x24c   :  { %v3865_v33 = vsel %vm650_vm1, %v3864_v46, %v3188_v1  ;;  %v3886_v38 = vrot.slane %v3200_v39, 4  ;;  %v3892_v56 = vrot.slane %v3208_v11, 4  ;;  %v1524_v24 = vrot.slane %v7244_v34, 4 }
 0x24d   :  { %8963 = vst [vmem:[#allocation62_spill] sm:$0xff] %v7236_v7  ;;  %v4486_v23 = vshrl.u32 %v7236_v7, 16  ;;  %v3771_v10 = vsel %vm650_vm1, 0, %v3770_v37  ;;  %v3798_v49 = vrot.slane %v7236_v7, 4  ;;  %v7256_v50 = vperm.slane %v3865_v33, %v5763_v60 }
 0x24e   :  { %v3887_v27 = vsel %vm650_vm1, %v3886_v38, %v3184_v31  ;;  %v3893_v8 = vsel %vm650_vm1, %v3892_v56, %v3192_v55  ;;  %v1390_v1 = vrot.slane %v1389_v44, 4  ;;  %v8964_v46 = vrot.slane %v6987_v59, 4 }
 0x24f   :  { %v4487_v51 = vpack.i.b16 %v4486_v23, %v4485_v58  ;;  %v3799_v35 = vsel %vm650_vm1, 0, %v3798_v49  ;;  %v3870_v37 = vrot.slane %v7256_v50, 4  ;;  %v7265_v58 = vperm.slane %v3887_v27, %v5763_v60 }
 0x250   :  { %v4490_v5 = vpack.i.b16 %v3799_v35, %v3771_v10  ;;  %v7268_v39 = vperm.slane %v3893_v8, %v5763_v60  ;;  %v1391_v47 = vsel %vm650_vm1, %v1390_v1, %v6987_v59  ;;  %v1393_v31 = vsel %vm650_vm1, %v1389_v44, %v8964_v46 }
 0x251   :  { %v4775_v41 = vunpack.c.l.b16 %v4487_v51  ;;  %v8966_v34 = vunpack.c.l.b16 %v8965_v63  ;;  %v3871_v49 = vsel %vm650_vm1, %v3870_v37, %v7250_v43  ;;  %v7282_v38 = vperm.slane %v1391_v47, %v5783_v14 }
 0x252   :  { %v4815_v11 = vunpack.c.l.b16 %v4490_v5  ;;  %v3898_v33 = vrot.slane %v7268_v39, 4  ;;  %v7286_v51 = vperm.slane %v3871_v49, %v5783_v14  ;;  %v7289_v59 = vperm.slane %v1393_v31, %v5783_v14  ;;  %v544_v31 = vpop.permute.xlu1 %543 }
 0x253   :  { %v4788_v23 = vpack.c.b16 %v4775_v41, %v8966_v34  ;;  %v4491_v44 = vshrl.u32 %v3771_v10, 16  ;;  %v1402_v27 = vrot.slane %v7282_v38, 4  ;;  %v4492_v1 = vshrl.u32 %v3799_v35, 16 }
 0x254   :  { %v4828_v56 = vpack.c.b16 %v4815_v11, %v6624_v2  ;;  %8967 = vst [vmem:[#allocation32_spill] sm:$0xff] %v7286_v51  ;;  %v3899_v5 = vsel %vm650_vm1, %v3898_v33, %v7265_v58  ;;  %v4533_v41 = vshrl.u32 %v7286_v51, 16  ;;  %v1404_v10 = vrot.slane %v7289_v59, 4 }
 0x255   :  { %4798 = vrot.lane.b32.xlu0 %v4788_v23, %s5546_s24  ;;  %v7298_v2 = vperm.slane %v3899_v5, %v5783_v14  ;;  %v7304_v11 = vsel %vm650_vm1, 0, %v1402_v27  ;;  %v3882_v47 = vrot.slane %v7286_v51, 4  ;;  %v4493_v46 = vpack.i.b16 %v4492_v1, %v4491_v44 }
 0x256   :  { %4838 = vrot.lane.b32.xlu2 %v4828_v56, %s5566_s29  ;;  %v8969_v35 = vrot.slane %v7176_v28, 4  ;;  %v7314_v23 = vsel %vm650_vm1, 0, %v1404_v10  ;;  %v8970_v27 = vrot.slane %v7159_v40, 4  ;;  %v1525_v10 = vsel %vm650_vm1, %v1524_v24, %v544_v31 }
 0x257   :  { %8968 = vst [vmem:[#allocation63_spill] sm:$0xff] %v7298_v2  ;;  %v4534_v34 = vshrl.u32 %v7298_v2, 16  ;;  %v3910_v33 = vrot.slane %v7298_v2, 4  ;;  %v3883_v5 = vsel %vm650_vm1, 0, %v3882_v47  ;;  %v4855_v44 = vunpack.c.l.b16 %v4493_v46 }
 0x258   :  { %v7310_v63 = vsel %vm650_vm1, 0, %v8969_v35  ;;  %v1517_v1 = vsel %vm650_vm1, 0, %v8970_v27  ;;  %v542_v35 = vpop.permute.xlu0 %541  ;;  %v4539_v8 = vshrl.u32 %v3883_v5, 16  ;;  %v8971_v2 = vunpack.c.l.b16 %v6705_v36 }
 0x259   :  { %v4535_v55 = vpack.i.b16 %v4534_v34, %v4533_v41  ;;  %v3911_v37 = vsel %vm650_vm1, 0, %v3910_v33  ;;  %v1529_v56 = vperm.slane %v1525_v10, %v5763_v60  ;;  %v2038_v46 = vshrl.u32 %v7310_v63, 16 }
 0x25a   :  { %v4538_v51 = vpack.i.b16 %v3911_v37, %v3883_v5  ;;  %v4540_v49 = vshrl.u32 %v3911_v37, 16  ;;  %v4868_v7 = vpack.c.b16 %v4855_v44, %v8971_v2  ;;  %v2054_v15 = vshrl.u32 %v1517_v1, 16 }
 0x25b   :  { %v4777_v47 = vunpack.c.l.b16 %v4535_v55  ;;  %v8972_v27 = vrot.slane %v7020_v9, 4  ;;  %v1530_v30 = vrot.slane %v1529_v56, 4  ;;  %v8973_v24 = vrot.slane %v7018_v42, 4 }
 0x25c   :  { %v4817_v34 = vunpack.c.l.b16 %v4538_v51  ;;  %v4541_v33 = vpack.i.b16 %v4540_v49, %v4539_v8  ;;  %v8974_v36 = vunpack.c.l.b16 %v6770_v57  ;;  %v3760_v5 = vrot.slane %v7206_v32, 4 }
 0x25d   :  { %v1413_v41 = vsel %vm650_vm1, %v8972_v27, %v542_v35  ;;  %v1533_v37 = vsel %vm650_vm1, %v1529_v56, %v8973_v24  ;;  %v1531_v51 = vsel %vm650_vm1, %v1530_v30, %v7018_v42  ;;  %v3788_v8 = vrot.slane %v7214_v45, 4 }
 0x25e   :  { %v4789_v2 = vpack.c.b16 %v4777_v47, %v8974_v36  ;;  %v1541_v31 = vperm.slane %v1533_v37, %v5783_v14  ;;  %v1417_v55 = vperm.slane %v1413_v41, %v5763_v60  ;;  %v4829_v9 = vpack.c.b16 %v4817_v34, %v6787_v6 }
 0x25f   :  { %v4857_v44 = vunpack.c.l.b16 %v4541_v33  ;;  %v1537_v49 = vperm.slane %v1531_v51, %v5783_v14  ;;  %v8975_v32 = vunpack.c.l.b16 %v6790_v17  ;;  %v8976_v47 = vrot.slane %v7117_v20, 4 }
 0x260   :  { %4800 = vrot.lane.b32.xlu1 %v4789_v2, %s5546_s24  ;;  %v1544_v57 = vrot.slane %v1541_v31, 4  ;;  %v2044_v56 = vpack.i.b16 %v1541_v31, %v7159_v40  ;;  %v2047_v35 = vshrl.u32 %v1541_v31, 16  ;;  %4840 = vrot.lane.b32.xlu0 %v4829_v9, %s5566_s29  ;;  %v1418_v6 = vrot.slane %v1417_v55, 4 }
 0x261   :  { %v4869_v10 = vpack.c.b16 %v4857_v44, %v8975_v32  ;;  %v1421_v42 = vsel %vm650_vm1, %v1417_v55, %v8976_v47  ;;  %v3761_v30 = vsel %vm650_vm1, %v7211_v53, %v3760_v5  ;;  %v1542_v27 = vrot.slane %v1537_v49, 4 }
 0x262   :  { %v1545_v41 = vsel %vm650_vm1, 0, %v1544_v57  ;;  %v2028_v34 = vpack.i.b16 %v1537_v49, %v7176_v28  ;;  %v2031_v33 = vshrl.u32 %v1537_v49, 16  ;;  %v8977_v17 = vshrl.u32 %v7159_v40, 16 }
 0x263   :  { %4880 = vrot.lane.b32.xlu2 %v4869_v10, %s5567_s30  ;;  %v2052_v37 = vpack.i.b16 %v1545_v41, %v1517_v1  ;;  %v2055_v36 = vshrl.u32 %v1545_v41, 16  ;;  %v2898_v2 = vrot.slane %v2044_v56, 4  ;;  %v1543_v31 = vsel %vm650_vm1, 0, %v1542_v27 }
 0x264   :  { %v2048_v24 = vpack.i.b16 %v2047_v35, %v8977_v17  ;;  %v8978_v55 = vshrl.u32 %v7176_v28, 16  ;;  %v1419_v5 = vsel %vm650_vm1, %v1418_v6, %v7117_v20  ;;  %v1429_v9 = vperm.slane %v1421_v42, %v5783_v14 }
 0x265   :  { %v2036_v44 = vpack.i.b16 %v1543_v31, %v7310_v63  ;;  %v2039_v51 = vshrl.u32 %v1543_v31, 16  ;;  %v2056_v49 = vpack.i.b16 %v2055_v36, %v2054_v15  ;;  %v2899_v40 = vsel %vm650_vm1, %v2898_v2, %v2028_v34 }
 0x266   :  { %v2032_v53 = vpack.i.b16 %v2031_v33, %v8978_v55  ;;  %v2903_v1 = vperm.slane %v2899_v40, %v5763_v60  ;;  %v2904_v57 = vrot.slane %v2052_v37, 4  ;;  %v2926_v56 = vrot.slane %v2048_v24, 4 }
 0x267   :  { %v1425_v35 = vperm.slane %v1419_v5, %v5783_v14  ;;  %v2040_v32 = vpack.i.b16 %v2039_v51, %v2038_v46  ;;  %v2932_v28 = vrot.slane %v2056_v49, 4  ;;  %v1432_v10 = vrot.slane %v1429_v9, 4 }
 0x268   :  { %v1980_v47 = vpack.i.b16 %v1429_v9, %v7289_v59  ;;  %4878 = vrot.lane.b32.xlu1 %v4868_v7, %s5567_s30  ;;  %v2905_v20 = vsel %vm650_vm1, %v2904_v57, %v2036_v44  ;;  %v2912_v63 = vrot.slane %v2903_v1, 4  ;;  %v2927_v15 = vsel %vm650_vm1, %v2926_v56, %v2032_v53 }
 0x269   :  { %v1430_v6 = vrot.slane %v1425_v35, 4  ;;  %v2909_v42 = vperm.slane %v2905_v20, %v5763_v60  ;;  %v2931_v27 = vperm.slane %v2927_v15, %v5763_v60  ;;  %v2933_v41 = vsel %vm650_vm1, %v2932_v28, %v2040_v32 }
 0x26a   :  { %v1433_v46 = vsel %vm650_vm1, 0, %v1432_v10  ;;  %v2937_v34 = vperm.slane %v2933_v41, %v5763_v60  ;;  %v1964_v7 = vpack.i.b16 %v1425_v35, %v7282_v38  ;;  %v1967_v17 = vshrl.u32 %v1425_v35, 16 }
 0x26b   :  { %v1431_v33 = vsel %vm650_vm1, 0, %v1430_v6  ;;  %v2910_v24 = vrot.slane %v2909_v42, 4  ;;  %v2913_v37 = vsel %vm650_vm1, %v2909_v42, %v2912_v63  ;;  %v2940_v36 = vrot.slane %v2931_v27, 4 }
 0x26c   :  { %v1972_v2 = vpack.i.b16 %v1431_v33, %v7304_v11  ;;  %v7384_v31 = vperm.slane %v2913_v37, %v5783_v14  ;;  %v2938_v55 = vrot.slane %v2937_v34, 4  ;;  %v8980_v53 = vshrl.u32 %v7282_v38, 16 }
 0x26d   :  { %v1975_v44 = vshrl.u32 %v1431_v33, 16  ;;  %v2911_v51 = vsel %vm650_vm1, %v2910_v24, %v2903_v1  ;;  %v2941_v49 = vsel %vm650_vm1, %v2937_v34, %v2940_v36  ;;  %v1983_v40 = vshrl.u32 %v1429_v9, 16 }
 0x26e   :  { %8979 = vst [vmem:[#allocation64_spill] sm:$0xff] %v7384_v31  ;;  %v1968_v5 = vpack.i.b16 %v1967_v17, %v8980_v53  ;;  %v1988_v57 = vpack.i.b16 %v1433_v46, %v7314_v23  ;;  %v7392_v56 = vperm.slane %v2911_v51, %v5783_v14  ;;  %v2939_v35 = vsel %vm650_vm1, %v2938_v55, %v2931_v27  ;;  %v564_v55 = vpop.permute.xlu0 %563 }
 0x26f   :  { %v7396_v32 = vperm.slane %v2941_v49, %v5783_v14  ;;  %v8983_v28 = vshrl.u32 %v7304_v11, 16  ;;  %v7401_v10 = vperm.slane %v2939_v35, %v5783_v14  ;;  %v8985_v1 = vshrl.u32 %v7289_v59, 16 }
 0x270   :  { %8981 = vst [vmem:[#allocation65_spill] sm:$0xff] %v7392_v56  ;;  %v1991_v9 = vshrl.u32 %v1433_v46, 16  ;;  %v2786_v63 = vrot.slane %v1980_v47, 4  ;;  %v2792_v6 = vrot.slane %v1988_v57, 4  ;;  %v7407_v42 = vperm.slane %v3761_v30, %v5783_v14 }
 0x271   :  { %8982 = vst [vmem:[#allocation66_spill] sm:$0xff] %v7396_v32  ;;  %v1976_v38 = vpack.i.b16 %v1975_v44, %v8983_v28  ;;  %v1984_v20 = vpack.i.b16 %v1983_v40, %v8985_v1  ;;  %v3789_v11 = vsel %vm650_vm1, %v7221_v61, %v3788_v8  ;;  %v8986_v27 = vshrl.u32 %v7314_v23, 16 }
 0x272   :  { %8984 = vst [vmem:[#allocation67_spill] sm:$0xff] %v7401_v10  ;;  %v2787_v34 = vsel %vm650_vm1, %v2786_v63, %v1964_v7  ;;  %v7417_v46 = vperm.slane %v3789_v11, %v5783_v14  ;;  %v2793_v33 = vsel %vm650_vm1, %v2792_v6, %v1972_v2  ;;  %v4497_v30 = vshrl.u32 %v7407_v42, 16  ;;  %v586_v2 = vpop.permute.xlu1 %585 }
 0x273   :  { %v1992_v41 = vpack.i.b16 %v1991_v9, %v8986_v27  ;;  %v2814_v59 = vrot.slane %v1984_v20, 4  ;;  %v2791_v47 = vperm.slane %v2787_v34, %v5763_v60  ;;  %v3872_v45 = vrot.slane %v7250_v43, 4 }
 0x274   :  { %v2797_v17 = vperm.slane %v2793_v33, %v5763_v60  ;;  %v4496_v8 = vpack.i.b16 %v7417_v46, %v7407_v42  ;;  %v4498_v37 = vshrl.u32 %v7417_v46, 16  ;;  %v3900_v1 = vrot.slane %v7265_v58, 4 }
 0x275   :  { %v2815_v61 = vsel %vm650_vm1, %v2814_v59, %v1968_v5  ;;  %v2820_v23 = vrot.slane %v1992_v41, 4  ;;  %v2800_v7 = vrot.slane %v2791_v47, 4  ;;  %v3873_v36 = vsel %vm650_vm1, %v7256_v50, %v3872_v45 }
 0x276   :  { %v2819_v24 = vperm.slane %v2815_v61, %v5763_v60  ;;  %v2798_v53 = vrot.slane %v2797_v17, 4  ;;  %v4895_v44 = vunpack.c.l.b16 %v4496_v8  ;;  %v3881_v5 = vperm.slane %v3873_v36, %v5783_v14 }
 0x277   :  { %v2821_v43 = vsel %vm650_vm1, %v2820_v23, %v1976_v38  ;;  %v2801_v51 = vsel %vm650_vm1, %v2797_v17, %v2800_v7  ;;  %v4499_v57 = vpack.i.b16 %v4498_v37, %v4497_v30  ;;  %v3901_v11 = vsel %vm650_vm1, %v7268_v39, %v3900_v1  ;;  %v8992_v30 = vld [vmem:[#allocation29_spill] sm:$0xff]  ;;  %v8993_v17 = vld [vmem:[#allocation18_spill] sm:$0xff] }
 0x278   :  { %v2825_v49 = vperm.slane %v2821_v43, %v5763_v60  ;;  %v2828_v40 = vrot.slane %v2819_v24, 4  ;;  %v2799_v35 = vsel %vm650_vm1, %v2798_v53, %v2791_v47  ;;  %v7437_v28 = vperm.slane %v2801_v51, %v5783_v14 }
 0x279   :  { %v4908_v50 = vpack.c.b16 %v4895_v44, %v6742_v54  ;;  %v7442_v38 = vperm.slane %v2799_v35, %v5783_v14  ;;  %v4935_v63 = vunpack.c.l.b16 %v4499_v57  ;;  %v1182_v27 = vrot.slane %v586_v2, 4 }
 0x27a   :  { %8987 = vst [vmem:[#allocation68_spill] sm:$0xff] %v7437_v28  ;;  %v2826_v20 = vrot.slane %v2825_v49, 4  ;;  %v2829_v9 = vsel %vm650_vm1, %v2825_v49, %v2828_v40  ;;  %v1266_v54 = vrot.slane %v564_v55, 4  ;;  %v8990_v34 = vunpack.c.l.b16 %v6744_v0  ;;  %v612_v51 = vpop.permute.xlu1 %611  ;;  %v610_v49 = vpop.permute.xlu0 %609 }
 0x27b   :  { %8988 = vst [vmem:[#allocation69_spill] sm:$0xff] %v7442_v38  ;;  %v7446_v6 = vperm.slane %v2829_v9, %v5783_v14  ;;  %4918 = vrot.lane.b32.xlu0 %v4908_v50, %s5568_s2  ;;  %v3909_v47 = vperm.slane %v3901_v11, %v5783_v14  ;;  %v1183_v45 = vsel %vm650_vm1, %v1182_v27, %v8992_v30  ;;  %v4545_v61 = vshrl.u32 %v3881_v5, 16 }
 0x27c   :  { %v2827_v41 = vsel %vm650_vm1, %v2826_v20, %v2819_v24  ;;  %v4948_v59 = vpack.c.b16 %v4935_v63, %v8990_v34  ;;  %v1267_v39 = vsel %vm650_vm1, %v1266_v54, %v8993_v17  ;;  %v7465_v8 = vperm.slane %v1183_v45, %v5763_v60  ;;  %v8995_v17 = vld [vmem:[#allocation50_spill] sm:$0xff] }
 0x27d   :  { %8989 = vst [vmem:[#allocation70_spill] sm:$0xff] %v7446_v6  ;;  %v7457_v33 = vperm.slane %v2827_v41, %v5783_v14  ;;  %v4544_v23 = vpack.i.b16 %v3909_v47, %v3881_v5  ;;  %v1271_v0 = vperm.slane %v1267_v39, %v5763_v60  ;;  %v4546_v7 = vshrl.u32 %v3909_v47, 16 }
 0x27e   :  { %4958 = vrot.lane.b32.xlu2 %v4948_v59, %s5569_s5  ;;  %v3884_v24 = vrot.slane %v3881_v5, 4  ;;  %v3912_v37 = vrot.slane %v3909_v47, 4  ;;  %v3772_v36 = vrot.slane %v7407_v42, 4  ;;  %v3800_v2 = vrot.slane %v7417_v46, 4 }
 0x27f   :  { %8991 = vst [vmem:[#allocation71_spill] sm:$0xff] %v7457_v33  ;;  %v4897_v55 = vunpack.c.l.b16 %v4544_v23  ;;  %v1280_v43 = vrot.slane %v1271_v0, 4  ;;  %v4547_v44 = vpack.i.b16 %v4546_v7, %v4545_v61  ;;  %v1272_v20 = vrot.slane %v612_v51, 4  ;;  %v8996_v23 = vld [vmem:[#allocation51_spill] sm:$0xff] }
 0x280   :  { %v7472_v40 = vsel %vm650_vm1, 0, %v3884_v24  ;;  %v7475_v57 = vsel %vm650_vm1, 0, %v3912_v37  ;;  %v7478_v5 = vsel %vm650_vm1, 0, %v3772_v36  ;;  %v7481_v42 = vsel %vm650_vm1, 0, %v3800_v2  ;;  %v8998_v24 = vld [vmem:[#allocation55_spill] sm:$0xff]  ;;  %v9000_v2 = vld [vmem:[#allocation53_spill] sm:$0xff] }
 0x281   :  { %v4909_v46 = vpack.c.b16 %v4897_v55, %v6757_v26  ;;  %v4937_v35 = vunpack.c.l.b16 %v4547_v44  ;;  %v4550_v50 = vpack.i.b16 %v7475_v57, %v7472_v40  ;;  %v4502_v1 = vpack.i.b16 %v7481_v42, %v7478_v5  ;;  %v9001_v55 = vld [vmem:[#allocation57_spill] sm:$0xff] }
 0x282   :  { %v1160_v9 = vrot.slane %v610_v49, 4  ;;  %v2138_v63 = vrot.slane %v7145_v13, 4  ;;  %v2140_v11 = vrot.slane %v7148_v18, 4  ;;  %v8994_v27 = vunpack.c.l.b16 %v6759_v25 }
 0x283   :  { %4920 = vrot.lane.b32.xlu1 %v4909_v46, %s5568_s2  ;;  %v4977_v41 = vunpack.c.l.b16 %v4550_v50  ;;  %v4975_v26 = vunpack.c.l.b16 %v4502_v1  ;;  %v7495_v34 = vperm.slane %v7156_v52, %v5783_v14  ;;  %v1273_v59 = vsel %vm650_vm1, %v1272_v20, %v6590_v48 }
 0x284   :  { %v4949_v54 = vpack.c.b16 %v4937_v35, %v8994_v27  ;;  %v1161_v47 = vsel %vm650_vm1, %v1160_v9, %v6726_v21  ;;  %v7502_v30 = vsel %vm650_vm1, 0, %v2138_v63  ;;  %v7505_v45 = vsel %vm650_vm1, 0, %v2140_v11 }
 0x285   :  { %v4989_v25 = vpack.c.b16 %v4977_v41, %v6792_v3  ;;  %v4988_v39 = vpack.c.b16 %v4975_v26, %v8995_v17  ;;  %v1277_v52 = vperm.slane %v1273_v59, %v5763_v60  ;;  %v1165_v61 = vperm.slane %v1161_v47, %v5763_v60  ;;  %v9004_v41 = vld [vmem:[#allocation54_spill] sm:$0xff] }
 0x286   :  { %4960 = vrot.lane.b32.xlu0 %v4949_v54, %s5569_s5  ;;  %v2165_v48 = vperm.slane %v7152_v22, %v5783_v14  ;;  %v2166_v21 = vrot.slane %v7495_v34, 4  ;;  %v8997_v7 = vshrl.u32 %v8996_v23, 16  ;;  %v8999_v37 = vshrl.u32 %v8998_v24, 16 }
 0x287   :  { %v2980_v44 = vpack.i.b16 %v9001_v55, %v9000_v2  ;;  %5000 = vrot.lane.b32.xlu2 %v4989_v25, %s5570_s6  ;;  %v1278_v3 = vrot.slane %v1277_v52, 4  ;;  %v1281_v51 = vsel %vm650_vm1, %v1277_v52, %v1280_v43  ;;  %v1166_v49 = vrot.slane %v1165_v61, 4  ;;  %v9008_v52 = vld [vmem:[#allocation52_spill] sm:$0xff] }
 0x288   :  { %v2976_v36 = vpack.i.b16 %v8999_v37, %v8997_v7  ;;  %v9002_v46 = vrot.slane %v7136_v12, 4  ;;  %v7527_v35 = vperm.slane %v1281_v51, %v5783_v14  ;;  %v2167_v1 = vsel %vm650_vm1, 0, %v2166_v21 }
 0x289   :  { %v2168_v20 = vrot.slane %v2165_v48, 4  ;;  %v1279_v9 = vsel %vm650_vm1, %v1278_v3, %v1271_v0  ;;  %v1167_v63 = vsel %vm650_vm1, %v1166_v49, %v7136_v12  ;;  %v2982_v43 = vshrl.u32 %v9000_v2, 16 }
 0x28a   :  { %v1169_v22 = vsel %vm650_vm1, %v1165_v61, %v9002_v46  ;;  %v2983_v11 = vshrl.u32 %v9001_v55, 16  ;;  %v7539_v27 = vperm.slane %v1279_v9, %v5783_v14  ;;  %v1292_v54 = vrot.slane %v7527_v35, 4 }
 0x28b   :  { %v7530_v50 = vperm.slane %v1169_v22, %v5783_v14  ;;  %v7544_v26 = vperm.slane %v1167_v63, %v5783_v14  ;;  %4998 = vrot.lane.b32.xlu1 %v4988_v39, %s5570_s6  ;;  %v2169_v59 = vsel %vm650_vm1, 0, %v2168_v20  ;;  %v2988_v7 = vpack.i.b16 %v7495_v34, %v7145_v13 }
 0x28c   :  { %v2984_v47 = vpack.i.b16 %v2983_v11, %v2982_v43  ;;  %v1290_v25 = vrot.slane %v7539_v27, 4  ;;  %v7552_v17 = vsel %vm650_vm1, 0, %v1292_v54  ;;  %v2990_v37 = vshrl.u32 %v7145_v13, 16 }
 0x28d   :  { %v2991_v55 = vshrl.u32 %v7495_v34, 16  ;;  %v2996_v3 = vpack.i.b16 %v2167_v1, %v7502_v30  ;;  %v2998_v51 = vshrl.u32 %v7502_v30, 16  ;;  %v2999_v46 = vshrl.u32 %v2167_v1, 16 }
 0x28e   :  { %v7562_v2 = vsel %vm650_vm1, 0, %v1290_v25  ;;  %v3004_v22 = vpack.i.b16 %v2165_v48, %v7148_v18  ;;  %v3006_v20 = vshrl.u32 %v7148_v18, 16  ;;  %v3007_v63 = vshrl.u32 %v2165_v48, 16  ;;  %v9005_v18 = vld [vmem:[#allocation49_spill] sm:$0xff] }
 0x28f   :  { %v2992_v9 = vpack.i.b16 %v2991_v55, %v2990_v37  ;;  %v3012_v13 = vpack.i.b16 %v2169_v59, %v7505_v45  ;;  %v3014_v43 = vshrl.u32 %v7505_v45, 16  ;;  %v3000_v11 = vpack.i.b16 %v2999_v46, %v2998_v51  ;;  %v9007_v55 = vld [vmem:[#allocation56_spill] sm:$0xff] }
 0x290   :  { %v3015_v54 = vshrl.u32 %v2169_v59, 16  ;;  %v9003_v34 = vpack.i.b16 %v8998_v24, %v8996_v23  ;;  %v3472_v30 = vrot.slane %v2980_v44, 4  ;;  %v3008_v58 = vpack.i.b16 %v3007_v63, %v3006_v20 }
 0x291   :  { %v3494_v15 = vrot.slane %v2976_v36, 4  ;;  %v3500_v1 = vrot.slane %v2984_v47, 4  ;;  %v3522_v21 = vrot.slane %v3004_v22, 4  ;;  %v9006_v37 = vpack.i.b16 %v9004_v41, %v9005_v18  ;;  %v9010_v36 = vld [vmem:[#allocation58_spill] sm:$0xff]  ;;  %v9011_v47 = vld [vmem:[#allocation59_spill] sm:$0xff] }
 0x292   :  { %v3466_v25 = vrot.slane %v9003_v34, 4  ;;  %v3016_v49 = vpack.i.b16 %v3015_v54, %v3014_v43  ;;  %v9009_v45 = vpack.i.b16 %v9007_v55, %v9008_v52  ;;  %v3528_v51 = vrot.slane %v3012_v13, 4 }
 0x293   :  { %v3495_v44 = vsel %vm650_vm1, %v3494_v15, %v9010_v36  ;;  %v3501_v41 = vsel %vm650_vm1, %v3500_v1, %v9011_v47  ;;  %v3523_v22 = vsel %vm650_vm1, %v3522_v21, %v2988_v7  ;;  %v3550_v43 = vrot.slane %v3008_v58, 4  ;;  %v9013_v1 = vld [vmem:[#allocation48_spill] sm:$0xff]  ;;  %v9014_v47 = vld [vmem:[#allocation14_spill] sm:$0xff] }
 0x294   :  { %v3467_v48 = vsel %vm650_vm1, %v3466_v25, %v9006_v37  ;;  %v3473_v59 = vsel %vm650_vm1, %v3472_v30, %v9009_v45  ;;  %v7594_v46 = vperm.slane %v3495_v44, %v5763_v60  ;;  %v7597_v52 = vperm.slane %v3501_v41, %v5763_v60  ;;  %v9012_v25 = vld [vmem:[#allocation47_spill] sm:$0xff] }
 0x295   :  { %v7584_v23 = vperm.slane %v3467_v48, %v5763_v60  ;;  %v7587_v24 = vperm.slane %v3473_v59, %v5763_v60  ;;  %v3529_v20 = vsel %vm650_vm1, %v3528_v51, %v2996_v3  ;;  %v7603_v13 = vperm.slane %v3523_v22, %v5763_v60  ;;  %v9015_v41 = vld [vmem:[#allocation15_spill] sm:$0xff] }
 0x296   :  { %v7606_v15 = vperm.slane %v3529_v20, %v5763_v60  ;;  %v3506_v54 = vrot.slane %v7597_v52, 4  ;;  %v3556_v34 = vrot.slane %v3016_v49, 4  ;;  %v4479_v30 = vshrl.u32 %v9012_v25, 16 }
 0x297   :  { %v3478_v63 = vrot.slane %v7587_v24, 4  ;;  %v4480_v18 = vshrl.u32 %v9013_v1, 16  ;;  %v3551_v3 = vsel %vm650_vm1, %v3550_v43, %v2992_v9  ;;  %v4503_v37 = vshrl.u32 %v7478_v5, 16 }
 0x298   :  { %v3534_v7 = vrot.slane %v7606_v15, 4  ;;  %v3507_v58 = vsel %vm650_vm1, %v3506_v54, %v7594_v46  ;;  %v7622_v49 = vperm.slane %v3551_v3, %v5763_v60  ;;  %v3557_v55 = vsel %vm650_vm1, %v3556_v34, %v3000_v11  ;;  %v9019_v3 = vld [vmem:[#allocation17_spill] sm:$0xff] }
 0x299   :  { %v3479_v21 = vsel %vm650_vm1, %v3478_v63, %v7584_v23  ;;  %v7626_v45 = vperm.slane %v3507_v58, %v5783_v14  ;;  %v7631_v9 = vperm.slane %v3557_v55, %v5763_v60  ;;  %v4481_v5 = vpack.i.b16 %v4480_v18, %v4479_v30 }
 0x29a   :  { %v7617_v48 = vperm.slane %v3479_v21, %v5783_v14  ;;  %v3535_v59 = vsel %vm650_vm1, %v3534_v7, %v7603_v13  ;;  %v4504_v44 = vshrl.u32 %v7481_v42, 16  ;;  %v9016_v11 = vrot.slane %v9015_v41, 4  ;;  %v9018_v7 = vld [vmem:[#allocation16_spill] sm:$0xff] }
 0x29b   :  { %v7634_v51 = vperm.slane %v3535_v59, %v5783_v14  ;;  %v3562_v20 = vrot.slane %v7631_v9, 4  ;;  %v4366_v63 = vshrl.u32 %v7626_v45, 16  ;;  %v5014_v43 = vunpack.c.l.b16 %v4481_v5 }
 0x29c   :  { %v4365_v36 = vshrl.u32 %v7617_v48, 16  ;;  %v2183_v22 = vsel %vm650_vm1, %v9016_v11, %v9014_v47  ;;  %v9017_v54 = vrot.slane %v9014_v47, 4  ;;  %v4505_v30 = vpack.i.b16 %v4504_v44, %v4503_v37 }
 0x29d   :  { %v4389_v25 = vshrl.u32 %v7634_v51, 16  ;;  %v7650_v42 = vperm.slane %v2183_v22, %v5783_v14  ;;  %v3563_v18 = vsel %vm650_vm1, %v3562_v20, %v7622_v49  ;;  %v9020_v58 = vrot.slane %v9019_v3, 4 }
 0x29e   :  { %v2185_v34 = vsel %vm650_vm1, %v9015_v41, %v9017_v54  ;;  %v4367_v21 = vpack.i.b16 %v4366_v63, %v4365_v36  ;;  %v9021_v59 = vrot.slane %v9018_v7, 4  ;;  %v7666_v5 = vperm.slane %v3563_v18, %v5783_v14 }
 0x29f   :  { %v7653_v1 = vperm.slane %v2185_v34, %v5783_v14  ;;  %v2211_v55 = vsel %vm650_vm1, %v9020_v58, %v9018_v7  ;;  %v5015_v44 = vunpack.c.l.b16 %v4505_v30  ;;  %v2194_v47 = vrot.slane %v7650_v42, 4 }
 0x2a0   :  { %v2213_v37 = vsel %vm650_vm1, %v9019_v3, %v9021_v59  ;;  %9022 = vst [vmem:[#allocation29_spill] sm:$0xff] %v7666_v5  ;;  %v4770_v11 = vunpack.c.l.b16 %v4367_v21  ;;  %v7671_v36 = vperm.slane %v2211_v55, %v5783_v14  ;;  %v2250_v20 = vrot.slane %v7095_v62, 4 }
 0x2a1   :  { %v2196_v41 = vrot.slane %v7653_v1, 4  ;;  %v2221_v22 = vperm.slane %v2213_v37, %v5783_v14  ;;  %v4390_v63 = vshrl.u32 %v7666_v5, 16  ;;  %v5028_v54 = vpack.c.b16 %v5015_v44, %v5014_v43 }
 0x2a2   :  { %v2195_v34 = vsel %vm650_vm1, 0, %v2194_v47  ;;  %v2222_v30 = vrot.slane %v7671_v36, 4  ;;  %v7680_v3 = vsel %vm650_vm1, 0, %v2250_v20  ;;  %v2252_v21 = vrot.slane %v7098_v4, 4 }
 0x2a3   :  { %v2197_v18 = vsel %vm650_vm1, 0, %v2196_v41  ;;  %v2224_v7 = vrot.slane %v2221_v22, 4  ;;  %v4391_v58 = vpack.i.b16 %v4390_v63, %v4389_v25  ;;  %5038 = vrot.lane.b32.xlu2 %v5028_v54, %s5571_s7  ;;  %v2273_v55 = vperm.slane %v7106_v29, %v5783_v14 }
 0x2a4   :  { %v2277_v43 = vperm.slane %v7101_v19, %v5783_v14  ;;  %v3020_v59 = vpack.i.b16 %v7671_v36, %v7650_v42  ;;  %v2223_v37 = vsel %vm650_vm1, 0, %v2222_v30  ;;  %v2253_v47 = vsel %vm650_vm1, 0, %v2252_v21 }
 0x2a5   :  { %v2225_v44 = vsel %vm650_vm1, 0, %v2224_v7  ;;  %v3022_v25 = vshrl.u32 %v7650_v42, 16  ;;  %v4771_v41 = vunpack.c.l.b16 %v4391_v58  ;;  %v2278_v20 = vrot.slane %v2273_v55, 4 }
 0x2a6   :  { %v2280_v63 = vrot.slane %v2277_v43, 4  ;;  %v3023_v54 = vshrl.u32 %v7671_v36, 16  ;;  %v3028_v29 = vpack.i.b16 %v2223_v37, %v2195_v34  ;;  %v3030_v39 = vshrl.u32 %v2195_v34, 16 }
 0x2a7   :  { %v3031_v12 = vshrl.u32 %v2223_v37, 16  ;;  %v3036_v19 = vpack.i.b16 %v2221_v22, %v7653_v1  ;;  %v4786_v53 = vpack.c.b16 %v4771_v41, %v4770_v11  ;;  %v2279_v0 = vsel %vm650_vm1, 0, %v2278_v20 }
 0x2a8   :  { %v2281_v30 = vsel %vm650_vm1, 0, %v2280_v63  ;;  %v3024_v7 = vpack.i.b16 %v3023_v54, %v3022_v25  ;;  %v3038_v21 = vshrl.u32 %v7653_v1, 16  ;;  %v3039_v42 = vshrl.u32 %v2221_v22, 16 }
 0x2a9   :  { %v3032_v61 = vpack.i.b16 %v3031_v12, %v3030_v39  ;;  %v3044_v58 = vpack.i.b16 %v2225_v44, %v2197_v18  ;;  %4794 = vrot.lane.b32.xlu0 %v4786_v53, %s5546_s24  ;;  %v3046_v6 = vshrl.u32 %v2197_v18, 16  ;;  %v3047_v36 = vshrl.u32 %v2225_v44, 16 }
 0x2aa   :  { %v3052_v34 = vpack.i.b16 %v2273_v55, %v7095_v62  ;;  %v3054_v37 = vshrl.u32 %v7095_v62, 16  ;;  %v3040_v33 = vpack.i.b16 %v3039_v42, %v3038_v21  ;;  %v3055_v11 = vshrl.u32 %v2273_v55, 16 }
 0x2ab   :  { %v3060_v41 = vpack.i.b16 %v2279_v0, %v7680_v3  ;;  %v3062_v20 = vshrl.u32 %v7680_v3, 16  ;;  %v3048_v25 = vpack.i.b16 %v3047_v36, %v3046_v6  ;;  %v3063_v12 = vshrl.u32 %v2279_v0, 16 }
 0x2ac   :  { %v3068_v39 = vpack.i.b16 %v2277_v43, %v7098_v4  ;;  %v3070_v1 = vshrl.u32 %v7098_v4, 16  ;;  %v3056_v22 = vpack.i.b16 %v3055_v11, %v3054_v37  ;;  %v3071_v53 = vshrl.u32 %v2277_v43, 16 }
 0x2ad   :  { %v3076_v18 = vpack.i.b16 %v2281_v30, %v2253_v47  ;;  %v3078_v44 = vshrl.u32 %v2253_v47, 16  ;;  %v3064_v63 = vpack.i.b16 %v3063_v12, %v3062_v20  ;;  %v3079_v54 = vshrl.u32 %v2281_v30, 16 }
 0x2ae   :  { %v3578_v28 = vrot.slane %v3036_v19, 4  ;;  %v3584_v62 = vrot.slane %v3044_v58, 4  ;;  %v3072_v21 = vpack.i.b16 %v3071_v53, %v3070_v1  ;;  %v3606_v55 = vrot.slane %v3040_v33, 4 }
 0x2af   :  { %v3612_v42 = vrot.slane %v3048_v25, 4  ;;  %v3634_v38 = vrot.slane %v3068_v39, 4  ;;  %v3080_v32 = vpack.i.b16 %v3079_v54, %v3078_v44  ;;  %v3640_v3 = vrot.slane %v3076_v18, 4 }
 0x2b0   :  { %v3579_v6 = vsel %vm650_vm1, %v3578_v28, %v3020_v59  ;;  %v3585_v0 = vsel %vm650_vm1, %v3584_v62, %v3028_v29  ;;  %v3607_v47 = vsel %vm650_vm1, %v3606_v55, %v3024_v7  ;;  %v538_v29 = vpop.permute.xlu1 %537  ;;  %v9023_v20 = vrot.slane %v7544_v26, 4  ;;  %v636_v55 = vpop.permute.xlu0 %635 }
 0x2b1   :  { %v7709_v4 = vperm.slane %v3579_v6, %v5763_v60  ;;  %v7712_v43 = vperm.slane %v3585_v0, %v5763_v60  ;;  %v3613_v19 = vsel %vm650_vm1, %v3612_v42, %v3032_v61  ;;  %v7717_v33 = vperm.slane %v3607_v47, %v5763_v60 }
 0x2b2   :  { %v7720_v30 = vperm.slane %v3613_v19, %v5763_v60  ;;  %v3635_v28 = vsel %vm650_vm1, %v3634_v38, %v3052_v34  ;;  %v3641_v59 = vsel %vm650_vm1, %v3640_v3, %v3060_v41  ;;  %v3662_v61 = vrot.slane %v3072_v21, 4 }
 0x2b3   :  { %v3590_v58 = vrot.slane %v7712_v43, 4  ;;  %v7726_v36 = vperm.slane %v3635_v28, %v5763_v60  ;;  %v7729_v7 = vperm.slane %v3641_v59, %v5763_v60  ;;  %v3668_v11 = vrot.slane %v3080_v32, 4 }
 0x2b4   :  { %v3618_v37 = vrot.slane %v7720_v30, 4  ;;  %v7735_v25 = vsel %vm650_vm1, 0, %v9023_v20  ;;  %v9024_v38 = vrot.slane %v7530_v50, 4  ;;  %v3663_v39 = vsel %vm650_vm1, %v3662_v61, %v3056_v22 }
 0x2b5   :  { %v3591_v41 = vsel %vm650_vm1, %v3590_v58, %v7709_v4  ;;  %v3646_v12 = vrot.slane %v7729_v7, 4  ;;  %v9025_v1 = vrot.slane %v7259_v16, 4  ;;  %v7753_v44 = vperm.slane %v3663_v39, %v5763_v60 }
 0x2b6   :  { %v1181_v34 = vsel %vm650_vm1, 0, %v9024_v38  ;;  %v7748_v53 = vperm.slane %v3591_v41, %v5783_v14  ;;  %v3619_v18 = vsel %vm650_vm1, %v3618_v37, %v7717_v33  ;;  %v3669_v54 = vsel %vm650_vm1, %v3668_v11, %v3064_v63  ;;  %v9030_v37 = vld [vmem:[#allocation45_spill] sm:$0xff] }
 0x2b7   :  { %v1189_v32 = vsel %vm650_vm1, %v9025_v1, %v538_v29  ;;  %v7757_v62 = vperm.slane %v3619_v18, %v5783_v14  ;;  %v3647_v22 = vsel %vm650_vm1, %v3646_v12, %v7726_v36  ;;  %v7762_v16 = vperm.slane %v3669_v54, %v5763_v60  ;;  %v9031_v12 = vld [vmem:[#allocation46_spill] sm:$0xff]  ;;  %v540_v1 = vpop.permute.xlu2 %539 }
 0x2b8   :  { %9026 = vst [vmem:[#allocation18_spill] sm:$0xff] %v7748_v53  ;;  %v1193_v21 = vperm.slane %v1189_v32, %v5763_v60  ;;  %v7766_v42 = vperm.slane %v3647_v22, %v5783_v14  ;;  %v4413_v6 = vshrl.u32 %v7748_v53, 16  ;;  %v1846_v0 = vshrl.u32 %v7735_v25, 16 }
 0x2b9   :  { %9027 = vst [vmem:[#allocation50_spill] sm:$0xff] %v7757_v62  ;;  %v1862_v63 = vshrl.u32 %v1181_v34, 16  ;;  %v3674_v3 = vrot.slane %v7762_v16, 4  ;;  %v4414_v47 = vshrl.u32 %v7757_v62, 16  ;;  %v9029_v28 = vrot.slane %v7465_v8, 4 }
 0x2ba   :  { %9028 = vst [vmem:[#allocation51_spill] sm:$0xff] %v7766_v42  ;;  %v1194_v19 = vrot.slane %v1193_v21, 4  ;;  %v4437_v29 = vshrl.u32 %v7766_v42, 16  ;;  %v1300_v61 = vrot.slane %v636_v55, 4  ;;  %v4527_v11 = vshrl.u32 %v9030_v37, 16 }
 0x2bb   :  { %v1197_v59 = vsel %vm650_vm1, %v1193_v21, %v9029_v28  ;;  %v3675_v20 = vsel %vm650_vm1, %v3674_v3, %v7753_v44  ;;  %v4415_v38 = vpack.i.b16 %v4414_v47, %v4413_v6  ;;  %v4528_v39 = vshrl.u32 %v9031_v12, 16 }
 0x2bc   :  { %v1205_v58 = vperm.slane %v1197_v59, %v5783_v14  ;;  %v1195_v41 = vsel %vm650_vm1, %v1194_v19, %v7465_v8  ;;  %v7784_v32 = vperm.slane %v3675_v20, %v5783_v14  ;;  %v1301_v28 = vsel %vm650_vm1, %v1300_v61, %v540_v1 }
 0x2bd   :  { %v1201_v18 = vperm.slane %v1195_v41, %v5783_v14  ;;  %v4772_v21 = vunpack.c.l.b16 %v4415_v38  ;;  %v7789_v3 = vpack.i.b16 %v4528_v39, %v4527_v11  ;;  %v9033_v37 = vshrl.u32 %v7530_v50, 16 }
 0x2be   :  { %9032 = vst [vmem:[#allocation55_spill] sm:$0xff] %v7784_v32  ;;  %v1208_v54 = vrot.slane %v1205_v58, 4  ;;  %v1852_v22 = vpack.i.b16 %v1205_v58, %v7530_v50  ;;  %v1855_v55 = vshrl.u32 %v1205_v58, 16  ;;  %v4438_v6 = vshrl.u32 %v7784_v32, 16 }
 0x2bf   :  { %v1206_v8 = vrot.slane %v1201_v18, 4  ;;  %v1836_v19 = vpack.i.b16 %v1201_v18, %v7544_v26  ;;  %v1839_v59 = vshrl.u32 %v1201_v18, 16  ;;  %v1305_v61 = vperm.slane %v1301_v28, %v5763_v60 }
 0x2c0   :  { %v1209_v47 = vsel %vm650_vm1, 0, %v1208_v54  ;;  %v1856_v20 = vpack.i.b16 %v1855_v55, %v9033_v37  ;;  %v4439_v10 = vpack.i.b16 %v4438_v6, %v4437_v29  ;;  %v2562_v38 = vrot.slane %v1852_v22, 4 }
 0x2c1   :  { %v1860_v41 = vpack.i.b16 %v1209_v47, %v1181_v34  ;;  %v1863_v12 = vshrl.u32 %v1209_v47, 16  ;;  %v1207_v58 = vsel %vm650_vm1, 0, %v1206_v8  ;;  %v9034_v11 = vshrl.u32 %v7544_v26, 16  ;;  %v9035_v47 = vld [vmem:[#allocation60_spill] sm:$0xff] }
 0x2c2   :  { %v1844_v1 = vpack.i.b16 %v1207_v58, %v7735_v25  ;;  %v1847_v54 = vshrl.u32 %v1207_v58, 16  ;;  %v4773_v56 = vunpack.c.l.b16 %v4439_v10  ;;  %v2563_v18 = vsel %vm650_vm1, %v2562_v38, %v1836_v19 }
 0x2c3   :  { %v1840_v39 = vpack.i.b16 %v1839_v59, %v9034_v11  ;;  %v1864_v31 = vpack.i.b16 %v1863_v12, %v1862_v63  ;;  %v2568_v50 = vrot.slane %v1860_v41, 4  ;;  %v2590_v55 = vrot.slane %v1856_v20, 4 }
 0x2c4   :  { %v1848_v34 = vpack.i.b16 %v1847_v54, %v1846_v0  ;;  %v2567_v29 = vperm.slane %v2563_v18, %v5763_v60  ;;  %v1306_v8 = vrot.slane %v1305_v61, 4  ;;  %v4787_v22 = vpack.c.b16 %v4773_v56, %v4772_v21 }
 0x2c5   :  { %v2596_v6 = vrot.slane %v1864_v31, 4  ;;  %v2569_v28 = vsel %vm650_vm1, %v2568_v50, %v1844_v1  ;;  %v2591_v26 = vsel %vm650_vm1, %v2590_v55, %v1840_v39  ;;  %v9036_v59 = vrot.slane %v9035_v47, 4 }
 0x2c6   :  { %v2573_v10 = vperm.slane %v2569_v28, %v5763_v60  ;;  %v2576_v63 = vrot.slane %v2567_v29, 4  ;;  %v2595_v19 = vperm.slane %v2591_v26, %v5763_v60  ;;  %4796 = vrot.lane.b32.xlu1 %v4787_v22, %s5546_s24  ;;  %v1307_v56 = vsel %vm650_vm1, %v1306_v8, %v9035_v47 }
 0x2c7   :  { %v1309_v25 = vsel %vm650_vm1, %v1305_v61, %v9036_v59  ;;  %v2597_v0 = vsel %vm650_vm1, %v2596_v6, %v1848_v34  ;;  %v4551_v37 = vshrl.u32 %v7472_v40, 16  ;;  %v1313_v58 = vperm.slane %v1307_v56, %v5783_v14 }
 0x2c8   :  { %v2601_v31 = vperm.slane %v2597_v0, %v5763_v60  ;;  %v1317_v21 = vperm.slane %v1309_v25, %v5783_v14  ;;  %v2574_v20 = vrot.slane %v2573_v10, 4  ;;  %v2577_v41 = vsel %vm650_vm1, %v2573_v10, %v2576_v63 }
 0x2c9   :  { %v2604_v12 = vrot.slane %v2595_v19, 4  ;;  %v7820_v38 = vperm.slane %v2577_v41, %v5783_v14  ;;  %v1318_v18 = vrot.slane %v1313_v58, 4  ;;  %v1900_v40 = vpack.i.b16 %v1313_v58, %v7539_v27 }
 0x2ca   :  { %v2602_v61 = vrot.slane %v2601_v31, 4  ;;  %v1320_v11 = vrot.slane %v1317_v21, 4  ;;  %v1916_v39 = vpack.i.b16 %v1317_v21, %v7527_v35  ;;  %v2575_v1 = vsel %vm650_vm1, %v2574_v20, %v2567_v29 }
 0x2cb   :  { %v2605_v54 = vsel %vm650_vm1, %v2601_v31, %v2604_v12  ;;  %v7827_v50 = vperm.slane %v2575_v1, %v5783_v14  ;;  %v1319_v29 = vsel %vm650_vm1, 0, %v1318_v18  ;;  %v1903_v22 = vshrl.u32 %v1313_v58, 16 }
 0x2cc   :  { %v2603_v55 = vsel %vm650_vm1, %v2602_v61, %v2595_v19  ;;  %v7831_v34 = vperm.slane %v2605_v54, %v5783_v14  ;;  %v1321_v6 = vsel %vm650_vm1, 0, %v1320_v11  ;;  %v1919_v28 = vshrl.u32 %v1317_v21, 16 }
 0x2cd   :  { %v7835_v8 = vperm.slane %v2603_v55, %v5783_v14  ;;  %v1908_v47 = vpack.i.b16 %v1319_v29, %v7562_v2  ;;  %v1911_v59 = vshrl.u32 %v1319_v29, 16  ;;  %v1924_v25 = vpack.i.b16 %v1321_v6, %v7552_v17 }
 0x2ce   :  { %v9037_v10 = vshrl.u32 %v7539_v27, 16  ;;  %v9038_v19 = vshrl.u32 %v7527_v35, 16  ;;  %v1927_v31 = vshrl.u32 %v1321_v6, 16  ;;  %v2674_v56 = vrot.slane %v1916_v39, 4 }
 0x2cf   :  { %v9039_v20 = vshrl.u32 %v7562_v2, 16  ;;  %v2680_v12 = vrot.slane %v1924_v25, 4  ;;  %v4552_v21 = vshrl.u32 %v7475_v57, 16  ;;  %v5016_v58 = vunpack.c.l.b16 %v7789_v3 }
 0x2d0   :  { %v1904_v63 = vpack.i.b16 %v1903_v22, %v9037_v10  ;;  %v1920_v0 = vpack.i.b16 %v1919_v28, %v9038_v19  ;;  %v9040_v61 = vshrl.u32 %v7552_v17, 16  ;;  %v2675_v1 = vsel %vm650_vm1, %v2674_v56, %v1900_v40 }
 0x2d1   :  { %v1912_v41 = vpack.i.b16 %v1911_v59, %v9039_v20  ;;  %v3602_v54 = vrot.slane %v7748_v53, 4  ;;  %v2679_v35 = vperm.slane %v2675_v1, %v5763_v60  ;;  %v2681_v39 = vsel %vm650_vm1, %v2680_v12, %v1908_v47 }
 0x2d2   :  { %v1928_v11 = vpack.i.b16 %v1927_v31, %v9040_v61  ;;  %v2702_v27 = vrot.slane %v1920_v0, 4  ;;  %v4553_v18 = vpack.i.b16 %v4552_v21, %v4551_v37  ;;  %v3630_v2 = vrot.slane %v7757_v62, 4 }
 0x2d3   :  { %v2685_v55 = vperm.slane %v2681_v39, %v5763_v60  ;;  %v7859_v17 = vsel %vm650_vm1, 0, %v3602_v54  ;;  %v2688_v6 = vrot.slane %v2679_v35, 4  ;;  %v3658_v47 = vrot.slane %v7766_v42, 4 }
 0x2d4   :  { %v2703_v57 = vsel %vm650_vm1, %v2702_v27, %v1904_v63  ;;  %v2708_v3 = vrot.slane %v1928_v11, 4  ;;  %v5017_v29 = vunpack.c.l.b16 %v4553_v18  ;;  %v3631_v22 = vsel %vm650_vm1, 0, %v3630_v2 }
 0x2d5   :  { %v7862_v40 = vperm.slane %v2703_v57, %v5763_v60  ;;  %v2686_v28 = vrot.slane %v2685_v55, 4  ;;  %v3686_v59 = vrot.slane %v7784_v32, 4  ;;  %v7869_v25 = vsel %vm650_vm1, %v2685_v55, %v2688_v6 }
 0x2d6   :  { %v2709_v37 = vsel %vm650_vm1, %v2708_v3, %v1912_v41  ;;  %v5029_v19 = vpack.c.b16 %v5017_v29, %v5016_v58  ;;  %v3659_v31 = vsel %vm650_vm1, 0, %v3658_v47  ;;  %v4418_v20 = vpack.i.b16 %v3631_v22, %v7859_v17 }
 0x2d7   :  { %v7872_v10 = vperm.slane %v2709_v37, %v5763_v60  ;;  %v2687_v0 = vsel %vm650_vm1, %v2686_v28, %v2679_v35  ;;  %v3687_v56 = vsel %vm650_vm1, 0, %v3686_v59  ;;  %v3490_v61 = vrot.slane %v7617_v48, 4 }
 0x2d8   :  { %v7880_v41 = vperm.slane %v2687_v0, %v5783_v14  ;;  %5040 = vrot.lane.b32.xlu0 %v5029_v19, %s5571_s7  ;;  %v4442_v21 = vpack.i.b16 %v3687_v56, %v3659_v31  ;;  %v4812_v11 = vunpack.c.l.b16 %v4418_v20  ;;  %v3518_v58 = vrot.slane %v7626_v45, 4 }
 0x2d9   :  { %v2714_v12 = vrot.slane %v7872_v10, 4  ;;  %v3546_v1 = vrot.slane %v7634_v51, 4  ;;  %v3574_v27 = vrot.slane %v7666_v5, 4  ;;  %v3491_v39 = vsel %vm650_vm1, 0, %v3490_v61 }
 0x2da   :  { %v4813_v35 = vunpack.c.l.b16 %v4442_v21  ;;  %v3480_v18 = vrot.slane %v7584_v23, 4  ;;  %v3519_v2 = vsel %vm650_vm1, 0, %v3518_v58  ;;  %v4371_v3 = vshrl.u32 %v3491_v39, 16 }
 0x2db   :  { %v7890_v54 = vsel %vm650_vm1, %v2714_v12, %v7862_v40  ;;  %v3547_v55 = vsel %vm650_vm1, 0, %v3546_v1  ;;  %v3575_v57 = vsel %vm650_vm1, 0, %v3574_v27  ;;  %v4370_v29 = vpack.i.b16 %v3519_v2, %v3491_v39 }
 0x2dc   :  { %v4827_v6 = vpack.c.b16 %v4813_v35, %v4812_v11  ;;  %v4394_v28 = vpack.i.b16 %v3575_v57, %v3547_v55  ;;  %v4372_v37 = vshrl.u32 %v3519_v2, 16  ;;  %v4395_v47 = vshrl.u32 %v3547_v55, 16 }
 0x2dd   :  { %v4396_v59 = vshrl.u32 %v3575_v57, 16  ;;  %v3481_v19 = vsel %vm650_vm1, %v7587_v24, %v3480_v18  ;;  %v3508_v0 = vrot.slane %v7594_v46, 4  ;;  %v4810_v23 = vunpack.c.l.b16 %v4370_v29 }
 0x2de   :  { %4836 = vrot.lane.b32.xlu2 %v4827_v6, %s5566_s29  ;;  %v4811_v20 = vunpack.c.l.b16 %v4394_v28  ;;  %v4373_v12 = vpack.i.b16 %v4372_v37, %v4371_v3  ;;  %v7902_v21 = vperm.slane %v3481_v19, %v5783_v14  ;;  %v3536_v58 = vrot.slane %v7603_v13, 4 }
 0x2df   :  { %v4397_v61 = vpack.i.b16 %v4396_v59, %v4395_v47  ;;  %v3509_v11 = vsel %vm650_vm1, %v7597_v52, %v3508_v0  ;;  %v3564_v1 = vrot.slane %v7622_v49, 4  ;;  %v4419_v35 = vshrl.u32 %v7859_v17, 16 }
 0x2e0   :  { %v4826_v27 = vpack.c.b16 %v4811_v20, %v4810_v23  ;;  %v4850_v24 = vunpack.c.l.b16 %v4373_v12  ;;  %v3517_v46 = vperm.slane %v3509_v11, %v5783_v14  ;;  %v3537_v18 = vsel %vm650_vm1, %v7606_v15, %v3536_v58 }
 0x2e1   :  { %v4851_v39 = vunpack.c.l.b16 %v4397_v61  ;;  %v3565_v2 = vsel %vm650_vm1, %v7631_v9, %v3564_v1  ;;  %v4420_v55 = vshrl.u32 %v3631_v22, 16  ;;  %v3545_v52 = vperm.slane %v3537_v18, %v5783_v14 }
 0x2e2   :  { %4834 = vrot.lane.b32.xlu1 %v4826_v27, %s5566_s29  ;;  %v7917_v13 = vperm.slane %v3565_v2, %v5783_v14  ;;  %v4376_v49 = vpack.i.b16 %v3517_v46, %v7902_v21  ;;  %v4443_v57 = vshrl.u32 %v3659_v31, 16  ;;  %v4444_v6 = vshrl.u32 %v3687_v56, 16 }
 0x2e3   :  { %v4866_v3 = vpack.c.b16 %v4851_v39, %v4850_v24  ;;  %v4421_v17 = vpack.i.b16 %v4420_v55, %v4419_v35  ;;  %v3592_v29 = vrot.slane %v7709_v4, 4  ;;  %v3620_v9 = vrot.slane %v7717_v33, 4 }
 0x2e4   :  { %v4400_v15 = vpack.i.b16 %v7917_v13, %v3545_v52  ;;  %v4890_v28 = vunpack.c.l.b16 %v4376_v49  ;;  %v3648_v22 = vrot.slane %v7726_v36, 4  ;;  %v4445_v37 = vpack.i.b16 %v4444_v6, %v4443_v57 }
 0x2e5   :  { %4874 = vrot.lane.b32.xlu0 %v4866_v3, %s5567_s30  ;;  %v4852_v47 = vunpack.c.l.b16 %v4421_v17  ;;  %v3593_v59 = vsel %vm650_vm1, %v7712_v43, %v3592_v29  ;;  %v3676_v31 = vrot.slane %v7753_v44, 4  ;;  %v3621_v4 = vsel %vm650_vm1, %v7720_v30, %v3620_v9 }
 0x2e6   :  { %v4891_v19 = vunpack.c.l.b16 %v4400_v15  ;;  %v3601_v56 = vperm.slane %v3593_v59, %v5783_v14  ;;  %v3649_v33 = vsel %vm650_vm1, %v7729_v7, %v3648_v22  ;;  %v4853_v0 = vunpack.c.l.b16 %v4445_v37 }
 0x2e7   :  { %v3629_v36 = vperm.slane %v3621_v4, %v5783_v14  ;;  %v3657_v23 = vperm.slane %v3649_v33, %v5783_v14  ;;  %v3677_v20 = vsel %vm650_vm1, %v7762_v16, %v3676_v31  ;;  %v4377_v61 = vshrl.u32 %v7902_v21, 16 }
 0x2e8   :  { %v4906_v43 = vpack.c.b16 %v4891_v19, %v4890_v28  ;;  %v3685_v44 = vperm.slane %v3677_v20, %v5783_v14  ;;  %v4425_v12 = vshrl.u32 %v3601_v56, 16  ;;  %v4867_v11 = vpack.c.b16 %v4853_v0, %v4852_v47 }
 0x2e9   :  { %v4424_v58 = vpack.i.b16 %v3629_v36, %v3601_v56  ;;  %v4426_v30 = vshrl.u32 %v3629_v36, 16  ;;  %v4449_v1 = vshrl.u32 %v3657_v23, 16  ;;  %v4378_v24 = vshrl.u32 %v3517_v46, 16 }
 0x2ea   :  { %4914 = vrot.lane.b32.xlu2 %v4906_v43, %s5568_s2  ;;  %v4448_v7 = vpack.i.b16 %v3685_v44, %v3657_v23  ;;  %v4450_v27 = vshrl.u32 %v3685_v44, 16  ;;  %v4401_v35 = vshrl.u32 %v3545_v52, 16  ;;  %4876 = vrot.lane.b32.xlu1 %v4867_v11, %s5567_s30  ;;  %v4402_v18 = vshrl.u32 %v7917_v13, 16 }
 0x2eb   :  { %v4892_v39 = vunpack.c.l.b16 %v4424_v58  ;;  %v4427_v16 = vpack.i.b16 %v4426_v30, %v4425_v12  ;;  %v3492_v2 = vrot.slane %v7902_v21, 4  ;;  %v4379_v57 = vpack.i.b16 %v4378_v24, %v4377_v61 }
 0x2ec   :  { %v4893_v55 = vunpack.c.l.b16 %v4448_v7  ;;  %v4451_v49 = vpack.i.b16 %v4450_v27, %v4449_v1  ;;  %v3520_v3 = vrot.slane %v3517_v46, 4  ;;  %v4403_v6 = vpack.i.b16 %v4402_v18, %v4401_v35  ;;  %v9041_v7 = vld [vmem:[#allocation35_spill] sm:$0xff] }
 0x2ed   :  { %v4932_v17 = vunpack.c.l.b16 %v4427_v16  ;;  %v3493_v29 = vsel %vm650_vm1, 0, %v3492_v2  ;;  %v3548_v15 = vrot.slane %v3545_v52, 4  ;;  %v4930_v22 = vunpack.c.l.b16 %v4379_v57 }
 0x2ee   :  { %v4907_v28 = vpack.c.b16 %v4893_v55, %v4892_v39  ;;  %v4933_v9 = vunpack.c.l.b16 %v4451_v49  ;;  %v3521_v37 = vsel %vm650_vm1, 0, %v3520_v3  ;;  %v4931_v47 = vunpack.c.l.b16 %v4403_v6  ;;  %v9042_v6 = vld [vmem:[#allocation36_spill] sm:$0xff] }
 0x2ef   :  { %v3549_v59 = vsel %vm650_vm1, 0, %v3548_v15  ;;  %v3576_v31 = vrot.slane %v7917_v13, 4  ;;  %v4382_v21 = vpack.i.b16 %v3521_v37, %v3493_v29  ;;  %v4383_v46 = vshrl.u32 %v3493_v29, 16 }
 0x2f0   :  { %4916 = vrot.lane.b32.xlu0 %v4907_v28, %s5568_s2  ;;  %v4947_v19 = vpack.c.b16 %v4933_v9, %v4932_v17  ;;  %v4384_v4 = vshrl.u32 %v3521_v37, 16  ;;  %v4407_v33 = vshrl.u32 %v3549_v59, 16  ;;  %v4946_v0 = vpack.c.b16 %v4931_v47, %v4930_v22 }
 0x2f1   :  { %v3577_v52 = vsel %vm650_vm1, 0, %v3576_v31  ;;  %v4970_v20 = vunpack.c.l.b16 %v4382_v21  ;;  %v3604_v43 = vrot.slane %v3601_v56, 4  ;;  %v3632_v58 = vrot.slane %v3629_v36, 4  ;;  %v9045_v21 = vld [vmem:[#allocation34_spill] sm:$0xff] }
 0x2f2   :  { %4956 = vrot.lane.b32.xlu2 %v4947_v19, %s5569_s5  ;;  %v4406_v12 = vpack.i.b16 %v3577_v52, %v3549_v59  ;;  %v4385_v61 = vpack.i.b16 %v4384_v4, %v4383_v46  ;;  %v4408_v11 = vshrl.u32 %v3577_v52, 16  ;;  %4954 = vrot.lane.b32.xlu1 %v4946_v0, %s5569_s5  ;;  %v3660_v30 = vrot.slane %v3657_v23, 4  ;;  %v9043_v59 = vld [vmem:[#allocation33_spill] sm:$0xff] }
 0x2f3   :  { %v3605_v13 = vsel %vm650_vm1, 0, %v3604_v43  ;;  %v3688_v1 = vrot.slane %v3685_v44, 4  ;;  %v7954_v27 = vperm.slane %v9041_v7, %v5783_v14  ;;  %v3633_v56 = vsel %vm650_vm1, 0, %v3632_v58  ;;  %v9046_v46 = vld [vmem:[#allocation37_spill] sm:$0xff]  ;;  %v9050_v7 = vld [vmem:[#allocation67_spill] sm:$0xff] }
 0x2f4   :  { %v4971_v24 = vunpack.c.l.b16 %v4406_v12  ;;  %v4409_v35 = vpack.i.b16 %v4408_v11, %v4407_v33  ;;  %v5010_v39 = vunpack.c.l.b16 %v4385_v61  ;;  %v3661_v16 = vsel %vm650_vm1, 0, %v3660_v30  ;;  %v9047_v61 = vld [vmem:[#allocation65_spill] sm:$0xff] }
 0x2f5   :  { %v3689_v18 = vsel %vm650_vm1, 0, %v3688_v1  ;;  %v4430_v36 = vpack.i.b16 %v3633_v56, %v3605_v13  ;;  %v4431_v2 = vshrl.u32 %v3605_v13, 16  ;;  %v4432_v57 = vshrl.u32 %v3633_v56, 16  ;;  %v9049_v13 = vld [vmem:[#allocation64_spill] sm:$0xff] }
 0x2f6   :  { %v4986_v55 = vpack.c.b16 %v4971_v24, %v4970_v20  ;;  %v5011_v49 = vunpack.c.l.b16 %v4409_v35  ;;  %v4454_v23 = vpack.i.b16 %v3689_v18, %v3661_v16  ;;  %v4455_v44 = vshrl.u32 %v3661_v16, 16  ;;  %v9051_v35 = vld [vmem:[#allocation66_spill] sm:$0xff] }
 0x2f7   :  { %v4456_v3 = vshrl.u32 %v3689_v18, 16  ;;  %v4972_v17 = vunpack.c.l.b16 %v4430_v36  ;;  %v2866_v29 = vrot.slane %v9042_v6, 4  ;;  %v4433_v9 = vpack.i.b16 %v4432_v57, %v4431_v2 }
 0x2f8   :  { %4994 = vrot.lane.b32.xlu0 %v4986_v55, %s5570_s6  ;;  %v5026_v15 = vpack.c.b16 %v5011_v49, %v5010_v39  ;;  %v4973_v28 = vunpack.c.l.b16 %v4454_v23  ;;  %v2868_v22 = vrot.slane %v7954_v27, 4  ;;  %v9044_v31 = vrot.slane %v9043_v59, 4 }
 0x2f9   :  { %v4457_v37 = vpack.i.b16 %v4456_v3, %v4455_v44  ;;  %v7963_v47 = vsel %vm650_vm1, 0, %v2866_v29  ;;  %v2889_v4 = vperm.slane %v9046_v46, %v5783_v14  ;;  %v5012_v0 = vunpack.c.l.b16 %v4433_v9 }
 0x2fa   :  { %v2885_v19 = vsel %vm650_vm1, %v9045_v21, %v9044_v31  ;;  %5034 = vrot.lane.b32.xlu2 %v5026_v15, %s5571_s7  ;;  %v4987_v33 = vpack.c.b16 %v4973_v28, %v4972_v17  ;;  %v2869_v52 = vsel %vm650_vm1, 0, %v2868_v22  ;;  %v9048_v11 = vrot.slane %v9047_v61, 4 }
 0x2fb   :  { %v2893_v20 = vperm.slane %v2885_v19, %v5783_v14  ;;  %v5013_v43 = vunpack.c.l.b16 %v4457_v37  ;;  %v2894_v12 = vrot.slane %v2889_v4, 4  ;;  %v2924_v30 = vrot.slane %v9049_v13, 4 }
 0x2fc   :  { %v7977_v58 = vsel %vm650_vm1, 0, %v9048_v11  ;;  %4996 = vrot.lane.b32.xlu1 %v4987_v33, %s5570_s6  ;;  %v2950_v24 = vrot.slane %v9050_v7, 4  ;;  %v2952_v39 = vrot.slane %v9051_v35, 4  ;;  %v3404_v56 = vpack.i.b16 %v2889_v4, %v9042_v6 }
 0x2fd   :  { %v2896_v1 = vrot.slane %v2893_v20, 4  ;;  %v5027_v16 = vpack.c.b16 %v5013_v43, %v5012_v0  ;;  %v2895_v18 = vsel %vm650_vm1, 0, %v2894_v12  ;;  %v2925_v36 = vsel %vm650_vm1, 0, %v2924_v30 }
 0x2fe   :  { %v3406_v2 = vshrl.u32 %v9042_v6, 16  ;;  %v2951_v49 = vsel %vm650_vm1, 0, %v2950_v24  ;;  %v2953_v57 = vsel %vm650_vm1, 0, %v2952_v39  ;;  %v3407_v23 = vshrl.u32 %v2889_v4, 16 }
 0x2ff   :  { %v2897_v55 = vsel %vm650_vm1, 0, %v2896_v1  ;;  %v3412_v44 = vpack.i.b16 %v2895_v18, %v7963_v47  ;;  %v3414_v3 = vshrl.u32 %v7963_v47, 16  ;;  %v3415_v17 = vshrl.u32 %v2895_v18, 16 }
 0x300   :  { %v3420_v29 = vpack.i.b16 %v2893_v20, %v7954_v27  ;;  %5036 = vrot.lane.b32.xlu0 %v5027_v16, %s5571_s7  ;;  %v3408_v15 = vpack.i.b16 %v3407_v23, %v3406_v2  ;;  %v3422_v28 = vshrl.u32 %v7954_v27, 16  ;;  %v3423_v6 = vshrl.u32 %v2893_v20, 16 }
 0x301   :  { %v3428_v9 = vpack.i.b16 %v2897_v55, %v2869_v52  ;;  %v3416_v22 = vpack.i.b16 %v3415_v17, %v3414_v3  ;;  %v3430_v37 = vshrl.u32 %v2869_v52, 16  ;;  %v3431_v59 = vshrl.u32 %v2897_v55, 16 }
 0x302   :  { %v3436_v31 = vpack.i.b16 %v9050_v7, %v9047_v61  ;;  %v3424_v21 = vpack.i.b16 %v3423_v6, %v3422_v28  ;;  %v3438_v19 = vshrl.u32 %v9047_v61, 16  ;;  %v3439_v47 = vshrl.u32 %v9050_v7, 16 }
 0x303   :  { %v3444_v46 = vpack.i.b16 %v2951_v49, %v7977_v58  ;;  %v3432_v4 = vpack.i.b16 %v3431_v59, %v3430_v37  ;;  %v3446_v33 = vshrl.u32 %v7977_v58, 16  ;;  %v3447_v0 = vshrl.u32 %v2951_v49, 16 }
 0x304   :  { %v3452_v27 = vpack.i.b16 %v9051_v35, %v9049_v13  ;;  %v3440_v20 = vpack.i.b16 %v3439_v47, %v3438_v19  ;;  %v3454_v52 = vshrl.u32 %v9049_v13, 16  ;;  %v3455_v43 = vshrl.u32 %v9051_v35, 16  ;;  %v9054_v47 = vld [vmem:[#allocation38_spill] sm:$0xff] }
 0x305   :  { %v3460_v12 = vpack.i.b16 %v2953_v57, %v2925_v36  ;;  %v3448_v11 = vpack.i.b16 %v3447_v0, %v3446_v33  ;;  %v3462_v30 = vshrl.u32 %v2925_v36, 16  ;;  %v3463_v61 = vshrl.u32 %v2953_v57, 16 }
 0x306   :  { %v4250_v1 = vrot.slane %v3420_v29, 4  ;;  %v3456_v7 = vpack.i.b16 %v3455_v43, %v3454_v52  ;;  %v4256_v24 = vrot.slane %v3428_v9, 4  ;;  %v4278_v39 = vrot.slane %v3424_v21, 4  ;;  %v9053_v21 = vld [vmem:[#allocation41_spill] sm:$0xff] }
 0x307   :  { %v4284_v16 = vrot.slane %v3432_v4, 4  ;;  %v3464_v18 = vpack.i.b16 %v3463_v61, %v3462_v30  ;;  %v4306_v2 = vrot.slane %v3452_v27, 4  ;;  %v4312_v55 = vrot.slane %v3460_v12, 4  ;;  %v9056_v4 = vld [vmem:[#allocation40_spill] sm:$0xff] }
 0x308   :  { %v4251_v58 = vsel %vm650_vm1, %v4250_v1, %v3404_v56  ;;  %v4257_v13 = vsel %vm650_vm1, %v4256_v24, %v3412_v44  ;;  %v4279_v35 = vsel %vm650_vm1, %v4278_v39, %v3408_v15  ;;  %v4334_v29 = vrot.slane %v3456_v7, 4  ;;  %v9059_v7 = vld [vmem:[#allocation42_spill] sm:$0xff] }
 0x309   :  { %v8007_v49 = vperm.slane %v4251_v58, %v5763_v60  ;;  %v4285_v36 = vsel %vm650_vm1, %v4284_v16, %v3416_v22  ;;  %v8013_v57 = vperm.slane %v4257_v13, %v5763_v60  ;;  %v8016_v23 = vperm.slane %v4279_v35, %v5763_v60  ;;  %v9052_v22 = vld [vmem:[#allocation39_spill] sm:$0xff] }
 0x30a   :  { %v8019_v3 = vperm.slane %v4285_v36, %v5763_v60  ;;  %v4307_v56 = vsel %vm650_vm1, %v4306_v2, %v3436_v31  ;;  %v4313_v44 = vsel %vm650_vm1, %v4312_v55, %v3444_v46  ;;  %v4340_v15 = vrot.slane %v3464_v18, 4  ;;  %v9061_v36 = vld [vmem:[#allocation69_spill] sm:$0xff] }
 0x30b   :  { %v8023_v17 = vperm.slane %v4307_v56, %v5763_v60  ;;  %v4262_v28 = vrot.slane %v8013_v57, 4  ;;  %v8029_v9 = vperm.slane %v4313_v44, %v5763_v60  ;;  %v8033_v37 = vperm.slane %v9052_v22, %v5783_v14 }
 0x30c   :  { %v4290_v6 = vrot.slane %v8019_v3, 4  ;;  %v4335_v59 = vsel %vm650_vm1, %v4334_v29, %v3440_v20  ;;  %v4341_v31 = vsel %vm650_vm1, %v4340_v15, %v3448_v11  ;;  %v2754_v19 = vrot.slane %v9053_v21, 4 }
 0x30d   :  { %v9055_v46 = vrot.slane %v9054_v47, 4  ;;  %v4263_v0 = vsel %vm650_vm1, %v4262_v28, %v8007_v49  ;;  %v4318_v52 = vrot.slane %v8029_v9, 4  ;;  %v8048_v43 = vperm.slane %v4335_v59, %v5763_v60  ;;  %v9065_v47 = vld [vmem:[#allocation71_spill] sm:$0xff] }
 0x30e   :  { %v4291_v27 = vsel %vm650_vm1, %v4290_v6, %v8016_v23  ;;  %v8051_v20 = vperm.slane %v4263_v0, %v5783_v14  ;;  %v8057_v11 = vperm.slane %v4341_v31, %v5763_v60  ;;  %v8060_v30 = vsel %vm650_vm1, 0, %v2754_v19  ;;  %v9063_v6 = vld [vmem:[#allocation68_spill] sm:$0xff]  ;;  %v9066_v0 = vld [vmem:[#allocation70_spill] sm:$0xff] }
 0x30f   :  { %v2773_v33 = vsel %vm650_vm1, %v9056_v4, %v9055_v46  ;;  %v8054_v12 = vperm.slane %v4291_v27, %v5783_v14  ;;  %v4319_v61 = vsel %vm650_vm1, %v4318_v52, %v8023_v17  ;;  %v2756_v1 = vrot.slane %v8033_v37, 4 }
 0x310   :  { %9057 = vst [vmem:[#allocation53_spill] sm:$0xff] %v8051_v20  ;;  %v8067_v24 = vperm.slane %v9059_v7, %v5783_v14  ;;  %v2781_v39 = vperm.slane %v2773_v33, %v5783_v14  ;;  %v8071_v16 = vperm.slane %v4319_v61, %v5783_v14  ;;  %v4346_v18 = vrot.slane %v8057_v11, 4 }
 0x311   :  { %9058 = vst [vmem:[#allocation57_spill] sm:$0xff] %v8054_v12  ;;  %v4701_v58 = vshrl.u32 %v8051_v20, 16  ;;  %v4702_v2 = vshrl.u32 %v8054_v12, 16  ;;  %v2757_v55 = vsel %vm650_vm1, 0, %v2756_v1  ;;  %v9062_v56 = vrot.slane %v9061_v36, 4 }
 0x312   :  { %9060 = vst [vmem:[#allocation54_spill] sm:$0xff] %v8071_v16  ;;  %v2782_v13 = vrot.slane %v8067_v24, 4  ;;  %v2784_v35 = vrot.slane %v2781_v39, 4  ;;  %v4347_v29 = vsel %vm650_vm1, %v4346_v18, %v8048_v43  ;;  %v4725_v28 = vshrl.u32 %v8071_v16, 16 }
 0x313   :  { %v8081_v44 = vsel %vm650_vm1, 0, %v9062_v56  ;;  %v4703_v15 = vpack.i.b16 %v4702_v2, %v4701_v58  ;;  %v2812_v22 = vrot.slane %v9063_v6, 4  ;;  %v8088_v59 = vperm.slane %v4347_v29, %v5783_v14 }
 0x314   :  { %v2783_v31 = vsel %vm650_vm1, 0, %v2782_v13  ;;  %v2785_v19 = vsel %vm650_vm1, 0, %v2784_v35  ;;  %v2838_v46 = vrot.slane %v9065_v47, 4  ;;  %v2840_v27 = vrot.slane %v9066_v0, 4 }
 0x315   :  { %9064 = vst [vmem:[#allocation49_spill] sm:$0xff] %v8088_v59  ;;  %v4784_v4 = vunpack.c.l.b16 %v4703_v15  ;;  %v2813_v33 = vsel %vm650_vm1, 0, %v2812_v22  ;;  %v3340_v52 = vpack.i.b16 %v8067_v24, %v9053_v21  ;;  %v4726_v61 = vshrl.u32 %v8088_v59, 16 }
 0x316   :  { %v2839_v1 = vsel %vm650_vm1, 0, %v2838_v46  ;;  %v3342_v7 = vshrl.u32 %v9053_v21, 16  ;;  %v3343_v18 = vshrl.u32 %v8067_v24, 16  ;;  %v2841_v58 = vsel %vm650_vm1, 0, %v2840_v27 }
 0x317   :  { %v3348_v2 = vpack.i.b16 %v2783_v31, %v8060_v30  ;;  %v3350_v13 = vshrl.u32 %v8060_v30, 16  ;;  %v3351_v35 = vshrl.u32 %v2783_v31, 16  ;;  %v4727_v56 = vpack.i.b16 %v4726_v61, %v4725_v28 }
 0x318   :  { %v3344_v29 = vpack.i.b16 %v3343_v18, %v3342_v7  ;;  %v3356_v15 = vpack.i.b16 %v2781_v39, %v8033_v37  ;;  %v3358_v22 = vshrl.u32 %v8033_v37, 16  ;;  %v3359_v63 = vshrl.u32 %v2781_v39, 16 }
 0x319   :  { %v3352_v26 = vpack.i.b16 %v3351_v35, %v3350_v13  ;;  %v3364_v46 = vpack.i.b16 %v2785_v19, %v2757_v55  ;;  %v3366_v32 = vshrl.u32 %v2757_v55, 16  ;;  %v4785_v21 = vunpack.c.l.b16 %v4727_v56 }
 0x31a   :  { %v3367_v42 = vshrl.u32 %v2785_v19, 16  ;;  %v3372_v24 = vpack.i.b16 %v9065_v47, %v9061_v36  ;;  %v3374_v27 = vshrl.u32 %v9061_v36, 16  ;;  %v3360_v62 = vpack.i.b16 %v3359_v63, %v3358_v22 }
 0x31b   :  { %v3375_v30 = vshrl.u32 %v9065_v47, 16  ;;  %v3380_v28 = vpack.i.b16 %v2839_v1, %v8081_v44  ;;  %v3382_v31 = vshrl.u32 %v8081_v44, 16  ;;  %v4793_v61 = vpack.c.b16 %v4785_v21, %v4784_v4 }
 0x31c   :  { %v3368_v37 = vpack.i.b16 %v3367_v42, %v3366_v32  ;;  %v3383_v7 = vshrl.u32 %v2839_v1, 16  ;;  %v3388_v39 = vpack.i.b16 %v9066_v0, %v9063_v6  ;;  %v3390_v19 = vshrl.u32 %v9063_v6, 16 }
 0x31d   :  { %v3376_v55 = vpack.i.b16 %v3375_v30, %v3374_v27  ;;  %v3391_v18 = vshrl.u32 %v9066_v0, 16  ;;  %v3396_v13 = vpack.i.b16 %v2841_v58, %v2813_v33  ;;  %4808 = vrot.lane.b32.xlu2 %v4793_v61, %s5546_s24  ;;  %v3398_v36 = vshrl.u32 %v2813_v33, 16 }
 0x31e   :  { %v3384_v63 = vpack.i.b16 %v3383_v7, %v3382_v31  ;;  %v3399_v47 = vshrl.u32 %v2841_v58, 16  ;;  %v4138_v35 = vrot.slane %v3356_v15, 4  ;;  %v4144_v44 = vrot.slane %v3364_v46, 4 }
 0x31f   :  { %v3392_v56 = vpack.i.b16 %v3391_v18, %v3390_v19  ;;  %v4166_v4 = vrot.slane %v3360_v62, 4  ;;  %v4172_v42 = vrot.slane %v3368_v37, 4  ;;  %v4194_v22 = vrot.slane %v3388_v39, 4 }
 0x320   :  { %v3400_v32 = vpack.i.b16 %v3399_v47, %v3398_v36  ;;  %v4139_v1 = vsel %vm650_vm1, %v4138_v35, %v3340_v52  ;;  %v4200_v21 = vrot.slane %v3396_v13, 4  ;;  %v4145_v0 = vsel %vm650_vm1, %v4144_v44, %v3348_v2 }
 0x321   :  { %v8119_v6 = vperm.slane %v4139_v1, %v5763_v60  ;;  %v4167_v27 = vsel %vm650_vm1, %v4166_v4, %v3344_v29  ;;  %v4173_v33 = vsel %vm650_vm1, %v4172_v42, %v3352_v26  ;;  %v8125_v58 = vperm.slane %v4145_v0, %v5763_v60 }
 0x322   :  { %v8128_v62 = vperm.slane %v4167_v27, %v5763_v60  ;;  %v8131_v15 = vperm.slane %v4173_v33, %v5763_v60  ;;  %v4195_v52 = vsel %vm650_vm1, %v4194_v22, %v3372_v24  ;;  %v4201_v2 = vsel %vm650_vm1, %v4200_v21, %v3380_v28 }
 0x323   :  { %v8135_v46 = vperm.slane %v4195_v52, %v5763_v60  ;;  %v4222_v30 = vrot.slane %v3392_v56, 4  ;;  %v4228_v29 = vrot.slane %v3400_v32, 4  ;;  %v4150_v26 = vrot.slane %v8125_v58, 4 }
 0x324   :  { %v4178_v31 = vrot.slane %v8131_v15, 4  ;;  %v8141_v61 = vperm.slane %v4201_v2, %v5763_v60  ;;  %v4274_v37 = vrot.slane %v8051_v20, 4  ;;  %v4302_v39 = vrot.slane %v8054_v12, 4 }
 0x325   :  { %v4223_v7 = vsel %vm650_vm1, %v4222_v30, %v3376_v55  ;;  %v4229_v24 = vsel %vm650_vm1, %v4228_v29, %v3384_v63  ;;  %v4330_v19 = vrot.slane %v8071_v16, 4  ;;  %v4151_v28 = vsel %vm650_vm1, %v4150_v26, %v8119_v6 }
 0x326   :  { %v4179_v18 = vsel %vm650_vm1, %v4178_v31, %v8128_v62  ;;  %v4206_v13 = vrot.slane %v8141_v61, 4  ;;  %v8154_v36 = vperm.slane %v4223_v7, %v5763_v60  ;;  %v8157_v47 = vperm.slane %v4151_v28, %v5783_v14 }
 0x327   :  { %v8160_v55 = vperm.slane %v4179_v18, %v5783_v14  ;;  %v8163_v63 = vperm.slane %v4229_v24, %v5763_v60  ;;  %v4275_v35 = vsel %vm650_vm1, 0, %v4274_v37  ;;  %v4303_v44 = vsel %vm650_vm1, 0, %v4302_v39 }
 0x328   :  { %9067 = vst [vmem:[#allocation56_spill] sm:$0xff] %v8157_v47  ;;  %v4207_v56 = vsel %vm650_vm1, %v4206_v13, %v8135_v46  ;;  %v4331_v4 = vsel %vm650_vm1, 0, %v4330_v19  ;;  %v4358_v42 = vrot.slane %v8088_v59, 4  ;;  %v4653_v22 = vshrl.u32 %v8157_v47, 16 }
 0x329   :  { %9068 = vst [vmem:[#allocation52_spill] sm:$0xff] %v8160_v55  ;;  %v8172_v32 = vperm.slane %v4207_v56, %v5783_v14  ;;  %v4234_v1 = vrot.slane %v8163_v63, 4  ;;  %v4654_v21 = vshrl.u32 %v8160_v55, 16  ;;  %v4162_v0 = vrot.slane %v8157_v47, 4 }
 0x32a   :  { %v4190_v27 = vrot.slane %v8160_v55, 4  ;;  %v4359_v33 = vsel %vm650_vm1, 0, %v4358_v42  ;;  %v4706_v52 = vpack.i.b16 %v4303_v44, %v4275_v35  ;;  %v4707_v12 = vshrl.u32 %v4275_v35, 16 }
 0x32b   :  { %9069 = vst [vmem:[#allocation58_spill] sm:$0xff] %v8172_v32  ;;  %v4235_v2 = vsel %vm650_vm1, %v4234_v1, %v8154_v36  ;;  %v4655_v30 = vpack.i.b16 %v4654_v21, %v4653_v22  ;;  %v4677_v29 = vshrl.u32 %v8172_v32, 16  ;;  %v4218_v26 = vrot.slane %v8172_v32, 4 }
 0x32c   :  { %v8185_v31 = vperm.slane %v4235_v2, %v5783_v14  ;;  %v4163_v37 = vsel %vm650_vm1, 0, %v4162_v0  ;;  %v4191_v7 = vsel %vm650_vm1, 0, %v4190_v27  ;;  %v4730_v24 = vpack.i.b16 %v4359_v33, %v4331_v4 }
 0x32d   :  { %v4782_v39 = vunpack.c.l.b16 %v4655_v30  ;;  %v4219_v19 = vsel %vm650_vm1, 0, %v4218_v26  ;;  %v4658_v28 = vpack.i.b16 %v4191_v7, %v4163_v37  ;;  %v4659_v18 = vshrl.u32 %v4163_v37, 16 }
 0x32e   :  { %9070 = vst [vmem:[#allocation59_spill] sm:$0xff] %v8185_v31  ;;  %v4678_v13 = vshrl.u32 %v8185_v31, 16  ;;  %v4246_v56 = vrot.slane %v8185_v31, 4  ;;  %v4660_v42 = vshrl.u32 %v4191_v7, 16  ;;  %v4683_v1 = vshrl.u32 %v4219_v19, 16 }
 0x32f   :  { %v4822_v22 = vunpack.c.l.b16 %v4658_v28  ;;  %v4824_v21 = vunpack.c.l.b16 %v4706_v52  ;;  %v4825_v2 = vunpack.c.l.b16 %v4730_v24  ;;  %v4708_v59 = vshrl.u32 %v4303_v44, 16 }
 0x330   :  { %v4679_v20 = vpack.i.b16 %v4678_v13, %v4677_v29  ;;  %v4247_v0 = vsel %vm650_vm1, 0, %v4246_v56  ;;  %v4661_v27 = vpack.i.b16 %v4660_v42, %v4659_v18  ;;  %v4731_v55 = vshrl.u32 %v4331_v4, 16 }
 0x331   :  { %v4682_v30 = vpack.i.b16 %v4247_v0, %v4219_v19  ;;  %v4684_v16 = vshrl.u32 %v4247_v0, 16  ;;  %v4833_v26 = vpack.c.b16 %v4825_v2, %v4824_v21  ;;  %v4709_v32 = vpack.i.b16 %v4708_v59, %v4707_v12 }
 0x332   :  { %v4783_v37 = vunpack.c.l.b16 %v4679_v20  ;;  %v4862_v47 = vunpack.c.l.b16 %v4661_v27  ;;  %v4732_v53 = vshrl.u32 %v4359_v33, 16  ;;  %v4264_v28 = vrot.slane %v8007_v49, 4 }
 0x333   :  { %v4823_v31 = vunpack.c.l.b16 %v4682_v30  ;;  %v4685_v7 = vpack.i.b16 %v4684_v16, %v4683_v1  ;;  %v4292_v52 = vrot.slane %v8016_v23, 4  ;;  %v4864_v24 = vunpack.c.l.b16 %v4709_v32 }
 0x334   :  { %v4792_v35 = vpack.c.b16 %v4783_v37, %v4782_v39  ;;  %v4733_v29 = vpack.i.b16 %v4732_v53, %v4731_v55  ;;  %v4320_v18 = vrot.slane %v8023_v17, 4  ;;  %v4265_v4 = vsel %vm650_vm1, %v8013_v57, %v4264_v28 }
 0x335   :  { %v4832_v44 = vpack.c.b16 %v4823_v31, %v4822_v22  ;;  %v4863_v19 = vunpack.c.l.b16 %v4685_v7  ;;  %v4293_v20 = vsel %vm650_vm1, %v8019_v3, %v4292_v52  ;;  %v8202_v49 = vperm.slane %v4265_v4, %v5783_v14 }
 0x336   :  { %4806 = vrot.lane.b32.xlu1 %v4792_v35, %s5546_s24  ;;  %v4865_v12 = vunpack.c.l.b16 %v4733_v29  ;;  %v8205_v23 = vperm.slane %v4293_v20, %v5783_v14  ;;  %v4321_v53 = vsel %vm650_vm1, %v8029_v9, %v4320_v18  ;;  %v4348_v3 = vrot.slane %v8048_v43, 4 }
 0x337   :  { %4846 = vrot.lane.b32.xlu0 %v4832_v44, %s5566_s29  ;;  %v4872_v17 = vpack.c.b16 %v4863_v19, %v4862_v47  ;;  %v8211_v57 = vperm.slane %v4321_v53, %v5783_v14  ;;  %v4152_v16 = vrot.slane %v8119_v6, 4  ;;  %v4180_v32 = vrot.slane %v8128_v62, 4 }
 0x338   :  { %v4873_v59 = vpack.c.b16 %v4865_v12, %v4864_v24  ;;  %v4712_v55 = vpack.i.b16 %v8205_v23, %v8202_v49  ;;  %v4208_v33 = vrot.slane %v8135_v46, 4  ;;  %v4349_v9 = vsel %vm650_vm1, %v8057_v11, %v4348_v3 }
 0x339   :  { %4886 = vrot.lane.b32.xlu2 %v4872_v17, %s5567_s30  ;;  %v4153_v47 = vsel %vm650_vm1, %v8125_v58, %v4152_v16  ;;  %v4236_v43 = vrot.slane %v8154_v36, 4  ;;  %v4713_v6 = vshrl.u32 %v8202_v49, 16  ;;  %v4357_v31 = vperm.slane %v4349_v9, %v5783_v14 }
 0x33a   :  { %v4904_v39 = vunpack.c.l.b16 %v4712_v55  ;;  %v4161_v13 = vperm.slane %v4153_v47, %v5783_v14  ;;  %v4181_v62 = vsel %vm650_vm1, %v8131_v15, %v4180_v32  ;;  %v4209_v11 = vsel %vm650_vm1, %v8141_v61, %v4208_v33 }
 0x33b   :  { %v4189_v46 = vperm.slane %v4181_v62, %v5783_v14  ;;  %v4237_v58 = vsel %vm650_vm1, %v8163_v63, %v4236_v43  ;;  %v4714_v36 = vshrl.u32 %v8205_v23, 16  ;;  %v4736_v56 = vpack.i.b16 %v4357_v31, %v8211_v57 }
 0x33c   :  { %v4217_v42 = vperm.slane %v4209_v11, %v5783_v14  ;;  %v4245_v1 = vperm.slane %v4237_v58, %v5783_v14  ;;  %v4665_v22 = vshrl.u32 %v4161_v13, 16  ;;  %v4164_v15 = vrot.slane %v4161_v13, 4 }
 0x33d   :  { %v4664_v21 = vpack.i.b16 %v4189_v46, %v4161_v13  ;;  %v4666_v2 = vshrl.u32 %v4189_v46, 16  ;;  %v4192_v0 = vrot.slane %v4189_v46, 4  ;;  %v4905_v27 = vunpack.c.l.b16 %v4736_v56  ;;  %v9071_v13 = vld [vmem:[#allocation25_spill] sm:$0xff] }
 0x33e   :  { %4848 = vrot.lane.b32.xlu1 %v4833_v26, %s5566_s29  ;;  %v4688_v61 = vpack.i.b16 %v4245_v1, %v4217_v42  ;;  %v4689_v30 = vshrl.u32 %v4217_v42, 16  ;;  %v4690_v37 = vshrl.u32 %v4245_v1, 16  ;;  %v8242_v28 = vsel %vm650_vm1, 0, %v4164_v15 }
 0x33f   :  { %4888 = vrot.lane.b32.xlu0 %v4873_v59, %s5567_s30  ;;  %v4902_v63 = vunpack.c.l.b16 %v4664_v21  ;;  %v4667_v7 = vpack.i.b16 %v4666_v2, %v4665_v22  ;;  %v8245_v52 = vsel %vm650_vm1, 0, %v4192_v0  ;;  %v4913_v35 = vpack.c.b16 %v4905_v27, %v4904_v39  ;;  %v9073_v0 = vld [vmem:[#allocation24_spill] sm:$0xff] }
 0x340   :  { %v4903_v29 = vunpack.c.l.b16 %v4688_v61  ;;  %v4691_v24 = vpack.i.b16 %v4690_v37, %v4689_v30  ;;  %v4220_v18 = vrot.slane %v4217_v42, 4  ;;  %v4248_v26 = vrot.slane %v4245_v1, 4  ;;  %v9075_v61 = vld [vmem:[#allocation26_spill] sm:$0xff]  ;;  %v9076_v37 = vld [vmem:[#allocation28_spill] sm:$0xff] }
 0x341   :  { %v4942_v44 = vunpack.c.l.b16 %v4667_v7  ;;  %v4670_v19 = vpack.i.b16 %v8245_v52, %v8242_v28  ;;  %v4715_v4 = vpack.i.b16 %v4714_v36, %v4713_v6  ;;  %4928 = vrot.lane.b32.xlu2 %v4913_v35, %s5568_s2  ;;  %v4737_v17 = vshrl.u32 %v8211_v57, 16 }
 0x342   :  { %v4912_v20 = vpack.c.b16 %v4903_v29, %v4902_v63  ;;  %v4943_v12 = vunpack.c.l.b16 %v4691_v24  ;;  %v8251_v53 = vsel %vm650_vm1, 0, %v4220_v18  ;;  %v8255_v3 = vsel %vm650_vm1, 0, %v4248_v26 }
 0x343   :  { %v4982_v16 = vunpack.c.l.b16 %v4670_v19  ;;  %v4738_v59 = vshrl.u32 %v4357_v31, 16  ;;  %v4944_v55 = vunpack.c.l.b16 %v4715_v4  ;;  %v4694_v33 = vpack.i.b16 %v8255_v3, %v8251_v53 }
 0x344   :  { %v4952_v32 = vpack.c.b16 %v4943_v12, %v4942_v44  ;;  %v4276_v9 = vrot.slane %v8202_v49, 4  ;;  %v4304_v47 = vrot.slane %v8205_v23, 4  ;;  %v4332_v6 = vrot.slane %v8211_v57, 4  ;;  %v9072_v49 = vld [vmem:[#allocation27_spill] sm:$0xff] }
 0x345   :  { %v4739_v43 = vpack.i.b16 %v4738_v59, %v4737_v17  ;;  %v4360_v39 = vrot.slane %v4357_v31, 4  ;;  %v8264_v62 = vperm.slane %v9071_v13, %v5783_v14  ;;  %v4983_v46 = vunpack.c.l.b16 %v4694_v33 }
 0x346   :  { %4926 = vrot.lane.b32.xlu1 %v4912_v20, %s5568_s2  ;;  %v8268_v11 = vsel %vm650_vm1, 0, %v4276_v9  ;;  %v8271_v58 = vsel %vm650_vm1, 0, %v4304_v47  ;;  %v2642_v36 = vrot.slane %v9072_v49, 4  ;;  %v8276_v57 = vsel %vm650_vm1, 0, %v4332_v6 }
 0x347   :  { %4966 = vrot.lane.b32.xlu0 %v4952_v32, %s5569_s5  ;;  %v4945_v23 = vunpack.c.l.b16 %v4739_v43  ;;  %v8279_v31 = vsel %vm650_vm1, 0, %v4360_v39  ;;  %v4718_v56 = vpack.i.b16 %v8271_v58, %v8268_v11  ;;  %v4992_v42 = vpack.c.b16 %v4983_v46, %v4982_v16 }
 0x348   :  { %v4742_v1 = vpack.i.b16 %v8279_v31, %v8276_v57  ;;  %v8286_v22 = vsel %vm650_vm1, 0, %v2642_v36  ;;  %v2644_v21 = vrot.slane %v8264_v62, 4  ;;  %v9074_v27 = vrot.slane %v9073_v0, 4 }
 0x349   :  { %v4953_v2 = vpack.c.b16 %v4945_v23, %v4944_v55  ;;  %v4984_v15 = vunpack.c.l.b16 %v4718_v56  ;;  %v8295_v63 = vperm.slane %v9076_v37, %v5783_v14  ;;  %5006 = vrot.lane.b32.xlu2 %v4992_v42, %s5570_s6  ;;  %v2697_v24 = vperm.slane %v7869_v25, %v5783_v14 }
 0x34a   :  { %v2661_v30 = vsel %vm650_vm1, %v9075_v61, %v9074_v27  ;;  %v4985_v7 = vunpack.c.l.b16 %v4742_v1  ;;  %v2645_v35 = vsel %vm650_vm1, 0, %v2644_v21  ;;  %v2698_v44 = vrot.slane %v7880_v41, 4 }
 0x34b   :  { %v2669_v29 = vperm.slane %v2661_v30, %v5783_v14  ;;  %v2670_v18 = vrot.slane %v8295_v63, 4  ;;  %v9077_v26 = vrot.slane %v7862_v40, 4  ;;  %v8310_v4 = vperm.slane %v7890_v54, %v5783_v14 }
 0x34c   :  { %v4993_v20 = vpack.c.b16 %v4985_v7, %v4984_v15  ;;  %v2700_v17 = vrot.slane %v2697_v24, 4  ;;  %v2699_v59 = vsel %vm650_vm1, 0, %v2698_v44  ;;  %v3276_v40 = vpack.i.b16 %v8295_v63, %v9072_v49 }
 0x34d   :  { %v2717_v19 = vsel %vm650_vm1, %v7872_v10, %v9077_v26  ;;  %v2672_v12 = vrot.slane %v2669_v29, 4  ;;  %v2671_v25 = vsel %vm650_vm1, 0, %v2670_v18  ;;  %v2726_v55 = vrot.slane %v8310_v4, 4 }
 0x34e   :  { %v2725_v16 = vperm.slane %v2717_v19, %v5783_v14  ;;  %4968 = vrot.lane.b32.xlu1 %v4953_v2, %s5569_s5  ;;  %v2701_v54 = vsel %vm650_vm1, 0, %v2700_v17  ;;  %v3278_v33 = vshrl.u32 %v9072_v49, 16  ;;  %v3279_v47 = vshrl.u32 %v8295_v63, 16 }
 0x34f   :  { %v2673_v10 = vsel %vm650_vm1, 0, %v2672_v12  ;;  %5008 = vrot.lane.b32.xlu0 %v4993_v20, %s5570_s6  ;;  %v2727_v9 = vsel %vm650_vm1, 0, %v2726_v55  ;;  %v3284_v43 = vpack.i.b16 %v2671_v25, %v8286_v22  ;;  %v3286_v6 = vshrl.u32 %v8286_v22, 16 }
 0x350   :  { %v2728_v32 = vrot.slane %v2725_v16, 4  ;;  %v3287_v13 = vshrl.u32 %v2671_v25, 16  ;;  %v3292_v46 = vpack.i.b16 %v2669_v29, %v8264_v62  ;;  %v3294_v36 = vshrl.u32 %v8264_v62, 16 }
 0x351   :  { %v3280_v23 = vpack.i.b16 %v3279_v47, %v3278_v33  ;;  %v3295_v56 = vshrl.u32 %v2669_v29, 16  ;;  %v3300_v49 = vpack.i.b16 %v2673_v10, %v2645_v35  ;;  %v3302_v42 = vshrl.u32 %v2645_v35, 16 }
 0x352   :  { %v2729_v39 = vsel %vm650_vm1, 0, %v2728_v32  ;;  %v3288_v1 = vpack.i.b16 %v3287_v13, %v3286_v6  ;;  %v3303_v21 = vshrl.u32 %v2673_v10, 16  ;;  %v3308_v2 = vpack.i.b16 %v8310_v4, %v7880_v41 }
 0x353   :  { %v3310_v15 = vshrl.u32 %v7880_v41, 16  ;;  %v3296_v0 = vpack.i.b16 %v3295_v56, %v3294_v36  ;;  %v3311_v22 = vshrl.u32 %v8310_v4, 16  ;;  %v3316_v27 = vpack.i.b16 %v2727_v9, %v2699_v59 }
 0x354   :  { %v3318_v61 = vshrl.u32 %v2699_v59, 16  ;;  %v3304_v30 = vpack.i.b16 %v3303_v21, %v3302_v42  ;;  %v3319_v37 = vshrl.u32 %v2727_v9, 16  ;;  %v3324_v63 = vpack.i.b16 %v2725_v16, %v2697_v24 }
 0x355   :  { %v3326_v62 = vshrl.u32 %v2697_v24, 16  ;;  %v3312_v7 = vpack.i.b16 %v3311_v22, %v3310_v15  ;;  %v3327_v29 = vshrl.u32 %v2725_v16, 16  ;;  %v3332_v18 = vpack.i.b16 %v2729_v39, %v2701_v54  ;;  %v9080_v15 = vld [vmem:[#allocation19_spill] sm:$0xff]  ;;  %v9082_v22 = vld [vmem:[#allocation20_spill] sm:$0xff] }
 0x356   :  { %v3334_v35 = vshrl.u32 %v2701_v54, 16  ;;  %v3320_v44 = vpack.i.b16 %v3319_v37, %v3318_v61  ;;  %v3335_v26 = vshrl.u32 %v2729_v39, 16  ;;  %v4026_v19 = vrot.slane %v3292_v46, 4 }
 0x357   :  { %v4032_v20 = vrot.slane %v3300_v49, 4  ;;  %v3328_v12 = vpack.i.b16 %v3327_v29, %v3326_v62  ;;  %v4054_v17 = vrot.slane %v3296_v0, 4  ;;  %v4060_v41 = vrot.slane %v3304_v30, 4  ;;  %v9079_v49 = vld [vmem:[#allocation22_spill] sm:$0xff]  ;;  %v8382_v62 = vpop.permute.xlu2 %4838 }
 0x358   :  { %v4082_v25 = vrot.slane %v3324_v63, 4  ;;  %v3336_v55 = vpack.i.b16 %v3335_v26, %v3334_v35  ;;  %v4027_v4 = vsel %vm650_vm1, %v4026_v19, %v3276_v40  ;;  %v4088_v10 = vrot.slane %v3332_v18, 4 }
 0x359   :  { %v4033_v59 = vsel %vm650_vm1, %v4032_v20, %v3284_v43  ;;  %v8337_v24 = vperm.slane %v4027_v4, %v5763_v60  ;;  %v4055_v54 = vsel %vm650_vm1, %v4054_v17, %v3280_v23  ;;  %v4061_v32 = vsel %vm650_vm1, %v4060_v41, %v3288_v1  ;;  %v9078_v23 = vld [vmem:[#allocation21_spill] sm:$0xff]  ;;  %v9083_v20 = vld [vmem:[#allocation23_spill] sm:$0xff] }
 0x35a   :  { %v8340_v16 = vperm.slane %v4033_v59, %v5763_v60  ;;  %v8345_v33 = vperm.slane %v4055_v54, %v5763_v60  ;;  %v8348_v9 = vperm.slane %v4061_v32, %v5763_v60  ;;  %v4083_v40 = vsel %vm650_vm1, %v4082_v25, %v3308_v2 }
 0x35b   :  { %v4089_v47 = vsel %vm650_vm1, %v4088_v10, %v3316_v27  ;;  %v8354_v6 = vperm.slane %v4083_v40, %v5763_v60  ;;  %v4110_v13 = vrot.slane %v3328_v12, 4  ;;  %v4116_v36 = vrot.slane %v3336_v55, 4 }
 0x35c   :  { %v4038_v43 = vrot.slane %v8340_v16, 4  ;;  %v8357_v39 = vperm.slane %v4089_v47, %v5763_v60  ;;  %v4066_v46 = vrot.slane %v8348_v9, 4  ;;  %v8362_v56 = vperm.slane %v9078_v23, %v5783_v14 }
 0x35d   :  { %v2530_v42 = vrot.slane %v9079_v49, 4  ;;  %v4111_v2 = vsel %vm650_vm1, %v4110_v13, %v3312_v7  ;;  %v9081_v0 = vrot.slane %v9080_v15, 4  ;;  %v4117_v63 = vsel %vm650_vm1, %v4116_v36, %v3320_v44 }
 0x35e   :  { %v4039_v1 = vsel %vm650_vm1, %v4038_v43, %v8337_v24  ;;  %v4094_v21 = vrot.slane %v8357_v39, 4  ;;  %v4067_v30 = vsel %vm650_vm1, %v4066_v46, %v8345_v33  ;;  %v8379_v37 = vperm.slane %v4111_v2, %v5763_v60 }
 0x35f   :  { %v2549_v27 = vsel %vm650_vm1, %v9082_v22, %v9081_v0  ;;  %v8374_v61 = vperm.slane %v4039_v1, %v5783_v14  ;;  %v8385_v7 = vperm.slane %v4067_v30, %v5783_v14  ;;  %v8390_v18 = vperm.slane %v4117_v63, %v5763_v60 }
 0x360   :  { %v4095_v29 = vsel %vm650_vm1, %v4094_v21, %v8354_v6  ;;  %v8393_v35 = vsel %vm650_vm1, 0, %v2530_v42  ;;  %v2532_v44 = vrot.slane %v8362_v56, 4  ;;  %v8402_v12 = vperm.slane %v9083_v20, %v5783_v14  ;;  %v8436_v20 = vpop.permute.xlu0 %4798 }
 0x361   :  { %v8396_v26 = vperm.slane %v4095_v29, %v5783_v14  ;;  %v4605_v19 = vshrl.u32 %v8374_v61, 16  ;;  %v4122_v17 = vrot.slane %v8390_v18, 4  ;;  %v4606_v41 = vshrl.u32 %v8385_v7, 16 }
 0x362   :  { %v2557_v25 = vperm.slane %v2549_v27, %v5783_v14  ;;  %v9084_v55 = vrot.slane %v7827_v50, 4  ;;  %v2533_v10 = vsel %vm650_vm1, 0, %v2532_v44  ;;  %v2558_v54 = vrot.slane %v8402_v12, 4 }
 0x363   :  { %v4629_v59 = vshrl.u32 %v8396_v26, 16  ;;  %v2588_v32 = vrot.slane %v7820_v38, 4  ;;  %v4123_v40 = vsel %vm650_vm1, %v4122_v17, %v8379_v37  ;;  %v4607_v47 = vpack.i.b16 %v4606_v41, %v4605_v19 }
 0x364   :  { %v8410_v4 = vsel %vm650_vm1, 0, %v9084_v55  ;;  %v2560_v43 = vrot.slane %v2557_v25, 4  ;;  %v2614_v13 = vrot.slane %v7835_v8, 4  ;;  %v8420_v46 = vperm.slane %v4123_v40, %v5783_v14 }
 0x365   :  { %v2559_v36 = vsel %vm650_vm1, 0, %v2558_v54  ;;  %v2589_v23 = vsel %vm650_vm1, 0, %v2588_v32  ;;  %v2616_v42 = vrot.slane %v7831_v34, 4  ;;  %v4780_v1 = vunpack.c.l.b16 %v4607_v47  ;;  %v8439_v32 = vpop.permute.xlu2 %4880 }
 0x366   :  { %v2561_v21 = vsel %vm650_vm1, 0, %v2560_v43  ;;  %v2615_v2 = vsel %vm650_vm1, 0, %v2614_v13  ;;  %v3212_v15 = vpack.i.b16 %v8402_v12, %v9079_v49  ;;  %v4630_v0 = vshrl.u32 %v8420_v46, 16 }
 0x367   :  { %v2617_v22 = vsel %vm650_vm1, 0, %v2616_v42  ;;  %v3214_v27 = vshrl.u32 %v9079_v49, 16  ;;  %v3215_v30 = vshrl.u32 %v8402_v12, 16  ;;  %v3220_v63 = vpack.i.b16 %v2559_v36, %v8393_v35 }
 0x368   :  { %v3222_v29 = vshrl.u32 %v8393_v35, 16  ;;  %v3223_v19 = vshrl.u32 %v2559_v36, 16  ;;  %v3228_v44 = vpack.i.b16 %v2557_v25, %v8362_v56  ;;  %v4631_v17 = vpack.i.b16 %v4630_v0, %v4629_v59 }
 0x369   :  { %v3216_v41 = vpack.i.b16 %v3215_v30, %v3214_v27  ;;  %v3230_v55 = vshrl.u32 %v8362_v56, 16  ;;  %v3231_v54 = vshrl.u32 %v2557_v25, 16  ;;  %v3236_v49 = vpack.i.b16 %v2561_v21, %v2533_v10 }
 0x36a   :  { %v3224_v40 = vpack.i.b16 %v3223_v19, %v3222_v29  ;;  %v3238_v47 = vshrl.u32 %v2533_v10, 16  ;;  %v3239_v12 = vshrl.u32 %v2561_v21, 16  ;;  %v4781_v43 = vunpack.c.l.b16 %v4631_v17 }
 0x36b   :  { %v3232_v13 = vpack.i.b16 %v3231_v54, %v3230_v55  ;;  %v3244_v35 = vpack.i.b16 %v7835_v8, %v7827_v50  ;;  %v3246_v36 = vshrl.u32 %v7827_v50, 16  ;;  %v3247_v59 = vshrl.u32 %v7835_v8, 16 }
 0x36c   :  { %v3240_v42 = vpack.i.b16 %v3239_v12, %v3238_v47  ;;  %v3252_v0 = vpack.i.b16 %v2615_v2, %v8410_v4  ;;  %v3254_v56 = vshrl.u32 %v8410_v4, 16  ;;  %v4791_v25 = vpack.c.b16 %v4781_v43, %v4780_v1  ;;  %v8452_v47 = vpop.permute.xlu1 %4800 }
 0x36d   :  { %v3255_v27 = vshrl.u32 %v2615_v2, 16  ;;  %v3260_v10 = vpack.i.b16 %v7831_v34, %v7820_v38  ;;  %v3262_v21 = vshrl.u32 %v7820_v38, 16  ;;  %v3248_v30 = vpack.i.b16 %v3247_v59, %v3246_v36 }
 0x36e   :  { %v3263_v29 = vshrl.u32 %v7831_v34, 16  ;;  %v3268_v19 = vpack.i.b16 %v2617_v22, %v2589_v23  ;;  %v3270_v17 = vshrl.u32 %v2589_v23, 16  ;;  %4804 = vrot.lane.b32.xlu2 %v4791_v25, %s5546_s24  ;;  %v3271_v8 = vshrl.u32 %v2617_v22, 16 }
 0x36f   :  { %v3256_v50 = vpack.i.b16 %v3255_v27, %v3254_v56  ;;  %v3914_v55 = vrot.slane %v3228_v44, 4  ;;  %v3920_v54 = vrot.slane %v3236_v49, 4  ;;  %v3942_v1 = vrot.slane %v3232_v13, 4  ;;  %v8464_v49 = vpop.permute.xlu0 %4840  ;;  %v8474_v56 = vpop.permute.xlu2 %4958 }
 0x370   :  { %v3264_v4 = vpack.i.b16 %v3263_v29, %v3262_v21  ;;  %v3948_v2 = vrot.slane %v3240_v42, 4  ;;  %v3970_v12 = vrot.slane %v3260_v10, 4  ;;  %v3272_v43 = vpack.i.b16 %v3271_v8, %v3270_v17 }
 0x371   :  { %v3915_v38 = vsel %vm650_vm1, %v3914_v55, %v3212_v15  ;;  %v3921_v36 = vsel %vm650_vm1, %v3920_v54, %v3220_v63  ;;  %v3976_v34 = vrot.slane %v3268_v19, 4  ;;  %v3943_v22 = vsel %vm650_vm1, %v3942_v1, %v3216_v41 }
 0x372   :  { %v8457_v23 = vperm.slane %v3915_v38, %v5763_v60  ;;  %v8460_v59 = vperm.slane %v3921_v36, %v5763_v60  ;;  %v3949_v44 = vsel %vm650_vm1, %v3948_v2, %v3224_v40  ;;  %v8467_v13 = vperm.slane %v3943_v22, %v5763_v60 }
 0x373   :  { %v8470_v15 = vperm.slane %v3949_v44, %v5763_v60  ;;  %v3971_v63 = vsel %vm650_vm1, %v3970_v12, %v3244_v35  ;;  %v3977_v42 = vsel %vm650_vm1, %v3976_v34, %v3252_v0  ;;  %v3998_v27 = vrot.slane %v3264_v4, 4 }
 0x374   :  { %v3926_v25 = vrot.slane %v8460_v59, 4  ;;  %v8478_v41 = vperm.slane %v3971_v63, %v5763_v60  ;;  %v8481_v40 = vperm.slane %v3977_v42, %v5763_v60  ;;  %v4004_v21 = vrot.slane %v3272_v43, 4 }
 0x375   :  { %v3954_v10 = vrot.slane %v8470_v15, 4  ;;  %v4671_v29 = vshrl.u32 %v8242_v28, 16  ;;  %v4672_v35 = vshrl.u32 %v8245_v52, 16  ;;  %v3999_v17 = vsel %vm650_vm1, %v3998_v27, %v3248_v30  ;;  %v8500_v52 = vpop.permute.xlu1 %4878 }
 0x376   :  { %v3927_v0 = vsel %vm650_vm1, %v3926_v25, %v8457_v23  ;;  %v3982_v19 = vrot.slane %v8481_v40, 4  ;;  %v4695_v8 = vshrl.u32 %v8251_v53, 16  ;;  %v8497_v4 = vperm.slane %v3999_v17, %v5763_v60 }
 0x377   :  { %v8492_v55 = vperm.slane %v3927_v0, %v5783_v14  ;;  %v3955_v54 = vsel %vm650_vm1, %v3954_v10, %v8467_v13  ;;  %v4005_v28 = vsel %vm650_vm1, %v4004_v21, %v3256_v50  ;;  %v4673_v2 = vpack.i.b16 %v4672_v35, %v4671_v29  ;;  %v9088_v21 = vld [vmem:[#allocation30_spill] sm:$0xff]  ;;  %v9089_v29 = vld [vmem:[#allocation31_spill] sm:$0xff]  ;;  %v8531_v0 = vpop.permute.xlu0 %4918 }
 0x378   :  { %v8503_v1 = vperm.slane %v3955_v54, %v5783_v14  ;;  %v3983_v30 = vsel %vm650_vm1, %v3982_v19, %v8478_v41  ;;  %v8508_v53 = vperm.slane %v4005_v28, %v5763_v60  ;;  %v4696_v38 = vshrl.u32 %v8255_v3, 16 }
 0x379   :  { %9085 = vst [vmem:[#allocation47_spill] sm:$0xff] %v8492_v55  ;;  %v8511_v12 = vperm.slane %v3983_v30, %v5783_v14  ;;  %v4557_v43 = vshrl.u32 %v8492_v55, 16  ;;  %v3938_v50 = vrot.slane %v8492_v55, 4  ;;  %v5022_v22 = vunpack.c.l.b16 %v4673_v2  ;;  %v9091_v2 = vld [vmem:[#allocation61_spill] sm:$0xff]  ;;  %v9096_v55 = vld [vmem:[#allocation32_spill] sm:$0xff] }
 0x37a   :  { %9086 = vst [vmem:[#allocation48_spill] sm:$0xff] %v8503_v1  ;;  %v4010_v36 = vrot.slane %v8508_v53, 4  ;;  %v4558_v34 = vshrl.u32 %v8503_v1, 16  ;;  %v3966_v44 = vrot.slane %v8503_v1, 4  ;;  %v4697_v63 = vpack.i.b16 %v4696_v38, %v4695_v8 }
 0x37b   :  { %9087 = vst [vmem:[#allocation14_spill] sm:$0xff] %v8511_v12  ;;  %v4581_v60 = vshrl.u32 %v8511_v12, 16  ;;  %v8521_v42 = vsel %vm650_vm1, 0, %v3938_v50  ;;  %v3994_v25 = vrot.slane %v8511_v12, 4  ;;  %v4460_v35 = vpack.i.b16 %v9089_v29, %v9088_v21  ;;  %v8543_v50 = vpop.permute.xlu2 %5000 }
 0x37c   :  { %v4011_v3 = vsel %vm650_vm1, %v4010_v36, %v8497_v4  ;;  %v4559_v27 = vpack.i.b16 %v4558_v34, %v4557_v43  ;;  %v8527_v10 = vsel %vm650_vm1, 0, %v3966_v44  ;;  %v5023_v17 = vunpack.c.l.b16 %v4697_v63  ;;  %v9092_v43 = vld [vmem:[#allocation62_spill] sm:$0xff]  ;;  %9093 = vst [vmem:[#allocation16_spill] sm:$0xff] %v8543_v50 }
 0x37d   :  { %v8534_v19 = vperm.slane %v4011_v3, %v5783_v14  ;;  %v8537_v8 = vsel %vm650_vm1, 0, %v3994_v25  ;;  %v4562_v54 = vpack.i.b16 %v8527_v10, %v8521_v42  ;;  %v4750_v30 = vunpack.c.l.b16 %v4460_v35  ;;  %v8550_v29 = vpop.permute.xlu1 %4920 }
 0x37e   :  { %v4778_v28 = vunpack.c.l.b16 %v4559_v27  ;;  %v4484_v38 = vpack.i.b16 %v9092_v43, %v9091_v2  ;;  %v5032_v34 = vpack.c.b16 %v5023_v17, %v5022_v22  ;;  %v4719_v25 = vshrl.u32 %v8268_v11, 16  ;;  %v9094_v22 = vld [vmem:[#allocation43_spill] sm:$0xff]  ;;  %v9095_v17 = vld [vmem:[#allocation44_spill] sm:$0xff] }
 0x37f   :  { %9090 = vst [vmem:[#allocation15_spill] sm:$0xff] %v8534_v19  ;;  %v4582_v36 = vshrl.u32 %v8534_v19, 16  ;;  %v4022_v44 = vrot.slane %v8534_v19, 4  ;;  %v4818_v63 = vunpack.c.l.b16 %v4562_v54  ;;  %v4720_v21 = vshrl.u32 %v8271_v58, 16  ;;  %v9097_v58 = vld [vmem:[#allocation63_spill] sm:$0xff] }
 0x380   :  { %v4751_v3 = vunpack.c.l.b16 %v4484_v38  ;;  %v4743_v27 = vshrl.u32 %v8276_v57, 16  ;;  %5046 = vrot.lane.b32.xlu0 %v5032_v34, %s5571_s7  ;;  %v4744_v43 = vshrl.u32 %v8279_v31, 16  ;;  %v4508_v1 = vpack.i.b16 %v9095_v17, %v9094_v22 }
 0x381   :  { %v4583_v35 = vpack.i.b16 %v4582_v36, %v4581_v60  ;;  %v4023_v2 = vsel %vm650_vm1, 0, %v4022_v44  ;;  %v4721_v11 = vpack.i.b16 %v4720_v21, %v4719_v25  ;;  %v4532_v19 = vpack.i.b16 %v9097_v58, %v9096_v55 }
 0x382   :  { %v4586_v54 = vpack.i.b16 %v4023_v2, %v8537_v8  ;;  %v4764_v38 = vpack.c.b16 %v4751_v3, %v4750_v30  ;;  %v4745_v12 = vpack.i.b16 %v4744_v43, %v4743_v27  ;;  %v4752_v50 = vunpack.c.l.b16 %v4508_v1  ;;  %v8565_v3 = vpop.permute.xlu0 %4960 }
 0x383   :  { %v4779_v57 = vunpack.c.l.b16 %v4583_v35  ;;  %v4050_v60 = vrot.slane %v8374_v61, 4  ;;  %v5024_v31 = vunpack.c.l.b16 %v4721_v11  ;;  %v4753_v44 = vunpack.c.l.b16 %v4532_v19  ;;  %v8576_v35 = vpop.permute.xlu2 %5038 }
 0x384   :  { %v4819_v36 = vunpack.c.l.b16 %v4586_v54  ;;  %v5059_v34 = vsel %vm5050_vm2, %v4764_v38, %v8436_v20  ;;  %v5025_v22 = vunpack.c.l.b16 %v4745_v12  ;;  %v4078_v30 = vrot.slane %v8385_v7, 4 }
 0x385   :  { %v4790_v5 = vpack.c.b16 %v4779_v57, %v4778_v28  ;;  %v4051_v17 = vsel %vm650_vm1, 0, %v4050_v60  ;;  %v4765_v25 = vpack.c.b16 %v4753_v44, %v4752_v50  ;;  %v4106_v1 = vrot.slane %v8396_v26, 4  ;;  %v8578_v11 = vpop.permute.xlu1 %4998 }
 0x386   :  { %v4830_v55 = vpack.c.b16 %v4819_v36, %v4818_v63  ;;  %v4134_v21 = vrot.slane %v8420_v46, 4  ;;  %v5033_v27 = vpack.c.b16 %v5025_v22, %v5024_v31  ;;  %v4079_v20 = vsel %vm650_vm1, 0, %v4078_v30 }
 0x387   :  { %4802 = vrot.lane.b32.xlu1 %v4790_v5, %s5546_s24  ;;  %v4611_v19 = vshrl.u32 %v4051_v17, 16  ;;  %v5062_v12 = vsel %vm5050_vm2, %v4765_v25, %v8452_v47  ;;  %v4107_v28 = vsel %vm650_vm1, 0, %v4106_v1  ;;  %v4610_v63 = vpack.i.b16 %v4079_v20, %v4051_v17 }
 0x388   :  { %4842 = vrot.lane.b32.xlu2 %v4830_v55, %s5566_s29  ;;  %v4135_v50 = vsel %vm650_vm1, 0, %v4134_v21  ;;  %v4612_v54 = vshrl.u32 %v4079_v20, 16  ;;  %v4635_v5 = vshrl.u32 %v4107_v28, 16  ;;  %v5083_v57 = vsel %vm5075_vm3, %v5062_v12, %v8464_v49 }
 0x389   :  { %v4634_v43 = vpack.i.b16 %v4135_v50, %v4107_v28  ;;  %v4636_v38 = vshrl.u32 %v4135_v50, 16  ;;  %v4820_v58 = vunpack.c.l.b16 %v4610_v63  ;;  %v4563_v60 = vshrl.u32 %v8521_v42, 16 }
 0x38a   :  { %v4564_v47 = vshrl.u32 %v8527_v10, 16  ;;  %v4613_v31 = vpack.i.b16 %v4612_v54, %v4611_v19  ;;  %v4587_v22 = vshrl.u32 %v8537_v8, 16  ;;  %v4588_v30 = vshrl.u32 %v4023_v2, 16  ;;  %v8589_v42 = vpop.permute.xlu0 %4794 }
 0x38b   :  { %v4821_v36 = vunpack.c.l.b16 %v4634_v43  ;;  %v4637_v44 = vpack.i.b16 %v4636_v38, %v4635_v5  ;;  %v5081_v55 = vsel %vm5075_vm3, %v5059_v34, %v8382_v62  ;;  %v3928_v19 = vrot.slane %v8457_v23, 4  ;;  %v8625_v63 = vpop.permute.xlu2 %4836 }
 0x38c   :  { %v4565_v17 = vpack.i.b16 %v4564_v47, %v4563_v60  ;;  %v4860_v1 = vunpack.c.l.b16 %v4613_v31  ;;  %v5098_v49 = vsel %vm5092_vm4, %v5081_v55, %v8500_v52  ;;  %v4589_v10 = vpack.i.b16 %v4588_v30, %v4587_v22 }
 0x38d   :  { %v4831_v25 = vpack.c.b16 %v4821_v36, %v4820_v58  ;;  %v4861_v21 = vunpack.c.l.b16 %v4637_v44  ;;  %v3956_v8 = vrot.slane %v8467_v13, 4  ;;  %v3984_v62 = vrot.slane %v8478_v41, 4 }
 0x38e   :  { %v4858_v20 = vunpack.c.l.b16 %v4565_v17  ;;  %v4012_v34 = vrot.slane %v8497_v4, 4  ;;  %v8599_v52 = vsel %vm102_vm0, %v5098_v49, %v8531_v0  ;;  %v4859_v12 = vunpack.c.l.b16 %v4589_v10 }
 0x38f   :  { %5048 = vrot.lane.b32.xlu1 %v5033_v27, %s5571_s7  ;;  %4844 = vrot.lane.b32.xlu0 %v4831_v25, %s5566_s29  ;;  %v4871_v2 = vpack.c.b16 %v4861_v21, %v4860_v1  ;;  %v3929_v28 = vsel %vm650_vm1, %v8460_v59, %v3928_v19  ;;  %v3957_v23 = vsel %vm650_vm1, %v8470_v15, %v3956_v8  ;;  %v4040_v13 = vrot.slane %v8337_v24, 4  ;;  %v8617_v59 = vpop.permute.xlu1 %4796 }
 0x390   :  { %v8608_v27 = vperm.slane %v3929_v28, %v5783_v14  ;;  %v8611_v41 = vperm.slane %v3957_v23, %v5783_v14  ;;  %v3985_v4 = vsel %vm650_vm1, %v8481_v40, %v3984_v62  ;;  %v4013_v0 = vsel %vm650_vm1, %v8508_v53, %v4012_v34 }
 0x391   :  { %4884 = vrot.lane.b32.xlu2 %v4871_v2, %s5567_s30  ;;  %v4870_v50 = vpack.c.b16 %v4859_v12, %v4858_v20  ;;  %v8620_v15 = vperm.slane %v3985_v4, %v5783_v14  ;;  %v8623_v24 = vperm.slane %v4013_v0, %v5783_v14  ;;  %v4041_v43 = vsel %vm650_vm1, %v8340_v16, %v4040_v13 }
 0x392   :  { %v4568_v40 = vpack.i.b16 %v8611_v41, %v8608_v27  ;;  %v4569_v54 = vshrl.u32 %v8608_v27, 16  ;;  %v4570_v53 = vshrl.u32 %v8611_v41, 16  ;;  %v4049_v5 = vperm.slane %v4041_v43, %v5783_v14  ;;  %v8641_v22 = vpop.permute.xlu0 %5040 }
 0x393   :  { %v4592_v38 = vpack.i.b16 %v8623_v24, %v8620_v15  ;;  %v4593_v58 = vshrl.u32 %v8620_v15, 16  ;;  %v4594_v60 = vshrl.u32 %v8623_v24, 16  ;;  %v4068_v47 = vrot.slane %v8345_v33, 4  ;;  %v8661_v0 = vpop.permute.xlu2 %4914 }
 0x394   :  { %v4898_v36 = vunpack.c.l.b16 %v4568_v40  ;;  %v4571_v16 = vpack.i.b16 %v4570_v53, %v4569_v54  ;;  %v4096_v31 = vrot.slane %v8354_v6, 4  ;;  %v4124_v44 = vrot.slane %v8379_v37, 4 }
 0x395   :  { %v4899_v17 = vunpack.c.l.b16 %v4592_v38  ;;  %v4595_v30 = vpack.i.b16 %v4594_v60, %v4593_v58  ;;  %v4069_v55 = vsel %vm650_vm1, %v8348_v9, %v4068_v47  ;;  %v5100_v25 = vsel %vm5092_vm4, %v5083_v57, %v8439_v32 }
 0x396   :  { %v4938_v1 = vunpack.c.l.b16 %v4571_v16  ;;  %v4077_v33 = vperm.slane %v4069_v55, %v5783_v14  ;;  %v4097_v6 = vsel %vm650_vm1, %v8357_v39, %v4096_v31  ;;  %v4125_v37 = vsel %vm650_vm1, %v8390_v18, %v4124_v44 }
 0x397   :  { %4882 = vrot.lane.b32.xlu1 %v4870_v50, %s5567_s30  ;;  %v4910_v21 = vpack.c.b16 %v4899_v17, %v4898_v36  ;;  %v4939_v49 = vunpack.c.l.b16 %v4595_v30  ;;  %v4105_v10 = vperm.slane %v4097_v6, %v5783_v14  ;;  %v4133_v9 = vperm.slane %v4125_v37, %v5783_v14  ;;  %v8657_v8 = vpop.permute.xlu1 %4834 }
 0x398   :  { %v4616_v20 = vpack.i.b16 %v4077_v33, %v4049_v5  ;;  %v5116_v32 = vsel %vm102_vm0, %v5100_v25, %v8550_v29  ;;  %v4617_v57 = vshrl.u32 %v4049_v5, 16  ;;  %v4618_v19 = vshrl.u32 %v4077_v33, 16 }
 0x399   :  { %4922 = vrot.lane.b32.xlu0 %v4910_v21, %s5568_s2  ;;  %v4950_v39 = vpack.c.b16 %v4939_v49, %v4938_v1  ;;  %v4640_v2 = vpack.i.b16 %v4133_v9, %v4105_v10  ;;  %v4641_v62 = vshrl.u32 %v4105_v10, 16  ;;  %v4642_v18 = vshrl.u32 %v4133_v9, 16 }
 0x39a   :  { %v4900_v34 = vunpack.c.l.b16 %v4616_v20  ;;  %v4619_v12 = vpack.i.b16 %v4618_v19, %v4617_v57  ;;  %v4052_v28 = vrot.slane %v4049_v5, 4  ;;  %v4080_v23 = vrot.slane %v4077_v33, 4  ;;  %v8667_v54 = vpop.permute.xlu0 %4874 }
 0x39b   :  { %4962 = vrot.lane.b32.xlu2 %v4950_v39, %s5569_s5  ;;  %v4901_v14 = vunpack.c.l.b16 %v4640_v2  ;;  %v4643_v13 = vpack.i.b16 %v4642_v18, %v4641_v62  ;;  %v4108_v4 = vrot.slane %v4105_v10, 4  ;;  %v4136_v29 = vrot.slane %v4133_v9, 4  ;;  %v9098_v39 = vld [vmem:[#allocation29_spill] sm:$0xff]  ;;  %v4957_v18 = vpop.permute.xlu2 %4956 }
 0x39c   :  { %v4940_v50 = vunpack.c.l.b16 %v4619_v12  ;;  %v8664_v43 = vsel %vm650_vm1, 0, %v4052_v28  ;;  %v4081_v40 = vsel %vm650_vm1, 0, %v4080_v23  ;;  %v5133_v36 = vsel %vm5125_vm5, %v5116_v32, %v8565_v3 }
 0x39d   :  { %v4911_v53 = vpack.c.b16 %v4901_v14, %v4900_v34  ;;  %v4941_v5 = vunpack.c.l.b16 %v4643_v13  ;;  %v4109_v38 = vsel %vm650_vm1, 0, %v4108_v4  ;;  %v4137_v58 = vsel %vm650_vm1, 0, %v4136_v29  ;;  %v9099_v29 = vld [vmem:[#allocation18_spill] sm:$0xff] }
 0x39e   :  { %v4622_v60 = vpack.i.b16 %v4081_v40, %v8664_v43  ;;  %v4646_v47 = vpack.i.b16 %v4137_v58, %v4109_v38  ;;  %v3940_v16 = vrot.slane %v8608_v27, 4  ;;  %v3968_v44 = vrot.slane %v8611_v41, 4 }
 0x39f   :  { %4924 = vrot.lane.b32.xlu1 %v4911_v53, %s5568_s2  ;;  %v4951_v31 = vpack.c.b16 %v4941_v5, %v4940_v50  ;;  %v3996_v17 = vrot.slane %v8620_v15, 4  ;;  %v4024_v30 = vrot.slane %v8623_v24, 4  ;;  %v8680_v33 = vpop.permute.xlu1 %4876  ;;  %v5131_v41 = vsel %vm5125_vm5, %v8599_v52, %v8474_v56  ;;  %v9100_v50 = vld [vmem:[#allocation50_spill] sm:$0xff]  ;;  %v9101_v5 = vld [vmem:[#allocation51_spill] sm:$0xff] }
 0x3a0   :  { %v4980_v55 = vunpack.c.l.b16 %v4622_v60  ;;  %v4981_v25 = vunpack.c.l.b16 %v4646_v47  ;;  %v3941_v1 = vsel %vm650_vm1, 0, %v3940_v16  ;;  %v3969_v3 = vsel %vm650_vm1, 0, %v3968_v44  ;;  %v9103_v44 = vld [vmem:[#allocation16_spill] sm:$0xff] }
 0x3a1   :  { %4964 = vrot.lane.b32.xlu0 %v4951_v31, %s5569_s5  ;;  %v3997_v27 = vsel %vm650_vm1, 0, %v3996_v17  ;;  %v4025_v6 = vsel %vm650_vm1, 0, %v4024_v30  ;;  %v4574_v24 = vpack.i.b16 %v3969_v3, %v3941_v1  ;;  %v5148_v21 = vsel %vm5142_vm6, %v5131_v41, %v8578_v11 }
 0x3a2   :  { %v4991_v15 = vpack.c.b16 %v4981_v25, %v4980_v55  ;;  %v4598_v37 = vpack.i.b16 %v4025_v6, %v3997_v27  ;;  %v4575_v49 = vshrl.u32 %v3941_v1, 16  ;;  %v4576_v10 = vshrl.u32 %v3969_v3, 16  ;;  %v4917_v52 = vpop.permute.xlu0 %4916 }
 0x3a3   :  { %v4599_v9 = vshrl.u32 %v3997_v27, 16  ;;  %v4600_v20 = vshrl.u32 %v4025_v6, 16  ;;  %v4978_v32 = vunpack.c.l.b16 %v4574_v24  ;;  %v4364_v19 = vpack.i.b16 %v7626_v45, %v7617_v48 }
 0x3a4   :  { %5004 = vrot.lane.b32.xlu2 %v4991_v15, %s5570_s6  ;;  %v4979_v57 = vunpack.c.l.b16 %v4598_v37  ;;  %v4388_v56 = vpack.i.b16 %v9098_v39, %v7634_v51  ;;  %v4577_v2 = vpack.i.b16 %v4576_v10, %v4575_v49  ;;  %v4623_v11 = vshrl.u32 %v8664_v43, 16  ;;  %v9102_v43 = vld [vmem:[#allocation55_spill] sm:$0xff]  ;;  %v5035_v15 = vpop.permute.xlu2 %5034  ;;  %v9104_v39 = vld [vmem:[#allocation58_spill] sm:$0xff] }
 0x3a5   :  { %v4601_v62 = vpack.i.b16 %v4600_v20, %v4599_v9  ;;  %v4746_v12 = vunpack.c.l.b16 %v4364_v19  ;;  %v5167_v23 = vsel %vm5159_vm7, %v5148_v21, %v8576_v35  ;;  %v4624_v48 = vshrl.u32 %v4081_v40, 16 }
 0x3a6   :  { %v4990_v34 = vpack.c.b16 %v4979_v57, %v4978_v32  ;;  %v4747_v28 = vunpack.c.l.b16 %v4388_v56  ;;  %v5018_v14 = vunpack.c.l.b16 %v4577_v2  ;;  %5234 = vmatpush.bf16.msra.mxu2 %v5167_v23  ;;  %v4647_v45 = vshrl.u32 %v4109_v38, 16  ;;  %v9105_v56 = vld [vmem:[#allocation59_spill] sm:$0xff] }
 0x3a7   :  { %v5019_v13 = vunpack.c.l.b16 %v4601_v62  ;;  %v4648_v4 = vshrl.u32 %v4137_v58, 16  ;;  %v4412_v53 = vpack.i.b16 %v9100_v50, %v9099_v29  ;;  %v4436_v60 = vpack.i.b16 %v9102_v43, %v9101_v5  ;;  %v4955_v47 = vpop.permute.xlu1 %4954  ;;  %v9106_v62 = vld [vmem:[#allocation56_spill] sm:$0xff]  ;;  %v9110_v5 = vld [vmem:[#allocation53_spill] sm:$0xff] }
 0x3a8   :  { %5002 = vrot.lane.b32.xlu1 %v4990_v34, %s5570_s6  ;;  %v4762_v51 = vpack.c.b16 %v4747_v28, %v4746_v12  ;;  %v4625_v31 = vpack.i.b16 %v4624_v48, %v4623_v11  ;;  %v5150_v35 = vsel %vm5142_vm6, %v5133_v36, %v9103_v44  ;;  %v4676_v2 = vpack.i.b16 %v9105_v56, %v9104_v39  ;;  %v9111_v43 = vld [vmem:[#allocation57_spill] sm:$0xff] }
 0x3a9   :  { %v5030_v16 = vpack.c.b16 %v5019_v13, %v5018_v14  ;;  %v4649_v38 = vpack.i.b16 %v4648_v4, %v4647_v45  ;;  %v4748_v17 = vunpack.c.l.b16 %v4412_v53  ;;  %v4749_v30 = vunpack.c.l.b16 %v4436_v60  ;;  %v9109_v4 = vld [vmem:[#allocation49_spill] sm:$0xff] }
 0x3aa   :  { %v5053_v40 = vsel %vm5050_vm2, %v4762_v51, %v8589_v42  ;;  %v5170_v58 = vsel %vm5159_vm7, %v5150_v35, %v8641_v22  ;;  %v5020_v25 = vunpack.c.l.b16 %v4625_v31  ;;  %v4995_v27 = vpop.permute.xlu0 %4994  ;;  %v9108_v51 = vld [vmem:[#allocation54_spill] sm:$0xff]  ;;  %v4700_v60 = vpack.i.b16 %v9111_v43, %v9110_v5  ;;  %v5188_v5 = vld [vmem:[#allocation9 + $0x10] sm:$0xf] }
 0x3ab   :  { %5042 = vrot.lane.b32.xlu0 %v5030_v16, %s5571_s7  ;;  %v5077_v55 = vsel %vm5075_vm3, %v5053_v40, %v8657_v8  ;;  %v5021_v1 = vunpack.c.l.b16 %v4649_v38  ;;  %v4763_v3 = vpack.c.b16 %v4749_v30, %v4748_v17  ;;  %5250 = vmatpush.bf16.msra.mxu3 %v5170_v58  ;;  %v4724_v29 = vpack.i.b16 %v9109_v4, %v9108_v51  ;;  %v5186_v58 = vld [vmem:[#allocation9 + $0x8] sm:$0xf] }
 0x3ac   :  { %v5094_v36 = vsel %vm5092_vm4, %v5077_v55, %v8667_v54  ;;  %v4809_v32 = vpop.permute.xlu2 %4808  ;;  %v4760_v35 = vunpack.c.l.b16 %v4700_v60  ;;  %v5187_v55 = vld [vmem:[#allocation9 + $0xc] sm:$0xf]  ;;  %5396 = vmatmul.msk.bf16.vlgmr.msra.gmra.mxu2 %vm102_vm0, %v5186_v58  ;;  %v4628_v39 = vpack.i.b16 %v8420_v46, %v8396_v26 }
 0x3ad   :  { %v5110_v42 = vsel %vm102_vm0, %v5094_v36, %v8661_v0  ;;  %v5031_v6 = vpack.c.b16 %v5021_v1, %v5020_v25  ;;  %v5056_v41 = vsel %vm5050_vm2, %v4763_v3, %v8617_v59  ;;  %v4761_v16 = vunpack.c.l.b16 %v4724_v29 }
 0x3ae   :  { %v5127_v22 = vsel %vm5125_vm5, %v5110_v42, %v4955_v47  ;;  %v5079_v8 = vsel %vm5075_vm3, %v5056_v41, %v8625_v63  ;;  %5397 = vmatmul.msk.bf16.vlgmr.msra.gmra.mxu3 %vm102_vm0, %v5187_v55  ;;  %v5184_v41 = vld [vmem:[#allocation9] sm:$0xf] }
 0x3af   :  { %v5144_v24 = vsel %vm5142_vm6, %v5127_v22, %v4995_v27  ;;  %v5096_v54 = vsel %vm5092_vm4, %v5079_v8, %v8680_v33  ;;  %v4997_v0 = vpop.permute.xlu1 %4996  ;;  %v4769_v17 = vpack.c.b16 %v4761_v16, %v4760_v35  ;;  %v5185_v22 = vld [vmem:[#allocation9 + $0x4] sm:$0xf] }
 0x3b0   :  { %5044 = vrot.lane.b32.xlu1 %v5031_v6, %s5571_s7  ;;  %v5161_v37 = vsel %vm5159_vm7, %v5144_v24, %v5035_v15  ;;  %v5112_v21 = vsel %vm102_vm0, %v5096_v54, %v4917_v52  ;;  %v9107_v52 = vld [vmem:[#allocation52_spill] sm:$0xff] }
 0x3b1   :  { %5202 = vmatpush.bf16.msra.mxu0 %v5161_v37  ;;  %v5129_v59 = vsel %vm5125_vm5, %v5112_v21, %v4957_v18  ;;  %v4652_v11 = vpack.i.b16 %v9107_v52, %v9106_v62  ;;  %v4759_v18 = vunpack.c.l.b16 %v4676_v2  ;;  %v5074_v25 = vsel %vm5050_vm2, %v4769_v17, %v4809_v32  ;;  %v5191_v21 = vld [vmem:[#allocation9 + $0x1c] sm:$0xf] }
 0x3b2   :  { %v5146_v49 = vsel %vm5142_vm6, %v5129_v59, %v4997_v0  ;;  %v5037_v10 = vpop.permute.xlu0 %5036  ;;  %v5190_v0 = vld [vmem:[#allocation9 + $0x18] sm:$0xf]  ;;  %v9112_v59 = vld [vmem:[#allocation14_spill] sm:$0xff]  ;;  %v4604_v62 = vpack.i.b16 %v8385_v7, %v8374_v61 }
 0x3b3   :  { %v5164_v63 = vsel %vm5159_vm7, %v5146_v49, %v5037_v10  ;;  %v4758_v12 = vunpack.c.l.b16 %v4652_v11  ;;  %v9113_v49 = vld [vmem:[#allocation15_spill] sm:$0xff]  ;;  %v4757_v11 = vunpack.c.l.b16 %v4628_v39 }
 0x3b4   :  { %5218 = vmatpush.bf16.msra.mxu1 %v5164_v63  ;;  %v4887_v33 = vpop.permute.xlu2 %4886  ;;  %5394 = vmatmul.msk.bf16.vlgmr.msra.gmra.mxu0 %vm102_vm0, %v5184_v41  ;;  %v4580_v10 = vpack.i.b16 %v9113_v49, %v9112_v59  ;;  %v9114_v63 = vld [vmem:[#allocation47_spill] sm:$0xff] }
 0x3b5   :  { %v4768_v28 = vpack.c.b16 %v4759_v18, %v4758_v12  ;;  %v4756_v18 = vunpack.c.l.b16 %v4604_v62 }
 0x3b7   :  { %v4807_v20 = vpop.permute.xlu1 %4806  ;;  %5395 = vmatmul.msk.bf16.vlgmr.msra.gmra.mxu1 %vm102_vm0, %v5185_v22 }
 0x3b8   :  { %v5071_v13 = vsel %vm5050_vm2, %v4768_v28, %v4807_v20 }
 0x3ba   :  { %v4847_v9 = vpop.permute.xlu0 %4846 }
 0x3bb   :  { %v5089_v48 = vsel %vm5075_vm3, %v5071_v13, %v4847_v9  ;;  %v9115_v9 = vld [vmem:[#allocation48_spill] sm:$0xff] }
 0x3bc   :  { %v4929_v14 = vpop.permute.xlu2 %4928  ;;  %v5106_v50 = vsel %vm5092_vm4, %v5089_v48, %v4887_v33  ;;  %v4556_v20 = vpack.i.b16 %v9115_v9, %v9114_v63 }
 0x3be   :  { %v4754_v33 = vunpack.c.l.b16 %v4556_v20 }
 0x3bf   :  { %v4849_v19 = vpop.permute.xlu1 %4848 }
 0x3c0   :  { %v5091_v1 = vsel %vm5075_vm3, %v5074_v25, %v4849_v19 }
 0x3c2   :  { %v4889_v57 = vpop.permute.xlu0 %4888 }
 0x3c3   :  { %v5108_v27 = vsel %vm5092_vm4, %v5091_v1, %v4889_v57  ;;  %v4755_v57 = vunpack.c.l.b16 %v4580_v10 }
 0x3c4   :  { %v5007_v31 = vpop.permute.xlu2 %5006  ;;  %v5124_v42 = vsel %vm102_vm0, %v5108_v27, %v4929_v14  ;;  %v4767_v14 = vpack.c.b16 %v4757_v11, %v4756_v18 }
 0x3c5   :  { %v4766_v2 = vpack.c.b16 %v4755_v57, %v4754_v33 }
 0x3c7   :  { %v4927_v23 = vpop.permute.xlu1 %4926 }
 0x3c8   :  { %v5122_v53 = vsel %vm102_vm0, %v5106_v50, %v4927_v23 }
 0x3ca   :  { %v4967_v34 = vpop.permute.xlu0 %4966 }
 0x3cb   :  { %v5139_v44 = vsel %vm5125_vm5, %v5122_v53, %v4967_v34 }
 0x3cc   :  { %v5156_v38 = vsel %vm5142_vm6, %v5139_v44, %v5007_v31  ;;  %v4805_v36 = vpop.permute.xlu2 %4804  ;;  %v5189_v31 = vld [vmem:[#allocation9 + $0x14] sm:$0xf] }
 0x3cd   :  { %v5068_v13 = vsel %vm5050_vm2, %v4767_v14, %v4805_v36 }
 0x3cf   :  { %v4969_v47 = vpop.permute.xlu1 %4968 }
 0x3d0   :  { %v5141_v6 = vsel %vm5125_vm5, %v5124_v42, %v4969_v47 }
 0x3d2   :  { %v5009_v45 = vpop.permute.xlu0 %5008 }
 0x3d3   :  { %v5158_v15 = vsel %vm5142_vm6, %v5141_v6, %v5009_v45 }
 0x3e2   :  { %v4843_v37 = vpop.permute.xlu2 %4842 }
 0x3eb   :  { %v4885_v56 = vpop.permute.xlu2 %4884 }
 0x3f2   :  { %v5047_v40 = vpop.permute.xlu0 %5046 }
 0x3f3   :  { %v5179_v30 = vsel %vm5159_vm7, %v5156_v38, %v5047_v40 }
 0x3f4   :  { %5298 = vmatpush.bf16.msrb.mxu2 %v5179_v30 }
 0x3f5   :  { %v4963_v48 = vpop.permute.xlu2 %4962 }
 0x3f7   :  { %5400 = vmatmul.msk.bf16.vlgmr.msrb.gmra.mxu2 %vm102_vm0, %v5190_v0 }
 0x3f9   :  { %v4803_v3 = vpop.permute.xlu1 %4802 }
 0x3fa   :  { %v5065_v52 = vsel %vm5050_vm2, %v4766_v2, %v4803_v3 }
 0x3fb   :  { %v5085_v12 = vsel %vm5075_vm3, %v5065_v52, %v4843_v37 }
 0x3fe   :  { %v5005_v43 = vpop.permute.xlu2 %5004 }
 0x401   :  { %v5049_v8 = vpop.permute.xlu1 %5048  ;;  %v4845_v54 = vpop.permute.xlu0 %4844 }
 0x402   :  { %v5182_v24 = vsel %vm5159_vm7, %v5158_v15, %v5049_v8  ;;  %v5087_v46 = vsel %vm5075_vm3, %v5068_v13, %v4845_v54 }
 0x403   :  { %5314 = vmatpush.bf16.msrb.mxu3 %v5182_v24  ;;  %v5104_v7 = vsel %vm5092_vm4, %v5087_v46, %v4885_v56 }
 0x406   :  { %5401 = vmatmul.msk.bf16.vlgmr.msrb.gmra.mxu3 %vm102_vm0, %v5191_v21 }
 0x409   :  { %v4883_v32 = vpop.permute.xlu1 %4882 }
 0x40a   :  { %v5102_v23 = vsel %vm5092_vm4, %v5085_v12, %v4883_v32 }
 0x40b   :  { %v4923_v19 = vpop.permute.xlu0 %4922 }
 0x40c   :  { %v5118_v26 = vsel %vm102_vm0, %v5102_v23, %v4923_v19 }
 0x40d   :  { %v5135_v61 = vsel %vm5125_vm5, %v5118_v26, %v4963_v48 }
 0x411   :  { %v4925_v34 = vpop.permute.xlu1 %4924 }
 0x412   :  { %v5120_v4 = vsel %vm102_vm0, %v5104_v7, %v4925_v34 }
 0x413   :  { %v4965_v28 = vpop.permute.xlu0 %4964 }
 0x414   :  { %v5137_v53 = vsel %vm5125_vm5, %v5120_v4, %v4965_v28 }
 0x415   :  { %v5154_v47 = vsel %vm5142_vm6, %v5137_v53, %v5005_v43 }
 0x41a   :  { %v5003_v45 = vpop.permute.xlu1 %5002 }
 0x41b   :  { %v5152_v51 = vsel %vm5142_vm6, %v5135_v61, %v5003_v45 }
 0x41d   :  { %v5043_v29 = vpop.permute.xlu0 %5042 }
 0x41e   :  { %v5173_v50 = vsel %vm5159_vm7, %v5152_v51, %v5043_v29 }
 0x41f   :  { %5266 = vmatpush.bf16.msrb.mxu0 %v5173_v50 }
 0x422   :  { %v5045_v60 = vpop.permute.xlu1 %5044  ;;  %5398 = vmatmul.msk.bf16.vlgmr.msrb.gmra.mxu0 %vm102_vm0, %v5188_v5 }
 0x423   :  { %v5176_v16 = vsel %vm5159_vm7, %v5154_v47, %v5045_v60 }
 0x424   :  { %5282 = vmatpush.bf16.msrb.mxu1 %v5176_v16 }
 0x427   :  { %5399 = vmatmul.msk.bf16.vlgmr.msrb.gmra.mxu1 %vm102_vm0, %v5189_v31 }
 0x42f   :  { %v5236_v44 = vpop.f32.mrf.mxu2 }
 0x430   :  { %5323 = vst.msk [vmem:[#allocation10 + $0x10] sm:$0xff] %vm5320_vm8, %v5236_v44 }
 0x431   :  { %v5252_v35 = vpop.f32.mrf.mxu3  ;;  %v5204_v40 = vpop.f32.mrf.mxu0 }
 0x432   :  { %5324 = vst.msk [vmem:[#allocation10 + $0x18] sm:$0xff] %vm5320_vm8, %v5252_v35 }
 0x433   :  { %5321 = vst.msk [vmem:[#allocation10] sm:$0xff] %vm5320_vm8, %v5204_v40 }
 0x434   :  { %v5220_v38 = vpop.f32.mrf.mxu1 }
 0x435   :  { %5322 = vst.msk [vmem:[#allocation10 + $0x8] sm:$0xff] %vm5320_vm8, %v5220_v38 }
 0x437   :  { %v5238_v17 = vpop.f32.mrf.mxu2 }
 0x439   :  { %v5254_v30 = vpop.f32.mrf.mxu3  ;;  %v5206_v58 = vpop.f32.mrf.mxu0 }
 0x43c   :  { %v5222_v55 = vpop.f32.mrf.mxu1 }
 0x47a   :  { %v5300_v25 = vpop.f32.mrf.mxu2 }
 0x47b   :  { %5327 = vst.msk [vmem:[#allocation10 + $0x30] sm:$0xff] %vm5320_vm8, %v5300_v25 }
 0x482   :  { %v5302_v3 = vpop.f32.mrf.mxu2 }
 0x489   :  { %v5316_v1 = vpop.f32.mrf.mxu3 }
 0x48a   :  { %5328 = vst.msk [vmem:[#allocation10 + $0x38] sm:$0xff] %vm5320_vm8, %v5316_v1 }
 0x491   :  { %v5318_v36 = vpop.f32.mrf.mxu3 }
 0x49f   :  { %v5268_v27 = vpop.f32.mrf.mxu0 }
 0x4a0   :  { %5325 = vst.msk [vmem:[#allocation10 + $0x20] sm:$0xff] %vm5320_vm8, %v5268_v27 }
 0x4a4   :  { %v5284_v42 = vpop.f32.mrf.mxu1 }
 0x4a5   :  { %5326 = vst.msk [vmem:[#allocation10 + $0x28] sm:$0xff] %vm5320_vm8, %v5284_v42 }
 0x4a6   :  { %5341 = dma.vmem_to_hbm [thread:$0]  %s5334_s10, 1024, %s5336_s8, [#allocation6], %s5573_s11, %s5573_s11, %s5566_s29  }
 0x4a7   :  { %v5270_v6 = vpop.f32.mrf.mxu0 }
 0x4ac   :  { %v5286_v41 = vpop.f32.mrf.mxu1 }
 0x4ad   :  { %5542 = dma.done.wait [#allocation6], 1024  }
 0x4ae   :  { %5543 = vsyncadd [#allocation6], 4294966272 }
 0x4af   :  { %5346 = vsyncpa [#allocation5], 1 }
 0x4b0   :  { %5347 = vsyncpa [#allocation8], 1 }
 0x4b1   :  { %5348 = vsyncpa [#allocation6], 1 }

</bundles_post_ra>
